<compile_context>
chip_gen: v7x
topology: tpu7x:2x2x1
jax: 0.10.0
libtpu: 0.0.40
codegen_flags: <defaults>
</compile_context>

<pallas_src>
import numpy as np

import jax
import jax.numpy as jnp
from jax.experimental import pallas as pl
from jax.experimental.pallas import tpu as pltpu


# ----------------------------------------------------------------------------
# The single fused kernel.
# Activation layout for all conv-like stages: rows = (b, h), lanes = (c, w).
# Each conv-like stage consumes (L, G, bias) refs; each plain FC stage (W, b).
# ----------------------------------------------------------------------------
def _fused_autoencoder_kernel(*refs):
    out_ref, mu_ref, logsq_ref = refs[-3:]
    x_ref = refs[0]
    it = iter(refs[1:-3])

    def conv_like(x, ntaps, act):
        L, G, b = next(it), next(it), next(it)
        acc = b[...]                        # (1, N) or (M, N); broadcasts over rows
        for i in range(ntaps):
            acc = acc + jnp.dot(
                jnp.dot(L[i], x, preferred_element_type=jnp.float32),
                G[i], preferred_element_type=jnp.float32)
        if act == "relu":
            acc = jnp.maximum(acc, 0.0)
        elif act == "sigmoid":
            # sigmoid via tanh -> EUP slot, numerically stable
            acc = 0.5 * (jnp.tanh(0.5 * acc) + 1.0)
        return acc

    def fc(x, act):
        W, b = next(it), next(it)
        y = jnp.dot(x, W[...], preferred_element_type=jnp.float32) + b[...]
        if act == "relu":
            y = jnp.maximum(y, 0.0)
        return y

    x = x_ref[...]                          # (B*32, 32)

    # ---- encoder ----
    h = conv_like(x, 3, "relu")             # conv1: (B*16, 4*16)
    h = conv_like(h, 3, "relu")             # conv2: (B*8,  8*8)
    h = conv_like(h, 3, "relu")             # conv3: (B*4,  16*4)
    h = conv_like(h, 5, "relu")             # conv4: (B*2,  16*2)
    h6 = conv_like(h, 2, "relu")            # .view(-1,64) + fc6: (B, 20)

    muls = fc(h6, None)                     # (B, 4) = [mu | log_sq]
    mu_ref[...] = muls[:, 0:2].astype(mu_ref.dtype)
    logsq_ref[...] = muls[:, 2:4].astype(logsq_ref.dtype)

    # point_from_q: mu + exp(log_sq/2) * eps * 0  ==  mu exactly (per the module)
    z = muls[:, 0:2]

    # ---- decoder ----
    d7 = fc(z, "relu")                      # fc7: (B, 50)
    x9 = conv_like(d7, 8, "relu")           # fc8 + .view(-1,1,8,8): (8*B, 8), rows (h, b)
    d = conv_like(x9, 4, "relu")            # deconv9:  (B*16, 16*16)
    d = conv_like(d, 4, "relu")             # deconv10: (B*17, 8*17)
    d = conv_like(d, 4, "relu")             # deconv11: (B*16, 4*16)
    d = conv_like(d, 4, "sigmoid")          # deconv12: (B*32, 1*32)
    out_ref[...] = d.astype(out_ref.dtype)


# ----------------------------------------------------------------------------
# Parameters: PyTorch-native shapes + one-time conversion to L/G/bias constants
# ----------------------------------------------------------------------------
def _uniform(key, shape, fan_in):
    bound = 1.0 / jnp.sqrt(jnp.float32(fan_in))
    return jax.random.uniform(key, shape, jnp.float32, -bound, bound)


def init_params(key):
    """Parameters in PyTorch-native shapes (Conv2d: (OC,IC,k,k); Linear: (out,in);
    ConvTranspose2d: (IC,OC,k,k)), deterministic uniform init."""
    ks = iter(jax.random.split(key, 32))
    p = {}

    def conv(name, oc, ic, k):
        p[name + "_w"] = _uniform(next(ks), (oc, ic, k, k), ic * k * k)
        p[name + "_b"] = _uniform(next(ks), (oc,), ic * k * k)

    def deconv(name, ic, oc, k):
        p[name + "_w"] = _uniform(next(ks), (ic, oc, k, k), oc * k * k)
        p[name + "_b"] = _uniform(next(ks), (oc,), oc * k * k)

    def linear(name, fout, fin):
        p[name + "_w"] = _uniform(next(ks), (fout, fin), fin)
        p[name + "_b"] = _uniform(next(ks), (fout,), fin)

    conv("conv1", 4, 1, 3)
    conv("conv2", 8, 4, 3)
    conv("conv3", 16, 8, 3)
    conv("conv4", 16, 16, 5)
    linear("fc6", 20, 64)
    linear("mu", 2, 20)
    linear("logsq", 2, 20)
    linear("fc7", 50, 2)
    linear("fc8", 64, 50)
    deconv("deconv9", 1, 16, 4)
    deconv("deconv10", 16, 8, 4)
    deconv("deconv11", 8, 4, 4)
    deconv("deconv12", 4, 1, 4)
    return p


def prepare_params(p, batch):
    """One-time (outside jit) conversion of PyTorch-shaped params into the
    per-tap (L_i, G_i, bias_row) constants consumed by the fused kernel.

    Conv2d(OC,C,k,k), stride s, pad pd, input (H,W):
        Y[(b,oh),(oc,ow)] = sum_i (L_i @ X @ G_i) + bias
        L_i[(b,oh),(b,h)]   = 1  iff h == s*oh - pd + i
        G_i[(c,w),(oc,ow)]  = W[oc,c,i, w - s*ow + pd]   (0 <= j < k else 0)
    ConvTranspose2d(IC,OC,k,k):
        L_i[(b,oh),(b,h)]   = 1  iff oh == s*h + i - pd
        G_i[(c,w),(oc,ow)]  = Wt[c,oc,i, ow + pd - s*w]  (0 <= j < k else 0)
    """
    B = batch
    consts = []

    def to_np(a):
        return np.asarray(a, dtype=np.float32)

    def add_conv(wname, bname, H, W, stride, pad):
        w = to_np(p[wname]); b = to_np(p[bname])
        OC, C, k, _ = w.shape
        OH = (H + 2 * pad - k) // stride + 1
        OW = (W + 2 * pad - k) // stride + 1
        L = np.zeros((k, B * OH, B * H), np.float32)
        G = np.zeros((k, C * W, OC * OW), np.float32)
        for i in range(k):
            for bb in range(B):
                for oh in range(OH):
                    h = stride * oh - pad + i
                    if 0 <= h < H:
                        L[i, bb * OH + oh, bb * H + h] = 1.0
            for ow in range(OW):
                for j in range(k):
                    w_in = stride * ow - pad + j
                    if 0 <= w_in < W:
                        for c in range(C):
                            G[i, c * W + w_in, ow::OW] = w[:, c, i, j]
        brow = np.repeat(b, OW).reshape(1, OC * OW)
        consts.extend([jnp.asarray(L), jnp.asarray(G), jnp.asarray(brow)])

    def add_deconv(wname, bname, H, W, stride, pad, row_order="bh"):
        wt = to_np(p[wname]); b = to_np(p[bname])
        IC, OC, k, _ = wt.shape
        OH = (H - 1) * stride - 2 * pad + k
        OW = (W - 1) * stride - 2 * pad + k
        L = np.zeros((k, B * OH, B * H), np.float32)
        G = np.zeros((k, IC * W, OC * OW), np.float32)
        for i in range(k):
            for bb in range(B):
                for h in range(H):
                    oh = stride * h + i - pad
                    if 0 <= oh < OH:
                        col = (bb * H + h) if row_order == "bh" else (h * B + bb)
                        L[i, bb * OH + oh, col] = 1.0
            for ow in range(OW):
                for w_in in range(W):
                    j = ow + pad - stride * w_in
                    if 0 <= j < k:
                        for c in range(IC):
                            G[i, c * W + w_in, ow::OW] = wt[c, :, i, j]
        brow = np.repeat(b, OW).reshape(1, OC * OW)
        consts.extend([jnp.asarray(L), jnp.asarray(G), jnp.asarray(brow)])

    # ---- encoder convs ----
    add_conv("conv1_w", "conv1_b", 32, 32, 2, 1)    # -> 16x16, OC=4
    add_conv("conv2_w", "conv2_b", 16, 16, 2, 1)    # -> 8x8,   OC=8
    add_conv("conv3_w", "conv3_b", 8, 8, 2, 1)      # -> 4x4,   OC=16
    add_conv("conv4_w", "conv4_b", 4, 4, 2, 2)      # -> 2x2,   OC=16

    # ---- flatten (PyTorch .view(-1,64): f = oc*4 + oh*2 + ow) + fc6, 2-tap stage ----
    W6 = to_np(p["fc6_w"]); b6 = to_np(p["fc6_b"])
    OH4, OW4, OC4, N6 = 2, 2, 16, 20
    L6 = np.zeros((OH4, B, B * OH4), np.float32)
    G6 = np.zeros((OH4, OC4 * OW4, N6), np.float32)
    for oh in range(OH4):
        for bb in range(B):
            L6[oh, bb, bb * OH4 + oh] = 1.0
        for oc in range(OC4):
            for ow in range(OW4):
                G6[oh, oc * OW4 + ow, :] = W6[:, oc * 4 + oh * 2 + ow]
    consts.extend([jnp.asarray(L6), jnp.asarray(G6), jnp.asarray(b6.reshape(1, N6))])

    # ---- mu / log_sq as one concatenated (20, 4) weight ----
    Wml = np.concatenate([to_np(p["mu_w"]).T, to_np(p["logsq_w"]).T], axis=1)
    bml = np.concatenate([to_np(p["mu_b"]), to_np(p["logsq_b"])]).reshape(1, 4)
    consts.extend([jnp.asarray(Wml), jnp.asarray(bml)])

    # ---- fc7 ----
    consts.extend([jnp.asarray(to_np(p["fc7_w"]).T),
                   jnp.asarray(to_np(p["fc7_b"]).reshape(1, 50))])

    # ---- fc8 + .view(-1,1,8,8) as an 8-tap stage; output rows ordered (h, b) ----
    W8 = to_np(p["fc8_w"]); b8 = to_np(p["fc8_b"])
    L8 = np.zeros((8, 8 * B, B), np.float32)
    G8 = np.zeros((8, 50, 8), np.float32)
    b8f = np.zeros((8 * B, 8), np.float32)
    for hh in range(8):
        for bb in range(B):
            L8[hh, hh * B + bb, bb] = 1.0
            b8f[hh * B + bb, :] = b8[hh * 8:(hh + 1) * 8]
        G8[hh] = W8[hh * 8:(hh + 1) * 8, :].T
    consts.extend([jnp.asarray(L8), jnp.asarray(G8), jnp.asarray(b8f)])

    # ---- decoder (deconv9 absorbs the (h, b) row order of the fc8 stage) ----
    add_deconv("deconv9_w", "deconv9_b", 8, 8, 2, 1, row_order="hb")   # -> 16x16, OC=16
    add_deconv("deconv10_w", "deconv10_b", 16, 16, 1, 1)               # -> 17x17, OC=8
    add_deconv("deconv11_w", "deconv11_b", 17, 17, 1, 2)               # -> 16x16, OC=4
    add_deconv("deconv12_w", "deconv12_b", 16, 16, 2, 1)               # -> 32x32, OC=1

    return {"consts": tuple(consts)}


# ----------------------------------------------------------------------------
# Forward pass (deviation=True): ONE pallas_call, two free layout reshapes
# ----------------------------------------------------------------------------
def autoencoder_forward(prep, x_nchw):
    B, C, H, W = x_nchw.shape                       # (B, 1, 32, 32)
    xl = x_nchw.transpose(0, 2, 1, 3).reshape(B * H, C * W).astype(jnp.float32)

    args = (xl,) + tuple(prep["consts"])
    in_specs = [pl.BlockSpec(a.shape, lambda i, n=a.ndim: (0,) * n) for a in args]
    out_shape = (jax.ShapeDtypeStruct((B * 32, 32), jnp.float32),
                 jax.ShapeDtypeStruct((B, 2), jnp.float32),
                 jax.ShapeDtypeStruct((B, 2), jnp.float32))
    out_specs = (pl.BlockSpec((B * 32, 32), lambda i: (0, 0)),
                 pl.BlockSpec((B, 2), lambda i: (0, 0)),
                 pl.BlockSpec((B, 2), lambda i: (0, 0)))

    img, mu, log_sq = pl.pallas_call(
        _fused_autoencoder_kernel,
        out_shape=out_shape,
        grid=(1,),
        in_specs=in_specs,
        out_specs=out_specs,
        compiler_params=pltpu.CompilerParams(dimension_semantics=("arbitrary",)),
    )(*args)

    out = img.reshape(B, 32, 1, 32).transpose(0, 2, 1, 3)   # (B, 1, 32, 32)
    return out, mu, log_sq


if __name__ == "__main__":
    key = jax.random.PRNGKey(0)
    pkey, xkey = jax.random.split(key)

    B = 2
    params = init_params(pkey)
    prep = prepare_params(params, batch=B)    # one-time layout prep, outside jit

    x = jax.random.normal(xkey, (B, 1, 32, 32), jnp.float32)

    fwd = jax.jit(autoencoder_forward)
    out, mu, log_sq = fwd(prep, x)
    jax.block_until_ready((out, mu, log_sq))

    assert out.shape == (B, 1, 32, 32)
    assert mu.shape == (B, 2)
    assert log_sq.shape == (B, 2)
    # sigmoid output must lie in [0, 1]; mu/log_sq must be finite
    assert bool(jnp.all((out >= 0.0) & (out <= 1.0)))
    assert bool(jnp.all(jnp.isfinite(mu))) and bool(jnp.all(jnp.isfinite(log_sq)))
    print("KERNEL_OK")
</pallas_src>

<mosaic_0001>
module attributes {stable_mosaic.version = 11 : i64} {
  func.func @_fused_autoencoder_kernel(%arg0: i32, %arg1: memref<64x32xf32, #tpu.memory_space<vmem>>, %arg2: memref<3x32x64xf32, #tpu.memory_space<vmem>>, %arg3: memref<3x32x64xf32, #tpu.memory_space<vmem>>, %arg4: memref<1x64xf32, #tpu.memory_space<vmem>>, %arg5: memref<3x16x32xf32, #tpu.memory_space<vmem>>, %arg6: memref<3x64x64xf32, #tpu.memory_space<vmem>>, %arg7: memref<1x64xf32, #tpu.memory_space<vmem>>, %arg8: memref<3x8x16xf32, #tpu.memory_space<vmem>>, %arg9: memref<3x64x64xf32, #tpu.memory_space<vmem>>, %arg10: memref<1x64xf32, #tpu.memory_space<vmem>>, %arg11: memref<5x4x8xf32, #tpu.memory_space<vmem>>, %arg12: memref<5x64x32xf32, #tpu.memory_space<vmem>>, %arg13: memref<1x32xf32, #tpu.memory_space<vmem>>, %arg14: memref<2x2x4xf32, #tpu.memory_space<vmem>>, %arg15: memref<2x32x20xf32, #tpu.memory_space<vmem>>, %arg16: memref<1x20xf32, #tpu.memory_space<vmem>>, %arg17: memref<20x4xf32, #tpu.memory_space<vmem>>, %arg18: memref<1x4xf32, #tpu.memory_space<vmem>>, %arg19: memref<2x50xf32, #tpu.memory_space<vmem>>, %arg20: memref<1x50xf32, #tpu.memory_space<vmem>>, %arg21: memref<8x16x2xf32, #tpu.memory_space<vmem>>, %arg22: memref<8x50x8xf32, #tpu.memory_space<vmem>>, %arg23: memref<16x8xf32, #tpu.memory_space<vmem>>, %arg24: memref<4x32x16xf32, #tpu.memory_space<vmem>>, %arg25: memref<4x8x256xf32, #tpu.memory_space<vmem>>, %arg26: memref<1x256xf32, #tpu.memory_space<vmem>>, %arg27: memref<4x34x32xf32, #tpu.memory_space<vmem>>, %arg28: memref<4x256x136xf32, #tpu.memory_space<vmem>>, %arg29: memref<1x136xf32, #tpu.memory_space<vmem>>, %arg30: memref<4x32x34xf32, #tpu.memory_space<vmem>>, %arg31: memref<4x136x64xf32, #tpu.memory_space<vmem>>, %arg32: memref<1x64xf32, #tpu.memory_space<vmem>>, %arg33: memref<4x64x32xf32, #tpu.memory_space<vmem>>, %arg34: memref<4x64x32xf32, #tpu.memory_space<vmem>>, %arg35: memref<1x32xf32, #tpu.memory_space<vmem>>, %arg36: memref<64x32xf32, #tpu.memory_space<vmem>>, %arg37: memref<2x2xf32, #tpu.memory_space<vmem>>, %arg38: memref<2x2xf32, #tpu.memory_space<vmem>>) attributes {dimension_semantics = [#tpu.dimension_semantics<arbitrary>], iteration_bounds = array<i64: 1>, scalar_prefetch = 0 : i64, scratch_operands = 0 : i64, tpu.core_type = #tpu.core_type<tc>, window_params = [{pipeline_mode = #tpu.pipeline_mode<synchronous>, transform_indices = @transform_0, window_bounds = array<i64: 64, 32>}, {pipeline_mode = #tpu.pipeline_mode<synchronous>, transform_indices = @transform_1, window_bounds = array<i64: 3, 32, 64>}, {pipeline_mode = #tpu.pipeline_mode<synchronous>, transform_indices = @transform_2, window_bounds = array<i64: 3, 32, 64>}, {pipeline_mode = #tpu.pipeline_mode<synchronous>, transform_indices = @transform_3, window_bounds = array<i64: 1, 64>}, {pipeline_mode = #tpu.pipeline_mode<synchronous>, transform_indices = @transform_4, window_bounds = array<i64: 3, 16, 32>}, {pipeline_mode = #tpu.pipeline_mode<synchronous>, transform_indices = @transform_5, window_bounds = array<i64: 3, 64, 64>}, {pipeline_mode = #tpu.pipeline_mode<synchronous>, transform_indices = @transform_6, window_bounds = array<i64: 1, 64>}, {pipeline_mode = #tpu.pipeline_mode<synchronous>, transform_indices = @transform_7, window_bounds = array<i64: 3, 8, 16>}, {pipeline_mode = #tpu.pipeline_mode<synchronous>, transform_indices = @transform_8, window_bounds = array<i64: 3, 64, 64>}, {pipeline_mode = #tpu.pipeline_mode<synchronous>, transform_indices = @transform_9, window_bounds = array<i64: 1, 64>}, {pipeline_mode = #tpu.pipeline_mode<synchronous>, transform_indices = @transform_10, window_bounds = array<i64: 5, 4, 8>}, {pipeline_mode = #tpu.pipeline_mode<synchronous>, transform_indices = @transform_11, window_bounds = array<i64: 5, 64, 32>}, {pipeline_mode = #tpu.pipeline_mode<synchronous>, transform_indices = @transform_12, window_bounds = array<i64: 1, 32>}, {pipeline_mode = #tpu.pipeline_mode<synchronous>, transform_indices = @transform_13, window_bounds = array<i64: 2, 2, 4>}, {pipeline_mode = #tpu.pipeline_mode<synchronous>, transform_indices = @transform_14, window_bounds = array<i64: 2, 32, 20>}, {pipeline_mode = #tpu.pipeline_mode<synchronous>, transform_indices = @transform_15, window_bounds = array<i64: 1, 20>}, {pipeline_mode = #tpu.pipeline_mode<synchronous>, transform_indices = @transform_16, window_bounds = array<i64: 20, 4>}, {pipeline_mode = #tpu.pipeline_mode<synchronous>, transform_indices = @transform_17, window_bounds = array<i64: 1, 4>}, {pipeline_mode = #tpu.pipeline_mode<synchronous>, transform_indices = @transform_18, window_bounds = array<i64: 2, 50>}, {pipeline_mode = #tpu.pipeline_mode<synchronous>, transform_indices = @transform_19, window_bounds = array<i64: 1, 50>}, {pipeline_mode = #tpu.pipeline_mode<synchronous>, transform_indices = @transform_20, window_bounds = array<i64: 8, 16, 2>}, {pipeline_mode = #tpu.pipeline_mode<synchronous>, transform_indices = @transform_21, window_bounds = array<i64: 8, 50, 8>}, {pipeline_mode = #tpu.pipeline_mode<synchronous>, transform_indices = @transform_22, window_bounds = array<i64: 16, 8>}, {pipeline_mode = #tpu.pipeline_mode<synchronous>, transform_indices = @transform_23, window_bounds = array<i64: 4, 32, 16>}, {pipeline_mode = #tpu.pipeline_mode<synchronous>, transform_indices = @transform_24, window_bounds = array<i64: 4, 8, 256>}, {pipeline_mode = #tpu.pipeline_mode<synchronous>, transform_indices = @transform_25, window_bounds = array<i64: 1, 256>}, {pipeline_mode = #tpu.pipeline_mode<synchronous>, transform_indices = @transform_26, window_bounds = array<i64: 4, 34, 32>}, {pipeline_mode = #tpu.pipeline_mode<synchronous>, transform_indices = @transform_27, window_bounds = array<i64: 4, 256, 136>}, {pipeline_mode = #tpu.pipeline_mode<synchronous>, transform_indices = @transform_28, window_bounds = array<i64: 1, 136>}, {pipeline_mode = #tpu.pipeline_mode<synchronous>, transform_indices = @transform_29, window_bounds = array<i64: 4, 32, 34>}, {pipeline_mode = #tpu.pipeline_mode<synchronous>, transform_indices = @transform_30, window_bounds = array<i64: 4, 136, 64>}, {pipeline_mode = #tpu.pipeline_mode<synchronous>, transform_indices = @transform_31, window_bounds = array<i64: 1, 64>}, {pipeline_mode = #tpu.pipeline_mode<synchronous>, transform_indices = @transform_32, window_bounds = array<i64: 4, 64, 32>}, {pipeline_mode = #tpu.pipeline_mode<synchronous>, transform_indices = @transform_33, window_bounds = array<i64: 4, 64, 32>}, {pipeline_mode = #tpu.pipeline_mode<synchronous>, transform_indices = @transform_34, window_bounds = array<i64: 1, 32>}, {pipeline_mode = #tpu.pipeline_mode<synchronous>, transform_indices = @transform_35, window_bounds = array<i64: 64, 32>}, {pipeline_mode = #tpu.pipeline_mode<synchronous>, transform_indices = @transform_36, window_bounds = array<i64: 2, 2>}, {pipeline_mode = #tpu.pipeline_mode<synchronous>, transform_indices = @transform_37, window_bounds = array<i64: 2, 2>}]} {
    %c0 = arith.constant 0 : index
    %c0_0 = arith.constant 0 : index
    %0 = vector.load %arg1[%c0, %c0_0] : memref<64x32xf32, #tpu.memory_space<vmem>>, vector<64x32xf32>
    %c0_1 = arith.constant 0 : index
    %c0_2 = arith.constant 0 : index
    %1 = vector.load %arg4[%c0_1, %c0_2] : memref<1x64xf32, #tpu.memory_space<vmem>>, vector<1x64xf32>
    %c0_3 = arith.constant 0 : index
    %c0_4 = arith.constant 0 : index
    %c0_5 = arith.constant 0 : index
    %2 = vector.load %arg2[%c0_3, %c0_4, %c0_5] : memref<3x32x64xf32, #tpu.memory_space<vmem>>, vector<1x32x64xf32>
    %3 = vector.shape_cast %2 : vector<1x32x64xf32> to vector<32x64xf32>
    %cst = arith.constant dense<0.000000e+00> : vector<32x32xf32>
    %4 = tpu.matmul %3, %0, %cst {dimension_numbers = #tpu.dot_dimension_numbers<[1], [0], [0], [1], [0, 0, 1, 1], [], []>} : vector<32x64xf32>, vector<64x32xf32>, vector<32x32xf32> -> vector<32x32xf32>
    %c0_6 = arith.constant 0 : index
    %c0_7 = arith.constant 0 : index
    %c0_8 = arith.constant 0 : index
    %5 = vector.load %arg3[%c0_6, %c0_7, %c0_8] : memref<3x32x64xf32, #tpu.memory_space<vmem>>, vector<1x32x64xf32>
    %6 = vector.shape_cast %5 : vector<1x32x64xf32> to vector<32x64xf32>
    %cst_9 = arith.constant dense<0.000000e+00> : vector<32x64xf32>
    %7 = tpu.matmul %4, %6, %cst_9 {dimension_numbers = #tpu.dot_dimension_numbers<[1], [0], [0], [1], [0, 0, 1, 1], [], []>} : vector<32x32xf32>, vector<32x64xf32>, vector<32x64xf32> -> vector<32x64xf32>
    %8 = vector.broadcast %1 : vector<1x64xf32> to vector<32x64xf32>
    %9 = arith.addf %8, %7 : vector<32x64xf32>
    %c1 = arith.constant 1 : index
    %c0_10 = arith.constant 0 : index
    %c0_11 = arith.constant 0 : index
    %10 = vector.load %arg2[%c1, %c0_10, %c0_11] : memref<3x32x64xf32, #tpu.memory_space<vmem>>, vector<1x32x64xf32>
    %11 = vector.shape_cast %10 : vector<1x32x64xf32> to vector<32x64xf32>
    %cst_12 = arith.constant dense<0.000000e+00> : vector<32x32xf32>
    %12 = tpu.matmul %11, %0, %cst_12 {dimension_numbers = #tpu.dot_dimension_numbers<[1], [0], [0], [1], [0, 0, 1, 1], [], []>} : vector<32x64xf32>, vector<64x32xf32>, vector<32x32xf32> -> vector<32x32xf32>
    %c1_13 = arith.constant 1 : index
    %c0_14 = arith.constant 0 : index
    %c0_15 = arith.constant 0 : index
    %13 = vector.load %arg3[%c1_13, %c0_14, %c0_15] : memref<3x32x64xf32, #tpu.memory_space<vmem>>, vector<1x32x64xf32>
    %14 = vector.shape_cast %13 : vector<1x32x64xf32> to vector<32x64xf32>
    %cst_16 = arith.constant dense<0.000000e+00> : vector<32x64xf32>
    %15 = tpu.matmul %12, %14, %cst_16 {dimension_numbers = #tpu.dot_dimension_numbers<[1], [0], [0], [1], [0, 0, 1, 1], [], []>} : vector<32x32xf32>, vector<32x64xf32>, vector<32x64xf32> -> vector<32x64xf32>
    %16 = arith.addf %9, %15 : vector<32x64xf32>
    %c2 = arith.constant 2 : index
    %c0_17 = arith.constant 0 : index
    %c0_18 = arith.constant 0 : index
    %17 = vector.load %arg2[%c2, %c0_17, %c0_18] : memref<3x32x64xf32, #tpu.memory_space<vmem>>, vector<1x32x64xf32>
    %18 = vector.shape_cast %17 : vector<1x32x64xf32> to vector<32x64xf32>
    %cst_19 = arith.constant dense<0.000000e+00> : vector<32x32xf32>
    %19 = tpu.matmul %18, %0, %cst_19 {dimension_numbers = #tpu.dot_dimension_numbers<[1], [0], [0], [1], [0, 0, 1, 1], [], []>} : vector<32x64xf32>, vector<64x32xf32>, vector<32x32xf32> -> vector<32x32xf32>
    %c2_20 = arith.constant 2 : index
    %c0_21 = arith.constant 0 : index
    %c0_22 = arith.constant 0 : index
    %20 = vector.load %arg3[%c2_20, %c0_21, %c0_22] : memref<3x32x64xf32, #tpu.memory_space<vmem>>, vector<1x32x64xf32>
    %21 = vector.shape_cast %20 : vector<1x32x64xf32> to vector<32x64xf32>
    %cst_23 = arith.constant dense<0.000000e+00> : vector<32x64xf32>
    %22 = tpu.matmul %19, %21, %cst_23 {dimension_numbers = #tpu.dot_dimension_numbers<[1], [0], [0], [1], [0, 0, 1, 1], [], []>} : vector<32x32xf32>, vector<32x64xf32>, vector<32x64xf32> -> vector<32x64xf32>
    %23 = arith.addf %16, %22 : vector<32x64xf32>
    %cst_24 = arith.constant 0.000000e+00 : f32
    %24 = vector.broadcast %cst_24 : f32 to vector<32x64xf32>
    %25 = arith.maximumf %23, %24 : vector<32x64xf32>
    %c0_25 = arith.constant 0 : index
    %c0_26 = arith.constant 0 : index
    %26 = vector.load %arg7[%c0_25, %c0_26] : memref<1x64xf32, #tpu.memory_space<vmem>>, vector<1x64xf32>
    %c0_27 = arith.constant 0 : index
    %c0_28 = arith.constant 0 : index
    %c0_29 = arith.constant 0 : index
    %27 = vector.load %arg5[%c0_27, %c0_28, %c0_29] : memref<3x16x32xf32, #tpu.memory_space<vmem>>, vector<1x16x32xf32>
    %28 = vector.shape_cast %27 : vector<1x16x32xf32> to vector<16x32xf32>
    %cst_30 = arith.constant dense<0.000000e+00> : vector<16x64xf32>
    %29 = tpu.matmul %28, %25, %cst_30 {dimension_numbers = #tpu.dot_dimension_numbers<[1], [0], [0], [1], [0, 0, 1, 1], [], []>} : vector<16x32xf32>, vector<32x64xf32>, vector<16x64xf32> -> vector<16x64xf32>
    %c0_31 = arith.constant 0 : index
    %c0_32 = arith.constant 0 : index
    %c0_33 = arith.constant 0 : index
    %30 = vector.load %arg6[%c0_31, %c0_32, %c0_33] : memref<3x64x64xf32, #tpu.memory_space<vmem>>, vector<1x64x64xf32>
    %31 = vector.shape_cast %30 : vector<1x64x64xf32> to vector<64x64xf32>
    %cst_34 = arith.constant dense<0.000000e+00> : vector<16x64xf32>
    %32 = tpu.matmul %29, %31, %cst_34 {dimension_numbers = #tpu.dot_dimension_numbers<[1], [0], [0], [1], [0, 0, 1, 1], [], []>} : vector<16x64xf32>, vector<64x64xf32>, vector<16x64xf32> -> vector<16x64xf32>
    %33 = vector.broadcast %26 : vector<1x64xf32> to vector<16x64xf32>
    %34 = arith.addf %33, %32 : vector<16x64xf32>
    %c1_35 = arith.constant 1 : index
    %c0_36 = arith.constant 0 : index
    %c0_37 = arith.constant 0 : index
    %35 = vector.load %arg5[%c1_35, %c0_36, %c0_37] : memref<3x16x32xf32, #tpu.memory_space<vmem>>, vector<1x16x32xf32>
    %36 = vector.shape_cast %35 : vector<1x16x32xf32> to vector<16x32xf32>
    %cst_38 = arith.constant dense<0.000000e+00> : vector<16x64xf32>
    %37 = tpu.matmul %36, %25, %cst_38 {dimension_numbers = #tpu.dot_dimension_numbers<[1], [0], [0], [1], [0, 0, 1, 1], [], []>} : vector<16x32xf32>, vector<32x64xf32>, vector<16x64xf32> -> vector<16x64xf32>
    %c1_39 = arith.constant 1 : index
    %c0_40 = arith.constant 0 : index
    %c0_41 = arith.constant 0 : index
    %38 = vector.load %arg6[%c1_39, %c0_40, %c0_41] : memref<3x64x64xf32, #tpu.memory_space<vmem>>, vector<1x64x64xf32>
    %39 = vector.shape_cast %38 : vector<1x64x64xf32> to vector<64x64xf32>
    %cst_42 = arith.constant dense<0.000000e+00> : vector<16x64xf32>
    %40 = tpu.matmul %37, %39, %cst_42 {dimension_numbers = #tpu.dot_dimension_numbers<[1], [0], [0], [1], [0, 0, 1, 1], [], []>} : vector<16x64xf32>, vector<64x64xf32>, vector<16x64xf32> -> vector<16x64xf32>
    %41 = arith.addf %34, %40 : vector<16x64xf32>
    %c2_43 = arith.constant 2 : index
    %c0_44 = arith.constant 0 : index
    %c0_45 = arith.constant 0 : index
    %42 = vector.load %arg5[%c2_43, %c0_44, %c0_45] : memref<3x16x32xf32, #tpu.memory_space<vmem>>, vector<1x16x32xf32>
    %43 = vector.shape_cast %42 : vector<1x16x32xf32> to vector<16x32xf32>
    %cst_46 = arith.constant dense<0.000000e+00> : vector<16x64xf32>
    %44 = tpu.matmul %43, %25, %cst_46 {dimension_numbers = #tpu.dot_dimension_numbers<[1], [0], [0], [1], [0, 0, 1, 1], [], []>} : vector<16x32xf32>, vector<32x64xf32>, vector<16x64xf32> -> vector<16x64xf32>
    %c2_47 = arith.constant 2 : index
    %c0_48 = arith.constant 0 : index
    %c0_49 = arith.constant 0 : index
    %45 = vector.load %arg6[%c2_47, %c0_48, %c0_49] : memref<3x64x64xf32, #tpu.memory_space<vmem>>, vector<1x64x64xf32>
    %46 = vector.shape_cast %45 : vector<1x64x64xf32> to vector<64x64xf32>
    %cst_50 = arith.constant dense<0.000000e+00> : vector<16x64xf32>
    %47 = tpu.matmul %44, %46, %cst_50 {dimension_numbers = #tpu.dot_dimension_numbers<[1], [0], [0], [1], [0, 0, 1, 1], [], []>} : vector<16x64xf32>, vector<64x64xf32>, vector<16x64xf32> -> vector<16x64xf32>
    %48 = arith.addf %41, %47 : vector<16x64xf32>
    %cst_51 = arith.constant 0.000000e+00 : f32
    %49 = vector.broadcast %cst_51 : f32 to vector<16x64xf32>
    %50 = arith.maximumf %48, %49 : vector<16x64xf32>
    %c0_52 = arith.constant 0 : index
    %c0_53 = arith.constant 0 : index
    %51 = vector.load %arg10[%c0_52, %c0_53] : memref<1x64xf32, #tpu.memory_space<vmem>>, vector<1x64xf32>
    %c0_54 = arith.constant 0 : index
    %c0_55 = arith.constant 0 : index
    %c0_56 = arith.constant 0 : index
    %52 = vector.load %arg8[%c0_54, %c0_55, %c0_56] : memref<3x8x16xf32, #tpu.memory_space<vmem>>, vector<1x8x16xf32>
    %53 = vector.shape_cast %52 : vector<1x8x16xf32> to vector<8x16xf32>
    %cst_57 = arith.constant dense<0.000000e+00> : vector<8x64xf32>
    %54 = tpu.matmul %53, %50, %cst_57 {dimension_numbers = #tpu.dot_dimension_numbers<[1], [0], [0], [1], [0, 0, 1, 1], [], []>} : vector<8x16xf32>, vector<16x64xf32>, vector<8x64xf32> -> vector<8x64xf32>
    %c0_58 = arith.constant 0 : index
    %c0_59 = arith.constant 0 : index
    %c0_60 = arith.constant 0 : index
    %55 = vector.load %arg9[%c0_58, %c0_59, %c0_60] : memref<3x64x64xf32, #tpu.memory_space<vmem>>, vector<1x64x64xf32>
    %56 = vector.shape_cast %55 : vector<1x64x64xf32> to vector<64x64xf32>
    %cst_61 = arith.constant dense<0.000000e+00> : vector<8x64xf32>
    %57 = tpu.matmul %54, %56, %cst_61 {dimension_numbers = #tpu.dot_dimension_numbers<[1], [0], [0], [1], [0, 0, 1, 1], [], []>} : vector<8x64xf32>, vector<64x64xf32>, vector<8x64xf32> -> vector<8x64xf32>
    %58 = vector.broadcast %51 : vector<1x64xf32> to vector<8x64xf32>
    %59 = arith.addf %58, %57 : vector<8x64xf32>
    %c1_62 = arith.constant 1 : index
    %c0_63 = arith.constant 0 : index
    %c0_64 = arith.constant 0 : index
    %60 = vector.load %arg8[%c1_62, %c0_63, %c0_64] : memref<3x8x16xf32, #tpu.memory_space<vmem>>, vector<1x8x16xf32>
    %61 = vector.shape_cast %60 : vector<1x8x16xf32> to vector<8x16xf32>
    %cst_65 = arith.constant dense<0.000000e+00> : vector<8x64xf32>
    %62 = tpu.matmul %61, %50, %cst_65 {dimension_numbers = #tpu.dot_dimension_numbers<[1], [0], [0], [1], [0, 0, 1, 1], [], []>} : vector<8x16xf32>, vector<16x64xf32>, vector<8x64xf32> -> vector<8x64xf32>
    %c1_66 = arith.constant 1 : index
    %c0_67 = arith.constant 0 : index
    %c0_68 = arith.constant 0 : index
    %63 = vector.load %arg9[%c1_66, %c0_67, %c0_68] : memref<3x64x64xf32, #tpu.memory_space<vmem>>, vector<1x64x64xf32>
    %64 = vector.shape_cast %63 : vector<1x64x64xf32> to vector<64x64xf32>
    %cst_69 = arith.constant dense<0.000000e+00> : vector<8x64xf32>
    %65 = tpu.matmul %62, %64, %cst_69 {dimension_numbers = #tpu.dot_dimension_numbers<[1], [0], [0], [1], [0, 0, 1, 1], [], []>} : vector<8x64xf32>, vector<64x64xf32>, vector<8x64xf32> -> vector<8x64xf32>
    %66 = arith.addf %59, %65 : vector<8x64xf32>
    %c2_70 = arith.constant 2 : index
    %c0_71 = arith.constant 0 : index
    %c0_72 = arith.constant 0 : index
    %67 = vector.load %arg8[%c2_70, %c0_71, %c0_72] : memref<3x8x16xf32, #tpu.memory_space<vmem>>, vector<1x8x16xf32>
    %68 = vector.shape_cast %67 : vector<1x8x16xf32> to vector<8x16xf32>
    %cst_73 = arith.constant dense<0.000000e+00> : vector<8x64xf32>
    %69 = tpu.matmul %68, %50, %cst_73 {dimension_numbers = #tpu.dot_dimension_numbers<[1], [0], [0], [1], [0, 0, 1, 1], [], []>} : vector<8x16xf32>, vector<16x64xf32>, vector<8x64xf32> -> vector<8x64xf32>
    %c2_74 = arith.constant 2 : index
    %c0_75 = arith.constant 0 : index
    %c0_76 = arith.constant 0 : index
    %70 = vector.load %arg9[%c2_74, %c0_75, %c0_76] : memref<3x64x64xf32, #tpu.memory_space<vmem>>, vector<1x64x64xf32>
    %71 = vector.shape_cast %70 : vector<1x64x64xf32> to vector<64x64xf32>
    %cst_77 = arith.constant dense<0.000000e+00> : vector<8x64xf32>
    %72 = tpu.matmul %69, %71, %cst_77 {dimension_numbers = #tpu.dot_dimension_numbers<[1], [0], [0], [1], [0, 0, 1, 1], [], []>} : vector<8x64xf32>, vector<64x64xf32>, vector<8x64xf32> -> vector<8x64xf32>
    %73 = arith.addf %66, %72 : vector<8x64xf32>
    %cst_78 = arith.constant 0.000000e+00 : f32
    %74 = vector.broadcast %cst_78 : f32 to vector<8x64xf32>
    %75 = arith.maximumf %73, %74 : vector<8x64xf32>
    %c0_79 = arith.constant 0 : index
    %c0_80 = arith.constant 0 : index
    %76 = vector.load %arg13[%c0_79, %c0_80] : memref<1x32xf32, #tpu.memory_space<vmem>>, vector<1x32xf32>
    %c0_81 = arith.constant 0 : index
    %c0_82 = arith.constant 0 : index
    %c0_83 = arith.constant 0 : index
    %77 = vector.load %arg11[%c0_81, %c0_82, %c0_83] : memref<5x4x8xf32, #tpu.memory_space<vmem>>, vector<1x4x8xf32>
    %78 = vector.shape_cast %77 : vector<1x4x8xf32> to vector<4x8xf32>
    %cst_84 = arith.constant dense<0.000000e+00> : vector<4x64xf32>
    %79 = tpu.matmul %78, %75, %cst_84 {dimension_numbers = #tpu.dot_dimension_numbers<[1], [0], [0], [1], [0, 0, 1, 1], [], []>} : vector<4x8xf32>, vector<8x64xf32>, vector<4x64xf32> -> vector<4x64xf32>
    %c0_85 = arith.constant 0 : index
    %c0_86 = arith.constant 0 : index
    %c0_87 = arith.constant 0 : index
    %80 = vector.load %arg12[%c0_85, %c0_86, %c0_87] : memref<5x64x32xf32, #tpu.memory_space<vmem>>, vector<1x64x32xf32>
    %81 = vector.shape_cast %80 : vector<1x64x32xf32> to vector<64x32xf32>
    %cst_88 = arith.constant dense<0.000000e+00> : vector<4x32xf32>
    %82 = tpu.matmul %79, %81, %cst_88 {dimension_numbers = #tpu.dot_dimension_numbers<[1], [0], [0], [1], [0, 0, 1, 1], [], []>} : vector<4x64xf32>, vector<64x32xf32>, vector<4x32xf32> -> vector<4x32xf32>
    %83 = vector.broadcast %76 : vector<1x32xf32> to vector<4x32xf32>
    %84 = arith.addf %83, %82 : vector<4x32xf32>
    %c1_89 = arith.constant 1 : index
    %c0_90 = arith.constant 0 : index
    %c0_91 = arith.constant 0 : index
    %85 = vector.load %arg11[%c1_89, %c0_90, %c0_91] : memref<5x4x8xf32, #tpu.memory_space<vmem>>, vector<1x4x8xf32>
    %86 = vector.shape_cast %85 : vector<1x4x8xf32> to vector<4x8xf32>
    %cst_92 = arith.constant dense<0.000000e+00> : vector<4x64xf32>
    %87 = tpu.matmul %86, %75, %cst_92 {dimension_numbers = #tpu.dot_dimension_numbers<[1], [0], [0], [1], [0, 0, 1, 1], [], []>} : vector<4x8xf32>, vector<8x64xf32>, vector<4x64xf32> -> vector<4x64xf32>
    %c1_93 = arith.constant 1 : index
    %c0_94 = arith.constant 0 : index
    %c0_95 = arith.constant 0 : index
    %88 = vector.load %arg12[%c1_93, %c0_94, %c0_95] : memref<5x64x32xf32, #tpu.memory_space<vmem>>, vector<1x64x32xf32>
    %89 = vector.shape_cast %88 : vector<1x64x32xf32> to vector<64x32xf32>
    %cst_96 = arith.constant dense<0.000000e+00> : vector<4x32xf32>
    %90 = tpu.matmul %87, %89, %cst_96 {dimension_numbers = #tpu.dot_dimension_numbers<[1], [0], [0], [1], [0, 0, 1, 1], [], []>} : vector<4x64xf32>, vector<64x32xf32>, vector<4x32xf32> -> vector<4x32xf32>
    %91 = arith.addf %84, %90 : vector<4x32xf32>
    %c2_97 = arith.constant 2 : index
    %c0_98 = arith.constant 0 : index
    %c0_99 = arith.constant 0 : index
    %92 = vector.load %arg11[%c2_97, %c0_98, %c0_99] : memref<5x4x8xf32, #tpu.memory_space<vmem>>, vector<1x4x8xf32>
    %93 = vector.shape_cast %92 : vector<1x4x8xf32> to vector<4x8xf32>
    %cst_100 = arith.constant dense<0.000000e+00> : vector<4x64xf32>
    %94 = tpu.matmul %93, %75, %cst_100 {dimension_numbers = #tpu.dot_dimension_numbers<[1], [0], [0], [1], [0, 0, 1, 1], [], []>} : vector<4x8xf32>, vector<8x64xf32>, vector<4x64xf32> -> vector<4x64xf32>
    %c2_101 = arith.constant 2 : index
    %c0_102 = arith.constant 0 : index
    %c0_103 = arith.constant 0 : index
    %95 = vector.load %arg12[%c2_101, %c0_102, %c0_103] : memref<5x64x32xf32, #tpu.memory_space<vmem>>, vector<1x64x32xf32>
    %96 = vector.shape_cast %95 : vector<1x64x32xf32> to vector<64x32xf32>
    %cst_104 = arith.constant dense<0.000000e+00> : vector<4x32xf32>
    %97 = tpu.matmul %94, %96, %cst_104 {dimension_numbers = #tpu.dot_dimension_numbers<[1], [0], [0], [1], [0, 0, 1, 1], [], []>} : vector<4x64xf32>, vector<64x32xf32>, vector<4x32xf32> -> vector<4x32xf32>
    %98 = arith.addf %91, %97 : vector<4x32xf32>
    %c3 = arith.constant 3 : index
    %c0_105 = arith.constant 0 : index
    %c0_106 = arith.constant 0 : index
    %99 = vector.load %arg11[%c3, %c0_105, %c0_106] : memref<5x4x8xf32, #tpu.memory_space<vmem>>, vector<1x4x8xf32>
    %100 = vector.shape_cast %99 : vector<1x4x8xf32> to vector<4x8xf32>
    %cst_107 = arith.constant dense<0.000000e+00> : vector<4x64xf32>
    %101 = tpu.matmul %100, %75, %cst_107 {dimension_numbers = #tpu.dot_dimension_numbers<[1], [0], [0], [1], [0, 0, 1, 1], [], []>} : vector<4x8xf32>, vector<8x64xf32>, vector<4x64xf32> -> vector<4x64xf32>
    %c3_108 = arith.constant 3 : index
    %c0_109 = arith.constant 0 : index
    %c0_110 = arith.constant 0 : index
    %102 = vector.load %arg12[%c3_108, %c0_109, %c0_110] : memref<5x64x32xf32, #tpu.memory_space<vmem>>, vector<1x64x32xf32>
    %103 = vector.shape_cast %102 : vector<1x64x32xf32> to vector<64x32xf32>
    %cst_111 = arith.constant dense<0.000000e+00> : vector<4x32xf32>
    %104 = tpu.matmul %101, %103, %cst_111 {dimension_numbers = #tpu.dot_dimension_numbers<[1], [0], [0], [1], [0, 0, 1, 1], [], []>} : vector<4x64xf32>, vector<64x32xf32>, vector<4x32xf32> -> vector<4x32xf32>
    %105 = arith.addf %98, %104 : vector<4x32xf32>
    %c4 = arith.constant 4 : index
    %c0_112 = arith.constant 0 : index
    %c0_113 = arith.constant 0 : index
    %106 = vector.load %arg11[%c4, %c0_112, %c0_113] : memref<5x4x8xf32, #tpu.memory_space<vmem>>, vector<1x4x8xf32>
    %107 = vector.shape_cast %106 : vector<1x4x8xf32> to vector<4x8xf32>
    %cst_114 = arith.constant dense<0.000000e+00> : vector<4x64xf32>
    %108 = tpu.matmul %107, %75, %cst_114 {dimension_numbers = #tpu.dot_dimension_numbers<[1], [0], [0], [1], [0, 0, 1, 1], [], []>} : vector<4x8xf32>, vector<8x64xf32>, vector<4x64xf32> -> vector<4x64xf32>
    %c4_115 = arith.constant 4 : index
    %c0_116 = arith.constant 0 : index
    %c0_117 = arith.constant 0 : index
    %109 = vector.load %arg12[%c4_115, %c0_116, %c0_117] : memref<5x64x32xf32, #tpu.memory_space<vmem>>, vector<1x64x32xf32>
    %110 = vector.shape_cast %109 : vector<1x64x32xf32> to vector<64x32xf32>
    %cst_118 = arith.constant dense<0.000000e+00> : vector<4x32xf32>
    %111 = tpu.matmul %108, %110, %cst_118 {dimension_numbers = #tpu.dot_dimension_numbers<[1], [0], [0], [1], [0, 0, 1, 1], [], []>} : vector<4x64xf32>, vector<64x32xf32>, vector<4x32xf32> -> vector<4x32xf32>
    %112 = arith.addf %105, %111 : vector<4x32xf32>
    %cst_119 = arith.constant 0.000000e+00 : f32
    %113 = vector.broadcast %cst_119 : f32 to vector<4x32xf32>
    %114 = arith.maximumf %112, %113 : vector<4x32xf32>
    %c0_120 = arith.constant 0 : index
    %c0_121 = arith.constant 0 : index
    %115 = vector.load %arg16[%c0_120, %c0_121] : memref<1x20xf32, #tpu.memory_space<vmem>>, vector<1x20xf32>
    %c0_122 = arith.constant 0 : index
    %c0_123 = arith.constant 0 : index
    %c0_124 = arith.constant 0 : index
    %116 = vector.load %arg14[%c0_122, %c0_123, %c0_124] : memref<2x2x4xf32, #tpu.memory_space<vmem>>, vector<1x2x4xf32>
    %117 = vector.shape_cast %116 : vector<1x2x4xf32> to vector<2x4xf32>
    %cst_125 = arith.constant dense<0.000000e+00> : vector<2x32xf32>
    %118 = tpu.matmul %117, %114, %cst_125 {dimension_numbers = #tpu.dot_dimension_numbers<[1], [0], [0], [1], [0, 0, 1, 1], [], []>} : vector<2x4xf32>, vector<4x32xf32>, vector<2x32xf32> -> vector<2x32xf32>
    %c0_126 = arith.constant 0 : index
    %c0_127 = arith.constant 0 : index
    %c0_128 = arith.constant 0 : index
    %119 = vector.load %arg15[%c0_126, %c0_127, %c0_128] : memref<2x32x20xf32, #tpu.memory_space<vmem>>, vector<1x32x20xf32>
    %120 = vector.shape_cast %119 : vector<1x32x20xf32> to vector<32x20xf32>
    %cst_129 = arith.constant dense<0.000000e+00> : vector<2x20xf32>
    %121 = tpu.matmul %118, %120, %cst_129 {dimension_numbers = #tpu.dot_dimension_numbers<[1], [0], [0], [1], [0, 0, 1, 1], [], []>} : vector<2x32xf32>, vector<32x20xf32>, vector<2x20xf32> -> vector<2x20xf32>
    %122 = vector.broadcast %115 : vector<1x20xf32> to vector<2x20xf32>
    %123 = arith.addf %122, %121 : vector<2x20xf32>
    %c1_130 = arith.constant 1 : index
    %c0_131 = arith.constant 0 : index
    %c0_132 = arith.constant 0 : index
    %124 = vector.load %arg14[%c1_130, %c0_131, %c0_132] : memref<2x2x4xf32, #tpu.memory_space<vmem>>, vector<1x2x4xf32>
    %125 = vector.shape_cast %124 : vector<1x2x4xf32> to vector<2x4xf32>
    %cst_133 = arith.constant dense<0.000000e+00> : vector<2x32xf32>
    %126 = tpu.matmul %125, %114, %cst_133 {dimension_numbers = #tpu.dot_dimension_numbers<[1], [0], [0], [1], [0, 0, 1, 1], [], []>} : vector<2x4xf32>, vector<4x32xf32>, vector<2x32xf32> -> vector<2x32xf32>
    %c1_134 = arith.constant 1 : index
    %c0_135 = arith.constant 0 : index
    %c0_136 = arith.constant 0 : index
    %127 = vector.load %arg15[%c1_134, %c0_135, %c0_136] : memref<2x32x20xf32, #tpu.memory_space<vmem>>, vector<1x32x20xf32>
    %128 = vector.shape_cast %127 : vector<1x32x20xf32> to vector<32x20xf32>
    %cst_137 = arith.constant dense<0.000000e+00> : vector<2x20xf32>
    %129 = tpu.matmul %126, %128, %cst_137 {dimension_numbers = #tpu.dot_dimension_numbers<[1], [0], [0], [1], [0, 0, 1, 1], [], []>} : vector<2x32xf32>, vector<32x20xf32>, vector<2x20xf32> -> vector<2x20xf32>
    %130 = arith.addf %123, %129 : vector<2x20xf32>
    %cst_138 = arith.constant 0.000000e+00 : f32
    %131 = vector.broadcast %cst_138 : f32 to vector<2x20xf32>
    %132 = arith.maximumf %130, %131 : vector<2x20xf32>
    %c0_139 = arith.constant 0 : index
    %c0_140 = arith.constant 0 : index
    %133 = vector.load %arg17[%c0_139, %c0_140] : memref<20x4xf32, #tpu.memory_space<vmem>>, vector<20x4xf32>
    %cst_141 = arith.constant dense<0.000000e+00> : vector<2x4xf32>
    %134 = tpu.matmul %132, %133, %cst_141 {dimension_numbers = #tpu.dot_dimension_numbers<[1], [0], [0], [1], [0, 0, 1, 1], [], []>} : vector<2x20xf32>, vector<20x4xf32>, vector<2x4xf32> -> vector<2x4xf32>
    %c0_142 = arith.constant 0 : index
    %c0_143 = arith.constant 0 : index
    %135 = vector.load %arg18[%c0_142, %c0_143] : memref<1x4xf32, #tpu.memory_space<vmem>>, vector<1x4xf32>
    %136 = vector.broadcast %135 : vector<1x4xf32> to vector<2x4xf32>
    %137 = arith.addf %134, %136 : vector<2x4xf32>
    %138 = vector.extract_strided_slice %137 {offsets = [0, 0], sizes = [2, 2], strides = [1, 1]} : vector<2x4xf32> to vector<2x2xf32>
    %c0_144 = arith.constant 0 : index
    %c0_145 = arith.constant 0 : index
    %139 = vector.load %arg37[%c0_144, %c0_145] : memref<2x2xf32, #tpu.memory_space<vmem>>, vector<2x2xf32>
    tpu.vector_store %arg37[%c0_144, %c0_145], %138 {strides = array<i32>} : memref<2x2xf32, #tpu.memory_space<vmem>>, vector<2x2xf32>,
    %140 = vector.extract_strided_slice %137 {offsets = [0, 2], sizes = [2, 2], strides = [1, 1]} : vector<2x4xf32> to vector<2x2xf32>
    %c0_146 = arith.constant 0 : index
    %c0_147 = arith.constant 0 : index
    %141 = vector.load %arg38[%c0_146, %c0_147] : memref<2x2xf32, #tpu.memory_space<vmem>>, vector<2x2xf32>
    tpu.vector_store %arg38[%c0_146, %c0_147], %140 {strides = array<i32>} : memref<2x2xf32, #tpu.memory_space<vmem>>, vector<2x2xf32>,
    %142 = vector.extract_strided_slice %137 {offsets = [0, 0], sizes = [2, 2], strides = [1, 1]} : vector<2x4xf32> to vector<2x2xf32>
    %c0_148 = arith.constant 0 : index
    %c0_149 = arith.constant 0 : index
    %143 = vector.load %arg19[%c0_148, %c0_149] : memref<2x50xf32, #tpu.memory_space<vmem>>, vector<2x50xf32>
    %cst_150 = arith.constant dense<0.000000e+00> : vector<2x50xf32>
    %144 = tpu.matmul %142, %143, %cst_150 {dimension_numbers = #tpu.dot_dimension_numbers<[1], [0], [0], [1], [0, 0, 1, 1], [], []>} : vector<2x2xf32>, vector<2x50xf32>, vector<2x50xf32> -> vector<2x50xf32>
    %c0_151 = arith.constant 0 : index
    %c0_152 = arith.constant 0 : index
    %145 = vector.load %arg20[%c0_151, %c0_152] : memref<1x50xf32, #tpu.memory_space<vmem>>, vector<1x50xf32>
    %146 = vector.broadcast %145 : vector<1x50xf32> to vector<2x50xf32>
    %147 = arith.addf %144, %146 : vector<2x50xf32>
    %cst_153 = arith.constant 0.000000e+00 : f32
    %148 = vector.broadcast %cst_153 : f32 to vector<2x50xf32>
    %149 = arith.maximumf %147, %148 : vector<2x50xf32>
    %c0_154 = arith.constant 0 : index
    %c0_155 = arith.constant 0 : index
    %150 = vector.load %arg23[%c0_154, %c0_155] : memref<16x8xf32, #tpu.memory_space<vmem>>, vector<16x8xf32>
    %c0_156 = arith.constant 0 : index
    %c0_157 = arith.constant 0 : index
    %c0_158 = arith.constant 0 : index
    %151 = vector.load %arg21[%c0_156, %c0_157, %c0_158] : memref<8x16x2xf32, #tpu.memory_space<vmem>>, vector<1x16x2xf32>
    %152 = vector.shape_cast %151 : vector<1x16x2xf32> to vector<16x2xf32>
    %cst_159 = arith.constant dense<0.000000e+00> : vector<16x50xf32>
    %153 = tpu.matmul %152, %149, %cst_159 {dimension_numbers = #tpu.dot_dimension_numbers<[1], [0], [0], [1], [0, 0, 1, 1], [], []>} : vector<16x2xf32>, vector<2x50xf32>, vector<16x50xf32> -> vector<16x50xf32>
    %c0_160 = arith.constant 0 : index
    %c0_161 = arith.constant 0 : index
    %c0_162 = arith.constant 0 : index
    %154 = vector.load %arg22[%c0_160, %c0_161, %c0_162] : memref<8x50x8xf32, #tpu.memory_space<vmem>>, vector<1x50x8xf32>
    %155 = vector.shape_cast %154 : vector<1x50x8xf32> to vector<50x8xf32>
    %cst_163 = arith.constant dense<0.000000e+00> : vector<16x8xf32>
    %156 = tpu.matmul %153, %155, %cst_163 {dimension_numbers = #tpu.dot_dimension_numbers<[1], [0], [0], [1], [0, 0, 1, 1], [], []>} : vector<16x50xf32>, vector<50x8xf32>, vector<16x8xf32> -> vector<16x8xf32>
    %157 = arith.addf %150, %156 : vector<16x8xf32>
    %c1_164 = arith.constant 1 : index
    %c0_165 = arith.constant 0 : index
    %c0_166 = arith.constant 0 : index
    %158 = vector.load %arg21[%c1_164, %c0_165, %c0_166] : memref<8x16x2xf32, #tpu.memory_space<vmem>>, vector<1x16x2xf32>
    %159 = vector.shape_cast %158 : vector<1x16x2xf32> to vector<16x2xf32>
    %cst_167 = arith.constant dense<0.000000e+00> : vector<16x50xf32>
    %160 = tpu.matmul %159, %149, %cst_167 {dimension_numbers = #tpu.dot_dimension_numbers<[1], [0], [0], [1], [0, 0, 1, 1], [], []>} : vector<16x2xf32>, vector<2x50xf32>, vector<16x50xf32> -> vector<16x50xf32>
    %c1_168 = arith.constant 1 : index
    %c0_169 = arith.constant 0 : index
    %c0_170 = arith.constant 0 : index
    %161 = vector.load %arg22[%c1_168, %c0_169, %c0_170] : memref<8x50x8xf32, #tpu.memory_space<vmem>>, vector<1x50x8xf32>
    %162 = vector.shape_cast %161 : vector<1x50x8xf32> to vector<50x8xf32>
    %cst_171 = arith.constant dense<0.000000e+00> : vector<16x8xf32>
    %163 = tpu.matmul %160, %162, %cst_171 {dimension_numbers = #tpu.dot_dimension_numbers<[1], [0], [0], [1], [0, 0, 1, 1], [], []>} : vector<16x50xf32>, vector<50x8xf32>, vector<16x8xf32> -> vector<16x8xf32>
    %164 = arith.addf %157, %163 : vector<16x8xf32>
    %c2_172 = arith.constant 2 : index
    %c0_173 = arith.constant 0 : index
    %c0_174 = arith.constant 0 : index
    %165 = vector.load %arg21[%c2_172, %c0_173, %c0_174] : memref<8x16x2xf32, #tpu.memory_space<vmem>>, vector<1x16x2xf32>
    %166 = vector.shape_cast %165 : vector<1x16x2xf32> to vector<16x2xf32>
    %cst_175 = arith.constant dense<0.000000e+00> : vector<16x50xf32>
    %167 = tpu.matmul %166, %149, %cst_175 {dimension_numbers = #tpu.dot_dimension_numbers<[1], [0], [0], [1], [0, 0, 1, 1], [], []>} : vector<16x2xf32>, vector<2x50xf32>, vector<16x50xf32> -> vector<16x50xf32>
    %c2_176 = arith.constant 2 : index
    %c0_177 = arith.constant 0 : index
    %c0_178 = arith.constant 0 : index
    %168 = vector.load %arg22[%c2_176, %c0_177, %c0_178] : memref<8x50x8xf32, #tpu.memory_space<vmem>>, vector<1x50x8xf32>
    %169 = vector.shape_cast %168 : vector<1x50x8xf32> to vector<50x8xf32>
    %cst_179 = arith.constant dense<0.000000e+00> : vector<16x8xf32>
    %170 = tpu.matmul %167, %169, %cst_179 {dimension_numbers = #tpu.dot_dimension_numbers<[1], [0], [0], [1], [0, 0, 1, 1], [], []>} : vector<16x50xf32>, vector<50x8xf32>, vector<16x8xf32> -> vector<16x8xf32>
    %171 = arith.addf %164, %170 : vector<16x8xf32>
    %c3_180 = arith.constant 3 : index
    %c0_181 = arith.constant 0 : index
    %c0_182 = arith.constant 0 : index
    %172 = vector.load %arg21[%c3_180, %c0_181, %c0_182] : memref<8x16x2xf32, #tpu.memory_space<vmem>>, vector<1x16x2xf32>
    %173 = vector.shape_cast %172 : vector<1x16x2xf32> to vector<16x2xf32>
    %cst_183 = arith.constant dense<0.000000e+00> : vector<16x50xf32>
    %174 = tpu.matmul %173, %149, %cst_183 {dimension_numbers = #tpu.dot_dimension_numbers<[1], [0], [0], [1], [0, 0, 1, 1], [], []>} : vector<16x2xf32>, vector<2x50xf32>, vector<16x50xf32> -> vector<16x50xf32>
    %c3_184 = arith.constant 3 : index
    %c0_185 = arith.constant 0 : index
    %c0_186 = arith.constant 0 : index
    %175 = vector.load %arg22[%c3_184, %c0_185, %c0_186] : memref<8x50x8xf32, #tpu.memory_space<vmem>>, vector<1x50x8xf32>
    %176 = vector.shape_cast %175 : vector<1x50x8xf32> to vector<50x8xf32>
    %cst_187 = arith.constant dense<0.000000e+00> : vector<16x8xf32>
    %177 = tpu.matmul %174, %176, %cst_187 {dimension_numbers = #tpu.dot_dimension_numbers<[1], [0], [0], [1], [0, 0, 1, 1], [], []>} : vector<16x50xf32>, vector<50x8xf32>, vector<16x8xf32> -> vector<16x8xf32>
    %178 = arith.addf %171, %177 : vector<16x8xf32>
    %c4_188 = arith.constant 4 : index
    %c0_189 = arith.constant 0 : index
    %c0_190 = arith.constant 0 : index
    %179 = vector.load %arg21[%c4_188, %c0_189, %c0_190] : memref<8x16x2xf32, #tpu.memory_space<vmem>>, vector<1x16x2xf32>
    %180 = vector.shape_cast %179 : vector<1x16x2xf32> to vector<16x2xf32>
    %cst_191 = arith.constant dense<0.000000e+00> : vector<16x50xf32>
    %181 = tpu.matmul %180, %149, %cst_191 {dimension_numbers = #tpu.dot_dimension_numbers<[1], [0], [0], [1], [0, 0, 1, 1], [], []>} : vector<16x2xf32>, vector<2x50xf32>, vector<16x50xf32> -> vector<16x50xf32>
    %c4_192 = arith.constant 4 : index
    %c0_193 = arith.constant 0 : index
    %c0_194 = arith.constant 0 : index
    %182 = vector.load %arg22[%c4_192, %c0_193, %c0_194] : memref<8x50x8xf32, #tpu.memory_space<vmem>>, vector<1x50x8xf32>
    %183 = vector.shape_cast %182 : vector<1x50x8xf32> to vector<50x8xf32>
    %cst_195 = arith.constant dense<0.000000e+00> : vector<16x8xf32>
    %184 = tpu.matmul %181, %183, %cst_195 {dimension_numbers = #tpu.dot_dimension_numbers<[1], [0], [0], [1], [0, 0, 1, 1], [], []>} : vector<16x50xf32>, vector<50x8xf32>, vector<16x8xf32> -> vector<16x8xf32>
    %185 = arith.addf %178, %184 : vector<16x8xf32>
    %c5 = arith.constant 5 : index
    %c0_196 = arith.constant 0 : index
    %c0_197 = arith.constant 0 : index
    %186 = vector.load %arg21[%c5, %c0_196, %c0_197] : memref<8x16x2xf32, #tpu.memory_space<vmem>>, vector<1x16x2xf32>
    %187 = vector.shape_cast %186 : vector<1x16x2xf32> to vector<16x2xf32>
    %cst_198 = arith.constant dense<0.000000e+00> : vector<16x50xf32>
    %188 = tpu.matmul %187, %149, %cst_198 {dimension_numbers = #tpu.dot_dimension_numbers<[1], [0], [0], [1], [0, 0, 1, 1], [], []>} : vector<16x2xf32>, vector<2x50xf32>, vector<16x50xf32> -> vector<16x50xf32>
    %c5_199 = arith.constant 5 : index
    %c0_200 = arith.constant 0 : index
    %c0_201 = arith.constant 0 : index
    %189 = vector.load %arg22[%c5_199, %c0_200, %c0_201] : memref<8x50x8xf32, #tpu.memory_space<vmem>>, vector<1x50x8xf32>
    %190 = vector.shape_cast %189 : vector<1x50x8xf32> to vector<50x8xf32>
    %cst_202 = arith.constant dense<0.000000e+00> : vector<16x8xf32>
    %191 = tpu.matmul %188, %190, %cst_202 {dimension_numbers = #tpu.dot_dimension_numbers<[1], [0], [0], [1], [0, 0, 1, 1], [], []>} : vector<16x50xf32>, vector<50x8xf32>, vector<16x8xf32> -> vector<16x8xf32>
    %192 = arith.addf %185, %191 : vector<16x8xf32>
    %c6 = arith.constant 6 : index
    %c0_203 = arith.constant 0 : index
    %c0_204 = arith.constant 0 : index
    %193 = vector.load %arg21[%c6, %c0_203, %c0_204] : memref<8x16x2xf32, #tpu.memory_space<vmem>>, vector<1x16x2xf32>
    %194 = vector.shape_cast %193 : vector<1x16x2xf32> to vector<16x2xf32>
    %cst_205 = arith.constant dense<0.000000e+00> : vector<16x50xf32>
    %195 = tpu.matmul %194, %149, %cst_205 {dimension_numbers = #tpu.dot_dimension_numbers<[1], [0], [0], [1], [0, 0, 1, 1], [], []>} : vector<16x2xf32>, vector<2x50xf32>, vector<16x50xf32> -> vector<16x50xf32>
    %c6_206 = arith.constant 6 : index
    %c0_207 = arith.constant 0 : index
    %c0_208 = arith.constant 0 : index
    %196 = vector.load %arg22[%c6_206, %c0_207, %c0_208] : memref<8x50x8xf32, #tpu.memory_space<vmem>>, vector<1x50x8xf32>
    %197 = vector.shape_cast %196 : vector<1x50x8xf32> to vector<50x8xf32>
    %cst_209 = arith.constant dense<0.000000e+00> : vector<16x8xf32>
    %198 = tpu.matmul %195, %197, %cst_209 {dimension_numbers = #tpu.dot_dimension_numbers<[1], [0], [0], [1], [0, 0, 1, 1], [], []>} : vector<16x50xf32>, vector<50x8xf32>, vector<16x8xf32> -> vector<16x8xf32>
    %199 = arith.addf %192, %198 : vector<16x8xf32>
    %c7 = arith.constant 7 : index
    %c0_210 = arith.constant 0 : index
    %c0_211 = arith.constant 0 : index
    %200 = vector.load %arg21[%c7, %c0_210, %c0_211] : memref<8x16x2xf32, #tpu.memory_space<vmem>>, vector<1x16x2xf32>
    %201 = vector.shape_cast %200 : vector<1x16x2xf32> to vector<16x2xf32>
    %cst_212 = arith.constant dense<0.000000e+00> : vector<16x50xf32>
    %202 = tpu.matmul %201, %149, %cst_212 {dimension_numbers = #tpu.dot_dimension_numbers<[1], [0], [0], [1], [0, 0, 1, 1], [], []>} : vector<16x2xf32>, vector<2x50xf32>, vector<16x50xf32> -> vector<16x50xf32>
    %c7_213 = arith.constant 7 : index
    %c0_214 = arith.constant 0 : index
    %c0_215 = arith.constant 0 : index
    %203 = vector.load %arg22[%c7_213, %c0_214, %c0_215] : memref<8x50x8xf32, #tpu.memory_space<vmem>>, vector<1x50x8xf32>
    %204 = vector.shape_cast %203 : vector<1x50x8xf32> to vector<50x8xf32>
    %cst_216 = arith.constant dense<0.000000e+00> : vector<16x8xf32>
    %205 = tpu.matmul %202, %204, %cst_216 {dimension_numbers = #tpu.dot_dimension_numbers<[1], [0], [0], [1], [0, 0, 1, 1], [], []>} : vector<16x50xf32>, vector<50x8xf32>, vector<16x8xf32> -> vector<16x8xf32>
    %206 = arith.addf %199, %205 : vector<16x8xf32>
    %cst_217 = arith.constant 0.000000e+00 : f32
    %207 = vector.broadcast %cst_217 : f32 to vector<16x8xf32>
    %208 = arith.maximumf %206, %207 : vector<16x8xf32>
    %c0_218 = arith.constant 0 : index
    %c0_219 = arith.constant 0 : index
    %209 = vector.load %arg26[%c0_218, %c0_219] : memref<1x256xf32, #tpu.memory_space<vmem>>, vector<1x256xf32>
    %c0_220 = arith.constant 0 : index
    %c0_221 = arith.constant 0 : index
    %c0_222 = arith.constant 0 : index
    %210 = vector.load %arg24[%c0_220, %c0_221, %c0_222] : memref<4x32x16xf32, #tpu.memory_space<vmem>>, vector<1x32x16xf32>
    %211 = vector.shape_cast %210 : vector<1x32x16xf32> to vector<32x16xf32>
    %cst_223 = arith.constant dense<0.000000e+00> : vector<32x8xf32>
    %212 = tpu.matmul %211, %208, %cst_223 {dimension_numbers = #tpu.dot_dimension_numbers<[1], [0], [0], [1], [0, 0, 1, 1], [], []>} : vector<32x16xf32>, vector<16x8xf32>, vector<32x8xf32> -> vector<32x8xf32>
    %c0_224 = arith.constant 0 : index
    %c0_225 = arith.constant 0 : index
    %c0_226 = arith.constant 0 : index
    %213 = vector.load %arg25[%c0_224, %c0_225, %c0_226] : memref<4x8x256xf32, #tpu.memory_space<vmem>>, vector<1x8x256xf32>
    %214 = vector.shape_cast %213 : vector<1x8x256xf32> to vector<8x256xf32>
    %cst_227 = arith.constant dense<0.000000e+00> : vector<32x256xf32>
    %215 = tpu.matmul %212, %214, %cst_227 {dimension_numbers = #tpu.dot_dimension_numbers<[1], [0], [0], [1], [0, 0, 1, 1], [], []>} : vector<32x8xf32>, vector<8x256xf32>, vector<32x256xf32> -> vector<32x256xf32>
    %216 = vector.broadcast %209 : vector<1x256xf32> to vector<32x256xf32>
    %217 = arith.addf %216, %215 : vector<32x256xf32>
    %c1_228 = arith.constant 1 : index
    %c0_229 = arith.constant 0 : index
    %c0_230 = arith.constant 0 : index
    %218 = vector.load %arg24[%c1_228, %c0_229, %c0_230] : memref<4x32x16xf32, #tpu.memory_space<vmem>>, vector<1x32x16xf32>
    %219 = vector.shape_cast %218 : vector<1x32x16xf32> to vector<32x16xf32>
    %cst_231 = arith.constant dense<0.000000e+00> : vector<32x8xf32>
    %220 = tpu.matmul %219, %208, %cst_231 {dimension_numbers = #tpu.dot_dimension_numbers<[1], [0], [0], [1], [0, 0, 1, 1], [], []>} : vector<32x16xf32>, vector<16x8xf32>, vector<32x8xf32> -> vector<32x8xf32>
    %c1_232 = arith.constant 1 : index
    %c0_233 = arith.constant 0 : index
    %c0_234 = arith.constant 0 : index
    %221 = vector.load %arg25[%c1_232, %c0_233, %c0_234] : memref<4x8x256xf32, #tpu.memory_space<vmem>>, vector<1x8x256xf32>
    %222 = vector.shape_cast %221 : vector<1x8x256xf32> to vector<8x256xf32>
    %cst_235 = arith.constant dense<0.000000e+00> : vector<32x256xf32>
    %223 = tpu.matmul %220, %222, %cst_235 {dimension_numbers = #tpu.dot_dimension_numbers<[1], [0], [0], [1], [0, 0, 1, 1], [], []>} : vector<32x8xf32>, vector<8x256xf32>, vector<32x256xf32> -> vector<32x256xf32>
    %224 = arith.addf %217, %223 : vector<32x256xf32>
    %c2_236 = arith.constant 2 : index
    %c0_237 = arith.constant 0 : index
    %c0_238 = arith.constant 0 : index
    %225 = vector.load %arg24[%c2_236, %c0_237, %c0_238] : memref<4x32x16xf32, #tpu.memory_space<vmem>>, vector<1x32x16xf32>
    %226 = vector.shape_cast %225 : vector<1x32x16xf32> to vector<32x16xf32>
    %cst_239 = arith.constant dense<0.000000e+00> : vector<32x8xf32>
    %227 = tpu.matmul %226, %208, %cst_239 {dimension_numbers = #tpu.dot_dimension_numbers<[1], [0], [0], [1], [0, 0, 1, 1], [], []>} : vector<32x16xf32>, vector<16x8xf32>, vector<32x8xf32> -> vector<32x8xf32>
    %c2_240 = arith.constant 2 : index
    %c0_241 = arith.constant 0 : index
    %c0_242 = arith.constant 0 : index
    %228 = vector.load %arg25[%c2_240, %c0_241, %c0_242] : memref<4x8x256xf32, #tpu.memory_space<vmem>>, vector<1x8x256xf32>
    %229 = vector.shape_cast %228 : vector<1x8x256xf32> to vector<8x256xf32>
    %cst_243 = arith.constant dense<0.000000e+00> : vector<32x256xf32>
    %230 = tpu.matmul %227, %229, %cst_243 {dimension_numbers = #tpu.dot_dimension_numbers<[1], [0], [0], [1], [0, 0, 1, 1], [], []>} : vector<32x8xf32>, vector<8x256xf32>, vector<32x256xf32> -> vector<32x256xf32>
    %231 = arith.addf %224, %230 : vector<32x256xf32>
    %c3_244 = arith.constant 3 : index
    %c0_245 = arith.constant 0 : index
    %c0_246 = arith.constant 0 : index
    %232 = vector.load %arg24[%c3_244, %c0_245, %c0_246] : memref<4x32x16xf32, #tpu.memory_space<vmem>>, vector<1x32x16xf32>
    %233 = vector.shape_cast %232 : vector<1x32x16xf32> to vector<32x16xf32>
    %cst_247 = arith.constant dense<0.000000e+00> : vector<32x8xf32>
    %234 = tpu.matmul %233, %208, %cst_247 {dimension_numbers = #tpu.dot_dimension_numbers<[1], [0], [0], [1], [0, 0, 1, 1], [], []>} : vector<32x16xf32>, vector<16x8xf32>, vector<32x8xf32> -> vector<32x8xf32>
    %c3_248 = arith.constant 3 : index
    %c0_249 = arith.constant 0 : index
    %c0_250 = arith.constant 0 : index
    %235 = vector.load %arg25[%c3_248, %c0_249, %c0_250] : memref<4x8x256xf32, #tpu.memory_space<vmem>>, vector<1x8x256xf32>
    %236 = vector.shape_cast %235 : vector<1x8x256xf32> to vector<8x256xf32>
    %cst_251 = arith.constant dense<0.000000e+00> : vector<32x256xf32>
    %237 = tpu.matmul %234, %236, %cst_251 {dimension_numbers = #tpu.dot_dimension_numbers<[1], [0], [0], [1], [0, 0, 1, 1], [], []>} : vector<32x8xf32>, vector<8x256xf32>, vector<32x256xf32> -> vector<32x256xf32>
    %238 = arith.addf %231, %237 : vector<32x256xf32>
    %cst_252 = arith.constant 0.000000e+00 : f32
    %239 = vector.broadcast %cst_252 : f32 to vector<32x256xf32>
    %240 = arith.maximumf %238, %239 : vector<32x256xf32>
    %c0_253 = arith.constant 0 : index
    %c0_254 = arith.constant 0 : index
    %241 = vector.load %arg29[%c0_253, %c0_254] : memref<1x136xf32, #tpu.memory_space<vmem>>, vector<1x136xf32>
    %c0_255 = arith.constant 0 : index
    %c0_256 = arith.constant 0 : index
    %c0_257 = arith.constant 0 : index
    %242 = vector.load %arg27[%c0_255, %c0_256, %c0_257] : memref<4x34x32xf32, #tpu.memory_space<vmem>>, vector<1x34x32xf32>
    %243 = vector.shape_cast %242 : vector<1x34x32xf32> to vector<34x32xf32>
    %cst_258 = arith.constant dense<0.000000e+00> : vector<34x256xf32>
    %244 = tpu.matmul %243, %240, %cst_258 {dimension_numbers = #tpu.dot_dimension_numbers<[1], [0], [0], [1], [0, 0, 1, 1], [], []>} : vector<34x32xf32>, vector<32x256xf32>, vector<34x256xf32> -> vector<34x256xf32>
    %c0_259 = arith.constant 0 : index
    %c0_260 = arith.constant 0 : index
    %c0_261 = arith.constant 0 : index
    %245 = vector.load %arg28[%c0_259, %c0_260, %c0_261] : memref<4x256x136xf32, #tpu.memory_space<vmem>>, vector<1x256x136xf32>
    %246 = vector.shape_cast %245 : vector<1x256x136xf32> to vector<256x136xf32>
    %cst_262 = arith.constant dense<0.000000e+00> : vector<34x136xf32>
    %247 = tpu.matmul %244, %246, %cst_262 {dimension_numbers = #tpu.dot_dimension_numbers<[1], [0], [0], [1], [0, 0, 1, 1], [], []>} : vector<34x256xf32>, vector<256x136xf32>, vector<34x136xf32> -> vector<34x136xf32>
    %248 = vector.broadcast %241 : vector<1x136xf32> to vector<34x136xf32>
    %249 = arith.addf %248, %247 : vector<34x136xf32>
    %c1_263 = arith.constant 1 : index
    %c0_264 = arith.constant 0 : index
    %c0_265 = arith.constant 0 : index
    %250 = vector.load %arg27[%c1_263, %c0_264, %c0_265] : memref<4x34x32xf32, #tpu.memory_space<vmem>>, vector<1x34x32xf32>
    %251 = vector.shape_cast %250 : vector<1x34x32xf32> to vector<34x32xf32>
    %cst_266 = arith.constant dense<0.000000e+00> : vector<34x256xf32>
    %252 = tpu.matmul %251, %240, %cst_266 {dimension_numbers = #tpu.dot_dimension_numbers<[1], [0], [0], [1], [0, 0, 1, 1], [], []>} : vector<34x32xf32>, vector<32x256xf32>, vector<34x256xf32> -> vector<34x256xf32>
    %c1_267 = arith.constant 1 : index
    %c0_268 = arith.constant 0 : index
    %c0_269 = arith.constant 0 : index
    %253 = vector.load %arg28[%c1_267, %c0_268, %c0_269] : memref<4x256x136xf32, #tpu.memory_space<vmem>>, vector<1x256x136xf32>
    %254 = vector.shape_cast %253 : vector<1x256x136xf32> to vector<256x136xf32>
    %cst_270 = arith.constant dense<0.000000e+00> : vector<34x136xf32>
    %255 = tpu.matmul %252, %254, %cst_270 {dimension_numbers = #tpu.dot_dimension_numbers<[1], [0], [0], [1], [0, 0, 1, 1], [], []>} : vector<34x256xf32>, vector<256x136xf32>, vector<34x136xf32> -> vector<34x136xf32>
    %256 = arith.addf %249, %255 : vector<34x136xf32>
    %c2_271 = arith.constant 2 : index
    %c0_272 = arith.constant 0 : index
    %c0_273 = arith.constant 0 : index
    %257 = vector.load %arg27[%c2_271, %c0_272, %c0_273] : memref<4x34x32xf32, #tpu.memory_space<vmem>>, vector<1x34x32xf32>
    %258 = vector.shape_cast %257 : vector<1x34x32xf32> to vector<34x32xf32>
    %cst_274 = arith.constant dense<0.000000e+00> : vector<34x256xf32>
    %259 = tpu.matmul %258, %240, %cst_274 {dimension_numbers = #tpu.dot_dimension_numbers<[1], [0], [0], [1], [0, 0, 1, 1], [], []>} : vector<34x32xf32>, vector<32x256xf32>, vector<34x256xf32> -> vector<34x256xf32>
    %c2_275 = arith.constant 2 : index
    %c0_276 = arith.constant 0 : index
    %c0_277 = arith.constant 0 : index
    %260 = vector.load %arg28[%c2_275, %c0_276, %c0_277] : memref<4x256x136xf32, #tpu.memory_space<vmem>>, vector<1x256x136xf32>
    %261 = vector.shape_cast %260 : vector<1x256x136xf32> to vector<256x136xf32>
    %cst_278 = arith.constant dense<0.000000e+00> : vector<34x136xf32>
    %262 = tpu.matmul %259, %261, %cst_278 {dimension_numbers = #tpu.dot_dimension_numbers<[1], [0], [0], [1], [0, 0, 1, 1], [], []>} : vector<34x256xf32>, vector<256x136xf32>, vector<34x136xf32> -> vector<34x136xf32>
    %263 = arith.addf %256, %262 : vector<34x136xf32>
    %c3_279 = arith.constant 3 : index
    %c0_280 = arith.constant 0 : index
    %c0_281 = arith.constant 0 : index
    %264 = vector.load %arg27[%c3_279, %c0_280, %c0_281] : memref<4x34x32xf32, #tpu.memory_space<vmem>>, vector<1x34x32xf32>
    %265 = vector.shape_cast %264 : vector<1x34x32xf32> to vector<34x32xf32>
    %cst_282 = arith.constant dense<0.000000e+00> : vector<34x256xf32>
    %266 = tpu.matmul %265, %240, %cst_282 {dimension_numbers = #tpu.dot_dimension_numbers<[1], [0], [0], [1], [0, 0, 1, 1], [], []>} : vector<34x32xf32>, vector<32x256xf32>, vector<34x256xf32> -> vector<34x256xf32>
    %c3_283 = arith.constant 3 : index
    %c0_284 = arith.constant 0 : index
    %c0_285 = arith.constant 0 : index
    %267 = vector.load %arg28[%c3_283, %c0_284, %c0_285] : memref<4x256x136xf32, #tpu.memory_space<vmem>>, vector<1x256x136xf32>
    %268 = vector.shape_cast %267 : vector<1x256x136xf32> to vector<256x136xf32>
    %cst_286 = arith.constant dense<0.000000e+00> : vector<34x136xf32>
    %269 = tpu.matmul %266, %268, %cst_286 {dimension_numbers = #tpu.dot_dimension_numbers<[1], [0], [0], [1], [0, 0, 1, 1], [], []>} : vector<34x256xf32>, vector<256x136xf32>, vector<34x136xf32> -> vector<34x136xf32>
    %270 = arith.addf %263, %269 : vector<34x136xf32>
    %cst_287 = arith.constant 0.000000e+00 : f32
    %271 = vector.broadcast %cst_287 : f32 to vector<34x136xf32>
    %272 = arith.maximumf %270, %271 : vector<34x136xf32>
    %c0_288 = arith.constant 0 : index
    %c0_289 = arith.constant 0 : index
    %273 = vector.load %arg32[%c0_288, %c0_289] : memref<1x64xf32, #tpu.memory_space<vmem>>, vector<1x64xf32>
    %c0_290 = arith.constant 0 : index
    %c0_291 = arith.constant 0 : index
    %c0_292 = arith.constant 0 : index
    %274 = vector.load %arg30[%c0_290, %c0_291, %c0_292] : memref<4x32x34xf32, #tpu.memory_space<vmem>>, vector<1x32x34xf32>
    %275 = vector.shape_cast %274 : vector<1x32x34xf32> to vector<32x34xf32>
    %cst_293 = arith.constant dense<0.000000e+00> : vector<32x136xf32>
    %276 = tpu.matmul %275, %272, %cst_293 {dimension_numbers = #tpu.dot_dimension_numbers<[1], [0], [0], [1], [0, 0, 1, 1], [], []>} : vector<32x34xf32>, vector<34x136xf32>, vector<32x136xf32> -> vector<32x136xf32>
    %c0_294 = arith.constant 0 : index
    %c0_295 = arith.constant 0 : index
    %c0_296 = arith.constant 0 : index
    %277 = vector.load %arg31[%c0_294, %c0_295, %c0_296] : memref<4x136x64xf32, #tpu.memory_space<vmem>>, vector<1x136x64xf32>
    %278 = vector.shape_cast %277 : vector<1x136x64xf32> to vector<136x64xf32>
    %cst_297 = arith.constant dense<0.000000e+00> : vector<32x64xf32>
    %279 = tpu.matmul %276, %278, %cst_297 {dimension_numbers = #tpu.dot_dimension_numbers<[1], [0], [0], [1], [0, 0, 1, 1], [], []>} : vector<32x136xf32>, vector<136x64xf32>, vector<32x64xf32> -> vector<32x64xf32>
    %280 = vector.broadcast %273 : vector<1x64xf32> to vector<32x64xf32>
    %281 = arith.addf %280, %279 : vector<32x64xf32>
    %c1_298 = arith.constant 1 : index
    %c0_299 = arith.constant 0 : index
    %c0_300 = arith.constant 0 : index
    %282 = vector.load %arg30[%c1_298, %c0_299, %c0_300] : memref<4x32x34xf32, #tpu.memory_space<vmem>>, vector<1x32x34xf32>
    %283 = vector.shape_cast %282 : vector<1x32x34xf32> to vector<32x34xf32>
    %cst_301 = arith.constant dense<0.000000e+00> : vector<32x136xf32>
    %284 = tpu.matmul %283, %272, %cst_301 {dimension_numbers = #tpu.dot_dimension_numbers<[1], [0], [0], [1], [0, 0, 1, 1], [], []>} : vector<32x34xf32>, vector<34x136xf32>, vector<32x136xf32> -> vector<32x136xf32>
    %c1_302 = arith.constant 1 : index
    %c0_303 = arith.constant 0 : index
    %c0_304 = arith.constant 0 : index
    %285 = vector.load %arg31[%c1_302, %c0_303, %c0_304] : memref<4x136x64xf32, #tpu.memory_space<vmem>>, vector<1x136x64xf32>
    %286 = vector.shape_cast %285 : vector<1x136x64xf32> to vector<136x64xf32>
    %cst_305 = arith.constant dense<0.000000e+00> : vector<32x64xf32>
    %287 = tpu.matmul %284, %286, %cst_305 {dimension_numbers = #tpu.dot_dimension_numbers<[1], [0], [0], [1], [0, 0, 1, 1], [], []>} : vector<32x136xf32>, vector<136x64xf32>, vector<32x64xf32> -> vector<32x64xf32>
    %288 = arith.addf %281, %287 : vector<32x64xf32>
    %c2_306 = arith.constant 2 : index
    %c0_307 = arith.constant 0 : index
    %c0_308 = arith.constant 0 : index
    %289 = vector.load %arg30[%c2_306, %c0_307, %c0_308] : memref<4x32x34xf32, #tpu.memory_space<vmem>>, vector<1x32x34xf32>
    %290 = vector.shape_cast %289 : vector<1x32x34xf32> to vector<32x34xf32>
    %cst_309 = arith.constant dense<0.000000e+00> : vector<32x136xf32>
    %291 = tpu.matmul %290, %272, %cst_309 {dimension_numbers = #tpu.dot_dimension_numbers<[1], [0], [0], [1], [0, 0, 1, 1], [], []>} : vector<32x34xf32>, vector<34x136xf32>, vector<32x136xf32> -> vector<32x136xf32>
    %c2_310 = arith.constant 2 : index
    %c0_311 = arith.constant 0 : index
    %c0_312 = arith.constant 0 : index
    %292 = vector.load %arg31[%c2_310, %c0_311, %c0_312] : memref<4x136x64xf32, #tpu.memory_space<vmem>>, vector<1x136x64xf32>
    %293 = vector.shape_cast %292 : vector<1x136x64xf32> to vector<136x64xf32>
    %cst_313 = arith.constant dense<0.000000e+00> : vector<32x64xf32>
    %294 = tpu.matmul %291, %293, %cst_313 {dimension_numbers = #tpu.dot_dimension_numbers<[1], [0], [0], [1], [0, 0, 1, 1], [], []>} : vector<32x136xf32>, vector<136x64xf32>, vector<32x64xf32> -> vector<32x64xf32>
    %295 = arith.addf %288, %294 : vector<32x64xf32>
    %c3_314 = arith.constant 3 : index
    %c0_315 = arith.constant 0 : index
    %c0_316 = arith.constant 0 : index
    %296 = vector.load %arg30[%c3_314, %c0_315, %c0_316] : memref<4x32x34xf32, #tpu.memory_space<vmem>>, vector<1x32x34xf32>
    %297 = vector.shape_cast %296 : vector<1x32x34xf32> to vector<32x34xf32>
    %cst_317 = arith.constant dense<0.000000e+00> : vector<32x136xf32>
    %298 = tpu.matmul %297, %272, %cst_317 {dimension_numbers = #tpu.dot_dimension_numbers<[1], [0], [0], [1], [0, 0, 1, 1], [], []>} : vector<32x34xf32>, vector<34x136xf32>, vector<32x136xf32> -> vector<32x136xf32>
    %c3_318 = arith.constant 3 : index
    %c0_319 = arith.constant 0 : index
    %c0_320 = arith.constant 0 : index
    %299 = vector.load %arg31[%c3_318, %c0_319, %c0_320] : memref<4x136x64xf32, #tpu.memory_space<vmem>>, vector<1x136x64xf32>
    %300 = vector.shape_cast %299 : vector<1x136x64xf32> to vector<136x64xf32>
    %cst_321 = arith.constant dense<0.000000e+00> : vector<32x64xf32>
    %301 = tpu.matmul %298, %300, %cst_321 {dimension_numbers = #tpu.dot_dimension_numbers<[1], [0], [0], [1], [0, 0, 1, 1], [], []>} : vector<32x136xf32>, vector<136x64xf32>, vector<32x64xf32> -> vector<32x64xf32>
    %302 = arith.addf %295, %301 : vector<32x64xf32>
    %cst_322 = arith.constant 0.000000e+00 : f32
    %303 = vector.broadcast %cst_322 : f32 to vector<32x64xf32>
    %304 = arith.maximumf %302, %303 : vector<32x64xf32>
    %c0_323 = arith.constant 0 : index
    %c0_324 = arith.constant 0 : index
    %305 = vector.load %arg35[%c0_323, %c0_324] : memref<1x32xf32, #tpu.memory_space<vmem>>, vector<1x32xf32>
    %c0_325 = arith.constant 0 : index
    %c0_326 = arith.constant 0 : index
    %c0_327 = arith.constant 0 : index
    %306 = vector.load %arg33[%c0_325, %c0_326, %c0_327] : memref<4x64x32xf32, #tpu.memory_space<vmem>>, vector<1x64x32xf32>
    %307 = vector.shape_cast %306 : vector<1x64x32xf32> to vector<64x32xf32>
    %cst_328 = arith.constant dense<0.000000e+00> : vector<64x64xf32>
    %308 = tpu.matmul %307, %304, %cst_328 {dimension_numbers = #tpu.dot_dimension_numbers<[1], [0], [0], [1], [0, 0, 1, 1], [], []>} : vector<64x32xf32>, vector<32x64xf32>, vector<64x64xf32> -> vector<64x64xf32>
    %c0_329 = arith.constant 0 : index
    %c0_330 = arith.constant 0 : index
    %c0_331 = arith.constant 0 : index
    %309 = vector.load %arg34[%c0_329, %c0_330, %c0_331] : memref<4x64x32xf32, #tpu.memory_space<vmem>>, vector<1x64x32xf32>
    %310 = vector.shape_cast %309 : vector<1x64x32xf32> to vector<64x32xf32>
    %cst_332 = arith.constant dense<0.000000e+00> : vector<64x32xf32>
    %311 = tpu.matmul %308, %310, %cst_332 {dimension_numbers = #tpu.dot_dimension_numbers<[1], [0], [0], [1], [0, 0, 1, 1], [], []>} : vector<64x64xf32>, vector<64x32xf32>, vector<64x32xf32> -> vector<64x32xf32>
    %312 = vector.broadcast %305 : vector<1x32xf32> to vector<64x32xf32>
    %313 = arith.addf %312, %311 : vector<64x32xf32>
    %c1_333 = arith.constant 1 : index
    %c0_334 = arith.constant 0 : index
    %c0_335 = arith.constant 0 : index
    %314 = vector.load %arg33[%c1_333, %c0_334, %c0_335] : memref<4x64x32xf32, #tpu.memory_space<vmem>>, vector<1x64x32xf32>
    %315 = vector.shape_cast %314 : vector<1x64x32xf32> to vector<64x32xf32>
    %cst_336 = arith.constant dense<0.000000e+00> : vector<64x64xf32>
    %316 = tpu.matmul %315, %304, %cst_336 {dimension_numbers = #tpu.dot_dimension_numbers<[1], [0], [0], [1], [0, 0, 1, 1], [], []>} : vector<64x32xf32>, vector<32x64xf32>, vector<64x64xf32> -> vector<64x64xf32>
    %c1_337 = arith.constant 1 : index
    %c0_338 = arith.constant 0 : index
    %c0_339 = arith.constant 0 : index
    %317 = vector.load %arg34[%c1_337, %c0_338, %c0_339] : memref<4x64x32xf32, #tpu.memory_space<vmem>>, vector<1x64x32xf32>
    %318 = vector.shape_cast %317 : vector<1x64x32xf32> to vector<64x32xf32>
    %cst_340 = arith.constant dense<0.000000e+00> : vector<64x32xf32>
    %319 = tpu.matmul %316, %318, %cst_340 {dimension_numbers = #tpu.dot_dimension_numbers<[1], [0], [0], [1], [0, 0, 1, 1], [], []>} : vector<64x64xf32>, vector<64x32xf32>, vector<64x32xf32> -> vector<64x32xf32>
    %320 = arith.addf %313, %319 : vector<64x32xf32>
    %c2_341 = arith.constant 2 : index
    %c0_342 = arith.constant 0 : index
    %c0_343 = arith.constant 0 : index
    %321 = vector.load %arg33[%c2_341, %c0_342, %c0_343] : memref<4x64x32xf32, #tpu.memory_space<vmem>>, vector<1x64x32xf32>
    %322 = vector.shape_cast %321 : vector<1x64x32xf32> to vector<64x32xf32>
    %cst_344 = arith.constant dense<0.000000e+00> : vector<64x64xf32>
    %323 = tpu.matmul %322, %304, %cst_344 {dimension_numbers = #tpu.dot_dimension_numbers<[1], [0], [0], [1], [0, 0, 1, 1], [], []>} : vector<64x32xf32>, vector<32x64xf32>, vector<64x64xf32> -> vector<64x64xf32>
    %c2_345 = arith.constant 2 : index
    %c0_346 = arith.constant 0 : index
    %c0_347 = arith.constant 0 : index
    %324 = vector.load %arg34[%c2_345, %c0_346, %c0_347] : memref<4x64x32xf32, #tpu.memory_space<vmem>>, vector<1x64x32xf32>
    %325 = vector.shape_cast %324 : vector<1x64x32xf32> to vector<64x32xf32>
    %cst_348 = arith.constant dense<0.000000e+00> : vector<64x32xf32>
    %326 = tpu.matmul %323, %325, %cst_348 {dimension_numbers = #tpu.dot_dimension_numbers<[1], [0], [0], [1], [0, 0, 1, 1], [], []>} : vector<64x64xf32>, vector<64x32xf32>, vector<64x32xf32> -> vector<64x32xf32>
    %327 = arith.addf %320, %326 : vector<64x32xf32>
    %c3_349 = arith.constant 3 : index
    %c0_350 = arith.constant 0 : index
    %c0_351 = arith.constant 0 : index
    %328 = vector.load %arg33[%c3_349, %c0_350, %c0_351] : memref<4x64x32xf32, #tpu.memory_space<vmem>>, vector<1x64x32xf32>
    %329 = vector.shape_cast %328 : vector<1x64x32xf32> to vector<64x32xf32>
    %cst_352 = arith.constant dense<0.000000e+00> : vector<64x64xf32>
    %330 = tpu.matmul %329, %304, %cst_352 {dimension_numbers = #tpu.dot_dimension_numbers<[1], [0], [0], [1], [0, 0, 1, 1], [], []>} : vector<64x32xf32>, vector<32x64xf32>, vector<64x64xf32> -> vector<64x64xf32>
    %c3_353 = arith.constant 3 : index
    %c0_354 = arith.constant 0 : index
    %c0_355 = arith.constant 0 : index
    %331 = vector.load %arg34[%c3_353, %c0_354, %c0_355] : memref<4x64x32xf32, #tpu.memory_space<vmem>>, vector<1x64x32xf32>
    %332 = vector.shape_cast %331 : vector<1x64x32xf32> to vector<64x32xf32>
    %cst_356 = arith.constant dense<0.000000e+00> : vector<64x32xf32>
    %333 = tpu.matmul %330, %332, %cst_356 {dimension_numbers = #tpu.dot_dimension_numbers<[1], [0], [0], [1], [0, 0, 1, 1], [], []>} : vector<64x64xf32>, vector<64x32xf32>, vector<64x32xf32> -> vector<64x32xf32>
    %334 = arith.addf %327, %333 : vector<64x32xf32>
    %cst_357 = arith.constant 5.000000e-01 : f32
    %335 = vector.broadcast %cst_357 : f32 to vector<64x32xf32>
    %336 = arith.mulf %335, %334 : vector<64x32xf32>
    %337 = math.tanh %336 : vector<64x32xf32>
    %cst_358 = arith.constant 1.000000e+00 : f32
    %338 = vector.broadcast %cst_358 : f32 to vector<64x32xf32>
    %339 = arith.addf %337, %338 : vector<64x32xf32>
    %cst_359 = arith.constant 5.000000e-01 : f32
    %340 = vector.broadcast %cst_359 : f32 to vector<64x32xf32>
    %341 = arith.mulf %340, %339 : vector<64x32xf32>
    %c0_360 = arith.constant 0 : index
    %c0_361 = arith.constant 0 : index
    %342 = vector.load %arg36[%c0_360, %c0_361] : memref<64x32xf32, #tpu.memory_space<vmem>>, vector<64x32xf32>
    tpu.vector_store %arg36[%c0_360, %c0_361], %341 {strides = array<i32>} : memref<64x32xf32, #tpu.memory_space<vmem>>, vector<64x32xf32>,
    return
  }
  func.func @transform_0(%arg0: i32) -> (i32, i32) {
    %c0_i32 = arith.constant 0 : i32
    %c0_i32_0 = arith.constant 0 : i32
    %c0_i32_1 = arith.constant 0 : i32
    return %c0_i32, %c0_i32_0 : i32, i32
  }
  func.func @transform_1(%arg0: i32) -> (i32, i32, i32) {
    %c0_i32 = arith.constant 0 : i32
    %c0_i32_0 = arith.constant 0 : i32
    %c0_i32_1 = arith.constant 0 : i32
    %c0_i32_2 = arith.constant 0 : i32
    return %c0_i32, %c0_i32_0, %c0_i32_1 : i32, i32, i32
  }
  func.func @transform_2(%arg0: i32) -> (i32, i32, i32) {
    %c0_i32 = arith.constant 0 : i32
    %c0_i32_0 = arith.constant 0 : i32
    %c0_i32_1 = arith.constant 0 : i32
    %c0_i32_2 = arith.constant 0 : i32
    return %c0_i32, %c0_i32_0, %c0_i32_1 : i32, i32, i32
  }
  func.func @transform_3(%arg0: i32) -> (i32, i32) {
    %c0_i32 = arith.constant 0 : i32
    %c0_i32_0 = arith.constant 0 : i32
    %c0_i32_1 = arith.constant 0 : i32
    return %c0_i32, %c0_i32_0 : i32, i32
  }
  func.func @transform_4(%arg0: i32) -> (i32, i32, i32) {
    %c0_i32 = arith.constant 0 : i32
    %c0_i32_0 = arith.constant 0 : i32
    %c0_i32_1 = arith.constant 0 : i32
    %c0_i32_2 = arith.constant 0 : i32
    return %c0_i32, %c0_i32_0, %c0_i32_1 : i32, i32, i32
  }
  func.func @transform_5(%arg0: i32) -> (i32, i32, i32) {
    %c0_i32 = arith.constant 0 : i32
    %c0_i32_0 = arith.constant 0 : i32
    %c0_i32_1 = arith.constant 0 : i32
    %c0_i32_2 = arith.constant 0 : i32
    return %c0_i32, %c0_i32_0, %c0_i32_1 : i32, i32, i32
  }
  func.func @transform_6(%arg0: i32) -> (i32, i32) {
    %c0_i32 = arith.constant 0 : i32
    %c0_i32_0 = arith.constant 0 : i32
    %c0_i32_1 = arith.constant 0 : i32
    return %c0_i32, %c0_i32_0 : i32, i32
  }
  func.func @transform_7(%arg0: i32) -> (i32, i32, i32) {
    %c0_i32 = arith.constant 0 : i32
    %c0_i32_0 = arith.constant 0 : i32
    %c0_i32_1 = arith.constant 0 : i32
    %c0_i32_2 = arith.constant 0 : i32
    return %c0_i32, %c0_i32_0, %c0_i32_1 : i32, i32, i32
  }
  func.func @transform_8(%arg0: i32) -> (i32, i32, i32) {
    %c0_i32 = arith.constant 0 : i32
    %c0_i32_0 = arith.constant 0 : i32
    %c0_i32_1 = arith.constant 0 : i32
    %c0_i32_2 = arith.constant 0 : i32
    return %c0_i32, %c0_i32_0, %c0_i32_1 : i32, i32, i32
  }
  func.func @transform_9(%arg0: i32) -> (i32, i32) {
    %c0_i32 = arith.constant 0 : i32
    %c0_i32_0 = arith.constant 0 : i32
    %c0_i32_1 = arith.constant 0 : i32
    return %c0_i32, %c0_i32_0 : i32, i32
  }
  func.func @transform_10(%arg0: i32) -> (i32, i32, i32) {
    %c0_i32 = arith.constant 0 : i32
    %c0_i32_0 = arith.constant 0 : i32
    %c0_i32_1 = arith.constant 0 : i32
    %c0_i32_2 = arith.constant 0 : i32
    return %c0_i32, %c0_i32_0, %c0_i32_1 : i32, i32, i32
  }
  func.func @transform_11(%arg0: i32) -> (i32, i32, i32) {
    %c0_i32 = arith.constant 0 : i32
    %c0_i32_0 = arith.constant 0 : i32
    %c0_i32_1 = arith.constant 0 : i32
    %c0_i32_2 = arith.constant 0 : i32
    return %c0_i32, %c0_i32_0, %c0_i32_1 : i32, i32, i32
  }
  func.func @transform_12(%arg0: i32) -> (i32, i32) {
    %c0_i32 = arith.constant 0 : i32
    %c0_i32_0 = arith.constant 0 : i32
    %c0_i32_1 = arith.constant 0 : i32
    return %c0_i32, %c0_i32_0 : i32, i32
  }
  func.func @transform_13(%arg0: i32) -> (i32, i32, i32) {
    %c0_i32 = arith.constant 0 : i32
    %c0_i32_0 = arith.constant 0 : i32
    %c0_i32_1 = arith.constant 0 : i32
    %c0_i32_2 = arith.constant 0 : i32
    return %c0_i32, %c0_i32_0, %c0_i32_1 : i32, i32, i32
  }
  func.func @transform_14(%arg0: i32) -> (i32, i32, i32) {
    %c0_i32 = arith.constant 0 : i32
    %c0_i32_0 = arith.constant 0 : i32
    %c0_i32_1 = arith.constant 0 : i32
    %c0_i32_2 = arith.constant 0 : i32
    return %c0_i32, %c0_i32_0, %c0_i32_1 : i32, i32, i32
  }
  func.func @transform_15(%arg0: i32) -> (i32, i32) {
    %c0_i32 = arith.constant 0 : i32
    %c0_i32_0 = arith.constant 0 : i32
    %c0_i32_1 = arith.constant 0 : i32
    return %c0_i32, %c0_i32_0 : i32, i32
  }
  func.func @transform_16(%arg0: i32) -> (i32, i32) {
    %c0_i32 = arith.constant 0 : i32
    %c0_i32_0 = arith.constant 0 : i32
    %c0_i32_1 = arith.constant 0 : i32
    return %c0_i32, %c0_i32_0 : i32, i32
  }
  func.func @transform_17(%arg0: i32) -> (i32, i32) {
    %c0_i32 = arith.constant 0 : i32
    %c0_i32_0 = arith.constant 0 : i32
    %c0_i32_1 = arith.constant 0 : i32
    return %c0_i32, %c0_i32_0 : i32, i32
  }
  func.func @transform_18(%arg0: i32) -> (i32, i32) {
    %c0_i32 = arith.constant 0 : i32
    %c0_i32_0 = arith.constant 0 : i32
    %c0_i32_1 = arith.constant 0 : i32
    return %c0_i32, %c0_i32_0 : i32, i32
  }
  func.func @transform_19(%arg0: i32) -> (i32, i32) {
    %c0_i32 = arith.constant 0 : i32
    %c0_i32_0 = arith.constant 0 : i32
    %c0_i32_1 = arith.constant 0 : i32
    return %c0_i32, %c0_i32_0 : i32, i32
  }
  func.func @transform_20(%arg0: i32) -> (i32, i32, i32) {
    %c0_i32 = arith.constant 0 : i32
    %c0_i32_0 = arith.constant 0 : i32
    %c0_i32_1 = arith.constant 0 : i32
    %c0_i32_2 = arith.constant 0 : i32
    return %c0_i32, %c0_i32_0, %c0_i32_1 : i32, i32, i32
  }
  func.func @transform_21(%arg0: i32) -> (i32, i32, i32) {
    %c0_i32 = arith.constant 0 : i32
    %c0_i32_0 = arith.constant 0 : i32
    %c0_i32_1 = arith.constant 0 : i32
    %c0_i32_2 = arith.constant 0 : i32
    return %c0_i32, %c0_i32_0, %c0_i32_1 : i32, i32, i32
  }
  func.func @transform_22(%arg0: i32) -> (i32, i32) {
    %c0_i32 = arith.constant 0 : i32
    %c0_i32_0 = arith.constant 0 : i32
    %c0_i32_1 = arith.constant 0 : i32
    return %c0_i32, %c0_i32_0 : i32, i32
  }
  func.func @transform_23(%arg0: i32) -> (i32, i32, i32) {
    %c0_i32 = arith.constant 0 : i32
    %c0_i32_0 = arith.constant 0 : i32
    %c0_i32_1 = arith.constant 0 : i32
    %c0_i32_2 = arith.constant 0 : i32
    return %c0_i32, %c0_i32_0, %c0_i32_1 : i32, i32, i32
  }
  func.func @transform_24(%arg0: i32) -> (i32, i32, i32) {
    %c0_i32 = arith.constant 0 : i32
    %c0_i32_0 = arith.constant 0 : i32
    %c0_i32_1 = arith.constant 0 : i32
    %c0_i32_2 = arith.constant 0 : i32
    return %c0_i32, %c0_i32_0, %c0_i32_1 : i32, i32, i32
  }
  func.func @transform_25(%arg0: i32) -> (i32, i32) {
    %c0_i32 = arith.constant 0 : i32
    %c0_i32_0 = arith.constant 0 : i32
    %c0_i32_1 = arith.constant 0 : i32
    return %c0_i32, %c0_i32_0 : i32, i32
  }
  func.func @transform_26(%arg0: i32) -> (i32, i32, i32) {
    %c0_i32 = arith.constant 0 : i32
    %c0_i32_0 = arith.constant 0 : i32
    %c0_i32_1 = arith.constant 0 : i32
    %c0_i32_2 = arith.constant 0 : i32
    return %c0_i32, %c0_i32_0, %c0_i32_1 : i32, i32, i32
  }
  func.func @transform_27(%arg0: i32) -> (i32, i32, i32) {
    %c0_i32 = arith.constant 0 : i32
    %c0_i32_0 = arith.constant 0 : i32
    %c0_i32_1 = arith.constant 0 : i32
    %c0_i32_2 = arith.constant 0 : i32
    return %c0_i32, %c0_i32_0, %c0_i32_1 : i32, i32, i32
  }
  func.func @transform_28(%arg0: i32) -> (i32, i32) {
    %c0_i32 = arith.constant 0 : i32
    %c0_i32_0 = arith.constant 0 : i32
    %c0_i32_1 = arith.constant 0 : i32
    return %c0_i32, %c0_i32_0 : i32, i32
  }
  func.func @transform_29(%arg0: i32) -> (i32, i32, i32) {
    %c0_i32 = arith.constant 0 : i32
    %c0_i32_0 = arith.constant 0 : i32
    %c0_i32_1 = arith.constant 0 : i32
    %c0_i32_2 = arith.constant 0 : i32
    return %c0_i32, %c0_i32_0, %c0_i32_1 : i32, i32, i32
  }
  func.func @transform_30(%arg0: i32) -> (i32, i32, i32) {
    %c0_i32 = arith.constant 0 : i32
    %c0_i32_0 = arith.constant 0 : i32
    %c0_i32_1 = arith.constant 0 : i32
    %c0_i32_2 = arith.constant 0 : i32
    return %c0_i32, %c0_i32_0, %c0_i32_1 : i32, i32, i32
  }
  func.func @transform_31(%arg0: i32) -> (i32, i32) {
    %c0_i32 = arith.constant 0 : i32
    %c0_i32_0 = arith.constant 0 : i32
    %c0_i32_1 = arith.constant 0 : i32
    return %c0_i32, %c0_i32_0 : i32, i32
  }
  func.func @transform_32(%arg0: i32) -> (i32, i32, i32) {
    %c0_i32 = arith.constant 0 : i32
    %c0_i32_0 = arith.constant 0 : i32
    %c0_i32_1 = arith.constant 0 : i32
    %c0_i32_2 = arith.constant 0 : i32
    return %c0_i32, %c0_i32_0, %c0_i32_1 : i32, i32, i32
  }
  func.func @transform_33(%arg0: i32) -> (i32, i32, i32) {
    %c0_i32 = arith.constant 0 : i32
    %c0_i32_0 = arith.constant 0 : i32
    %c0_i32_1 = arith.constant 0 : i32
    %c0_i32_2 = arith.constant 0 : i32
    return %c0_i32, %c0_i32_0, %c0_i32_1 : i32, i32, i32
  }
  func.func @transform_34(%arg0: i32) -> (i32, i32) {
    %c0_i32 = arith.constant 0 : i32
    %c0_i32_0 = arith.constant 0 : i32
    %c0_i32_1 = arith.constant 0 : i32
    return %c0_i32, %c0_i32_0 : i32, i32
  }
  func.func @transform_35(%arg0: i32) -> (i32, i32) {
    %c0_i32 = arith.constant 0 : i32
    %c0_i32_0 = arith.constant 0 : i32
    %c0_i32_1 = arith.constant 0 : i32
    return %c0_i32, %c0_i32_0 : i32, i32
  }
  func.func @transform_36(%arg0: i32) -> (i32, i32) {
    %c0_i32 = arith.constant 0 : i32
    %c0_i32_0 = arith.constant 0 : i32
    %c0_i32_1 = arith.constant 0 : i32
    return %c0_i32, %c0_i32_0 : i32, i32
  }
  func.func @transform_37(%arg0: i32) -> (i32, i32) {
    %c0_i32 = arith.constant 0 : i32
    %c0_i32_0 = arith.constant 0 : i32
    %c0_i32_1 = arith.constant 0 : i32
    return %c0_i32, %c0_i32_0 : i32, i32
  }
}

</mosaic_0001>

<bundles_post_ra>
// kernel: autoencoder_forward.1
= control target key start
LH: loop header
LB: loop body
LE: loop exit
PB: predicated region body
PF: predicated region fallthrough
CT: control target
= control target key end

     0   :  { %s12026_s6 = smov 1   ;;  %s12027_s10 = smov 2   ;;  %s13646_s0 = inlined_call_operand.smem [shape: u32[38], index: -1, kind: input, shape index: {}] }
   0x1   :  { %s12080_s5 = sld [smem:[%s13646_s0]]   ;;  %s12028_s14 = smov 3  }
   0x2   :  { %s12085_s9 = sld [smem:[%s13646_s0 + %s12026_s6]]   ;;  %s12029_s18 = smov 4  }
   0x3   :  { %s12090_s13 = sld [smem:[%s13646_s0 + %s12027_s10]]   ;;  %s12030_s22 = smov 5  }
   0x4   :  { %s12095_s17 = sld [smem:[%s13646_s0 + %s12028_s14]]   ;;  %s12031_s26 = smov 6  }
   0x5   :  { %s12100_s21 = sld [smem:[%s13646_s0 + %s12029_s18]]   ;;  %s12032_s30 = smov 7  }
   0x6   :  { %s12105_s25 = sld [smem:[%s13646_s0 + %s12030_s22]]   ;;  %s12033_s4 = smov 8  }
   0x7   :  { %s12110_s29 = sld [smem:[%s13646_s0 + %s12031_s26]]   ;;  %s12034_s10 = smov 9  }
   0x8   :  { %s12115_s3 = sld [smem:[%s13646_s0 + %s12032_s30]]   ;;  %s12035_s15 = smov 10  }
   0x9   :  { %s12120_s8 = sld [smem:[%s13646_s0 + %s12033_s4]]   ;;  %s12036_s20 = smov 11  }
   0xa   :  { %s12125_s14 = sld [smem:[%s13646_s0 + %s12034_s10]]   ;;  %s12037_s26 = smov 12  }
   0xb   :  { %s12130_s19 = sld [smem:[%s13646_s0 + %s12035_s15]]   ;;  %s12038_s1 = smov 13  }
   0xc   :  { %s12135_s24 = sld [smem:[%s13646_s0 + %s12036_s20]]   ;;  %s12039_s7 = smov 14  }
   0xd   :  { %s12140_s30 = sld [smem:[%s13646_s0 + %s12037_s26]]   ;;  %s12040_s15 = smov 15  }
   0xe   :  { %s12145_s6 = sld [smem:[%s13646_s0 + %s12038_s1]]   ;;  %s12041_s22 = smov 16  }
   0xf   :  { %s12150_s12 = sld [smem:[%s13646_s0 + %s12039_s7]]   ;;  %s12042_s28 = smov 17  }
  0x10   :  { %s12155_s20 = sld [smem:[%s13646_s0 + %s12040_s15]]   ;;  %s12043_s7 = smov 18  }
  0x11   :  { %s12160_s27 = sld [smem:[%s13646_s0 + %s12041_s22]]   ;;  %s12044_s15 = smov 19  }
  0x12   :  { %s12165_s4 = sld [smem:[%s13646_s0 + %s12042_s28]]   ;;  %s12045_s22 = smov 20  }
  0x13   :  { %s12046_s28 = smov 21  }
  0x14   :  { %13660 = sst [smem:[#allocation9_spill]] %s12145_s6 }
  0x15   :  { %s12170_s6 = sld [smem:[%s13646_s0 + %s12043_s7]]   ;;  %s12047_s7 = smov 22  }
  0x16   :  { %13661 = sst [smem:[#allocation10_spill]] %s12155_s20 }
  0x17   :  { %13662 = sst [smem:[#allocation11_spill]] %s12160_s27 }
  0x18   :  { %13663 = sst [smem:[#allocation12_spill]] %s12165_s4 }
  0x19   :  { %s12175_s20 = sld [smem:[%s13646_s0 + %s12044_s15]]   ;;  %s12048_s15 = smov 23  }
  0x1a   :  { %s12180_s27 = sld [smem:[%s13646_s0 + %s12045_s22]]   ;;  %s12049_s22 = smov 24  }
  0x1b   :  { %13664 = sst [smem:[#allocation13_spill]] %s12170_s6 }
  0x1c   :  { %s12185_s4 = sld [smem:[%s13646_s0 + %s12046_s28]]   ;;  %s12050_s28 = smov 25  }
  0x1d   :  { %s12190_s6 = sld [smem:[%s13646_s0 + %s12047_s7]]   ;;  %s12051_s7 = smov 26  }
  0x1f   :  { %13665 = sst [smem:[#allocation14_spill]] %s12175_s20 }
  0x20   :  { %13666 = sst [smem:[#allocation15_spill]] %s12180_s27 }
  0x21   :  { %s12195_s20 = sld [smem:[%s13646_s0 + %s12048_s15]]   ;;  %s12052_s15 = smov 27  }
  0x22   :  { %13667 = sst [smem:[#allocation16_spill]] %s12185_s4 }
  0x23   :  { %13668 = sst [smem:[#allocation17_spill]] %s12190_s6 }
  0x24   :  { %s12200_s27 = sld [smem:[%s13646_s0 + %s12049_s22]]   ;;  %s12053_s22 = smov 28  }
  0x25   :  { %s12205_s4 = sld [smem:[%s13646_s0 + %s12050_s28]]   ;;  %s12054_s28 = smov 29  }
  0x26   :  { %s12210_s6 = sld [smem:[%s13646_s0 + %s12051_s7]]   ;;  %s12055_s7 = smov 30  }
  0x27   :  { %13669 = sst [smem:[#allocation18_spill]] %s12195_s20 }
  0x28   :  { %s12215_s20 = sld [smem:[%s13646_s0 + %s12052_s15]]   ;;  %s12056_s15 = smov 31  }
  0x2a   :  { %13670 = sst [smem:[#allocation19_spill]] %s12200_s27 }
  0x2b   :  { %13671 = sst [smem:[#allocation20_spill]] %s12205_s4 }
  0x2c   :  { %13672 = sst [smem:[#allocation21_spill]] %s12210_s6 }
  0x2d   :  { %s12220_s27 = sld [smem:[%s13646_s0 + %s12053_s22]]   ;;  %s12057_s22 = smov 32  }
  0x2e   :  { %13673 = sst [smem:[#allocation22_spill]] %s12215_s20 }
  0x2f   :  { %s12225_s4 = sld [smem:[%s13646_s0 + %s12054_s28]]   ;;  %s12058_s28 = smov 33  }
  0x30   :  { %s12230_s6 = sld [smem:[%s13646_s0 + %s12055_s7]]   ;;  %s12059_s7 = smov 34  }
  0x31   :  { %s12235_s20 = sld [smem:[%s13646_s0 + %s12056_s15]]   ;;  %s12060_s15 = smov 35  }
  0x33   :  { %13674 = sst [smem:[#allocation23_spill]] %s12220_s27 }
  0x34   :  { %s12240_s27 = sld [smem:[%s13646_s0 + %s12057_s22]]   ;;  %s12061_s22 = smov 36  }
  0x35   :  { %13675 = sst [smem:[#allocation24_spill]] %s12225_s4 }
  0x36   :  { %13676 = sst [smem:[#allocation25_spill]] %s12230_s6 }
  0x37   :  { %13677 = sst [smem:[#allocation26_spill]] %s12235_s20 }
  0x38   :  { %s12245_s4 = sld [smem:[%s13646_s0 + %s12058_s28]]   ;;  %s12062_s28 = smov 37  }
  0x39   :  { %s12250_s6 = sld [smem:[%s13646_s0 + %s12059_s7]]  }
  0x3a   :  { %13678 = sst [smem:[#allocation27_spill]] %s12240_s27 }
  0x3b   :  { %s12255_s20 = sld [smem:[%s13646_s0 + %s12060_s15]]  }
  0x3c   :  { %s12260_s27 = sld [smem:[%s13646_s0 + %s12061_s22]]  }
  0x3e   :  { %13679 = sst [smem:[#allocation28_spill]] %s12245_s4 }
  0x3f   :  { %s12265_s4 = sld [smem:[%s13646_s0 + %s12062_s28]]  }
  0x40   :  { %81 = vsyncpa [#allocation3], 0  ;;  %v153_v0 = vld [vmem:[%s12080_s5] sm:$0xff]  ;;  %v154_v1 = vld [vmem:[%s12080_s5 + $0x8] sm:$0xff]  ;;  %vm166_vm0 = vcmask 523264  }
  0x41   :  { %v155_v2 = vld [vmem:[%s12080_s5 + $0x10] sm:$0xff]  ;;  %v10823_v3 = vpack.c.bf16 %v154_v1, %v153_v0  ;;  %v156_v4 = vld [vmem:[%s12080_s5 + $0x18] sm:$0xff]  ;;  %v157_v6 = vld [vmem:[%s12080_s5 + $0x20] sm:$0xff] }
  0x42   :  { %v12271_v5 = vpack.c.bf16 %v156_v4, %v155_v2  ;;  %v158_v7 = vld [vmem:[%s12080_s5 + $0x28] sm:$0xff]  ;;  %v162_v8 = vld [vmem:[%s12085_s9] sm:$0xff]  ;;  %v266_v11 = vld [vmem:[%s12090_s13 + $0x10] sm:$0xff] }
  0x43   :  { %10824 = vmatprep.subr.bf16.mxu0 %v10823_v3  ;;  %9989 = vmatprep.mubr.msk.f32.mxu0 %vm166_vm0, %v162_v8  ;;  %v264_v9 = vld [vmem:[%s12090_s13] sm:$0xff]  ;;  %v265_v10 = vld [vmem:[%s12090_s13 + $0x8] sm:$0xff]  ;;  %v10831_v12 = vpack.c.bf16 %v158_v7, %v157_v6  ;;  %v267_v14 = vld [vmem:[%s12090_s13 + $0x18] sm:$0xff] }
  0x44   :  { %10826 = vmatpush3.bf16.msra.mxu0 %v10823_v3  ;;  %v10839_v13 = vpack.c.bf16 %v265_v10, %v264_v9 }
  0x45   :  { %10828 = vmatprep.subr.bf16.mxu0 %v12271_v5 }
  0x46   :  { %82 = vsyncpa [#allocation5], 0  ;;  %v159_v15 = vld [vmem:[%s12080_s5 + $0x30] sm:$0xff]  ;;  %v160_v16 = vld [vmem:[%s12080_s5 + $0x38] sm:$0xff]  ;;  %v10843_v17 = vpack.c.bf16 %v267_v14, %v266_v11  ;;  %10840 = vmatprep.subr.bf16.mxu1 %v10839_v13  ;;  %vm268_vm1 = vcmask 261120   ;;  %vm12064_vm2 = vmmov 0  }
  0x47   :  { %10842 = vmatpush3.bf16.msra.mxu1 %v10839_v13  ;;  %v10835_v18 = vpack.c.bf16 %v160_v16, %v159_v15  ;;  %v163_v19 = vld [vmem:[%s12085_s9 + $0x8] sm:$0xff]  ;;  %v164_v20 = vld [vmem:[%s12085_s9 + $0x10] sm:$0xff]  ;;  %v165_v21 = vld [vmem:[%s12085_s9 + $0x18] sm:$0xff]  ;;  %vm1333_vm3 = vcmask 130048   ;;  %vm1814_vm4 = vcmask 64512   ;;  %s13680_s0 = sld [smem:[#allocation9_spill]] }
  0x48   :  { %10830 = vmatpush3.bf16.msra.mxu0 %v12271_v5  ;;  %10844 = vmatprep.subr.bf16.mxu1 %v10843_v17  ;;  %v8778_v22 = vld [vmem:[%s12085_s9 + $0x40] sm:$0xff]  ;;  %v8779_v23 = vld [vmem:[%s12085_s9 + $0x48] sm:$0xff]  ;;  %v8780_v24 = vld [vmem:[%s12085_s9 + $0x50] sm:$0xff]  ;;  %vm2615_vm5 = vcmask 1043456   ;;  %vm2611_vm6 = vcmask 31744   ;;  %s13681_s5 = sld [smem:[#allocation11_spill]] }
  0x49   :  { %10832 = vmatprep.subr.bf16.mxu0 %v10831_v12  ;;  %v8781_v25 = vld [vmem:[%s12085_s9 + $0x58] sm:$0xff]  ;;  %v8762_v30 = vld [vmem:[%s12085_s9 + $0x20] sm:$0xff]  ;;  %v8771_v32 = vld [vmem:[%s12090_s13 + $0x28] sm:$0xff]  ;;  %vm2938_vm7 = vcmask 162816   ;;  %vm3033_vm8 = vcmask 1041408   ;;  %vm3030_vm9 = vcmask 15360  }
  0x4a   :  { %v8770_v31 = vld [vmem:[%s12090_s13 + $0x20] sm:$0xff]  ;;  %v8772_v34 = vld [vmem:[%s12090_s13 + $0x30] sm:$0xff]  ;;  %v8773_v35 = vld [vmem:[%s12090_s13 + $0x38] sm:$0xff]  ;;  %vm3015_vm10 = vcmask 9216   ;;  %vm3203_vm11 = vcmask 408576   ;;  %s13694_s7 = sld [smem:[#allocation23_spill]] }
  0x4b   :  { %10846 = vmatpush3.bf16.msra.mxu1 %v10843_v17  ;;  %v10863_v33 = vpack.c.bf16 %v8771_v32, %v8770_v31  ;;  %v8763_v36 = vld [vmem:[%s12085_s9 + $0x28] sm:$0xff]  ;;  %v8764_v37 = vld [vmem:[%s12085_s9 + $0x30] sm:$0xff]  ;;  %v10867_v38 = vpack.c.bf16 %v8773_v35, %v8772_v34  ;;  %v8765_v39 = vld [vmem:[%s12085_s9 + $0x38] sm:$0xff]  ;;  %s13682_s9 = sld [smem:[#allocation10_spill]]  ;;  %s13695_s10 = sld [smem:[#allocation25_spill]]  ;;  %vm6581_vm12 = vcmask 277504  }
  0x4c   :  { %10834 = vmatpush3.bf16.msra.mxu0 %v10831_v12  ;;  %10848 = vmatprep.subr.bf16.mxu1 %v10823_v3  ;;  %v8786_v40 = vld [vmem:[%s12090_s13 + $0x40] sm:$0xff]  ;;  %v8787_v41 = vld [vmem:[%s12090_s13 + $0x48] sm:$0xff]  ;;  %v8788_v47 = vld [vmem:[%s12090_s13 + $0x50] sm:$0xff]  ;;  %s13696_s11 = sld [smem:[#allocation24_spill]]  ;;  %s13697_s15 = sld [smem:[#allocation27_spill]] }
  0x4d   :  { %10836 = vmatprep.subr.bf16.mxu0 %v10835_v18  ;;  %v10887_v42 = vpack.c.bf16 %v8787_v41, %v8786_v40  ;;  %v8789_v48 = vld [vmem:[%s12090_s13 + $0x58] sm:$0xff]  ;;  %v797_v54 = vld [vmem:[%s12100_s21] sm:$0xff]  ;;  %v8799_v55 = vld [vmem:[%s12100_s21 + $0x10] sm:$0xff]  ;;  %s13683_s13 = sld [smem:[#allocation13_spill]]  ;;  %s13698_s16 = sld [smem:[#allocation28_spill]] }
  0x4e   :  { %v10891_v51 = vpack.c.bf16 %v8789_v48, %v8788_v47  ;;  %v8761_v56 = vld [vmem:[%s12095_s17] ss:$0 sm:$0xff]  ;;  %v881_v6 = vld [vmem:[%s12105_s25 + $0x8] sm:$0xff]  ;;  %v882_v10 = vld [vmem:[%s12105_s25 + $0x10] sm:$0xff]  ;;  %s13684_s17 = sld [smem:[#allocation12_spill]]  ;;  %s13699_s18 = sld [smem:[#allocation26_spill]] }
  0x4f   :  { %v883_v11 = vld [vmem:[%s12105_s25 + $0x18] sm:$0xff]  ;;  %v8813_v14 = vld [vmem:[%s12100_s21 + $0x20] sm:$0xff]  ;;  %v885_v17 = vld [vmem:[%s12105_s25 + $0x28] sm:$0xff]  ;;  %s12067_s22 = smov [#allocation4]  }
  0x50   :  { %10838 = vmatpush3.bf16.msra.mxu0 %v10835_v18  ;;  %v8800_v13 = vld [vmem:[%s12100_s21 + $0x18] sm:$0xff]  ;;  %v10907_v15 = vpack.c.bf16 %v883_v11, %v882_v10  ;;  %v884_v16 = vld [vmem:[%s12105_s25 + $0x20] sm:$0xff]  ;;  %v8808_v34 = vld [vmem:[%s12105_s25 + $0x68] sm:$0xff]  ;;  %s8691_s23 = sshll.u32 %s12067_s22, 4  ;;  %s8692_s23 = int_to_ptr.vmem [resolvable:$true] %s8691_s23 }
  0x51   :  { %10872 = vmatprep.subr.bf16.mxu0 %v10823_v3  ;;  %v8817_v41 = vld [vmem:[%s12105_s25 + $0x80] sm:$0xff]  ;;  %v8822_v48 = vld [vmem:[%s12105_s25 + $0xa8] sm:$0xff]  ;;  %v1414_v10 = vld [vmem:[%s12120_s8 + $0x38] sm:$0xff]  ;;  %s11956_s26 = scalar_lea.vmem %s8692_s23, 32  ;;  %p11961_p1 = scmp.lt.s32.totalorder %s8692_s23, %s8692_s23 }
  0x52   :  { %v8821_v47 = vld [vmem:[%s12105_s25 + $0xa0] sm:$0xff]  ;;  %p11957_p0 = scmp.ne.s32.totalorder %s8692_s23, %s11956_s26  ;;  %p11962_p2 = scmp.lt.s32.totalorder %s11956_s26, %s11956_s26 }
  0x53   :  { %9990 = vmatmul.mubr.msk.f32.vlgmr.msra.gmra.mrb[0].mxu0 %vm166_vm0, %v163_v19  ;;  %v886_v19 = vld [vmem:[%s12105_s25 + $0x30] sm:$0xff] }
  0x54   :  { %9992 = vmatprep.mubr.msk.f32.mxu0 %vm166_vm0, %v164_v20  ;;  %10874 = vmatpush3.bf16.msra.mxu0 %v10823_v3  ;;  %v887_v20 = vld [vmem:[%s12105_s25 + $0x38] sm:$0xff]  ;;  %p11963_p3 = por %p11962_p2, %p11961_p1 }
  0x55   :  { %10876 = vmatprep.subr.bf16.mxu0 %v12271_v5 }
  0x56   :  { %p11964_p4 = pnand %p11963_p3, %p11957_p0 }
  0x57   :  { %9993 = vmatmul.mubr.msk.f32.gmra.mrb[2].mxu0 %vm166_vm0, %v165_v21  ;;  %v8814_v21 = vld [vmem:[%s12100_s21 + $0x28] sm:$0xff] }
  0x58   :  { %10878 = vmatpush3.bf16.msra.mxu0 %v12271_v5  ;;  %10061 = vmatprep.mubr.msk.f32.mxu0 %vm166_vm0, %v8778_v22  ;;  %v10915_v22 = vpack.c.bf16 %v887_v20, %v886_v19  ;;  %v8834_v19 = vld [vmem:[%s12120_s8 + $0x50] sm:$0xff]  ;;  %v8835_v20 = vld [vmem:[%s12120_s8 + $0x58] sm:$0xff] }
  0x59   :  { %10880 = vmatprep.subr.bf16.mxu0 %v10831_v12 }
  0x5c   :  { %10882 = vmatpush3.bf16.msra.mxu0 %v10831_v12 }
  0x5d   :  { %10884 = vmatprep.subr.bf16.mxu0 %v10835_v18 }
  0x60   :  { %10886 = vmatpush3.bf16.msra.mxu0 %v10835_v18 }
  0x63   :  { %10062 = vmatmul.mubr.msk.f32.vlgmr.msra.gmra.mrb[4].mxu0 %vm166_vm0, %v8779_v23  ;;  %v8803_v23 = vld [vmem:[%s12105_s25 + $0x40] sm:$0xff] }
  0x64   :  { %10064 = vmatprep.mubr.msk.f32.mxu0 %vm166_vm0, %v8780_v24  ;;  %v8804_v24 = vld [vmem:[%s12105_s25 + $0x48] sm:$0xff] }
  0x67   :  { %10065 = vmatmul.mubr.msk.f32.gmra.mrb[6].mxu0 %vm166_vm0, %v8781_v25  ;;  %v10927_v25 = vpack.c.bf16 %v8804_v24, %v8803_v23  ;;  %v8837_v23 = vld [vmem:[%s12120_s8 + $0x68] sm:$0xff] }
  0x68   :  { %10089 = vmatprep.mubr.msk.f32.mxu0 %vm268_vm1, %v797_v54  ;;  %v12065_v54 = vmov 0.0  }
 0x126   :  { %v9991_v26 = vpop.f32.mrb[0].mxu0 }
 0x127   :  { %v245_v27 = vpop.f32.mrb[1].mxu0 }
 0x128   :  { %10003 = vmatprep.mubr.msk.f32.mxu1 %vm268_vm1, %v245_v27  ;;  %v8806_v27 = vld [vmem:[%s12105_s25 + $0x58] sm:$0xff] }
 0x129   :  { %10004 = vmatmul.mubr.msk.f32.vlgmr.msra.gmra.mrb[0].mxu1 %vm268_vm1, %v9991_v26  ;;  %v8805_v26 = vld [vmem:[%s12105_s25 + $0x50] sm:$0xff] }
 0x12a   :  { %10850 = vmatpush3.bf16.msra.mxu1 %v10823_v3  ;;  %v9994_v28 = vpop.f32.mrb[2].mxu0  ;;  %v10931_v31 = vpack.c.bf16 %v8806_v27, %v8805_v26  ;;  %v8839_v26 = vld [vmem:[%s12120_s8 + $0x78] sm:$0xff] }
 0x12b   :  { %10852 = vmatprep.subr.bf16.mxu1 %v12271_v5  ;;  %v255_v29 = vpop.f32.mrb[3].mxu0 }
 0x12c   :  { %10006 = vmatprep.mubr.msk.f32.mxu1 %vm268_vm1, %v255_v29 }
 0x12d   :  { %10007 = vmatmul.mubr.msk.f32.gmra.mrb[2].mxu1 %vm268_vm1, %v9994_v28 }
 0x12e   :  { %10854 = vmatpush3.bf16.msra.mxu1 %v12271_v5  ;;  %10025 = vmatprep.mubr.msk.f32.mxu1 %vm166_vm0, %v8762_v30  ;;  %v880_v5 = vld [vmem:[%s12105_s25] sm:$0xff] }
 0x12f   :  { %10856 = vmatprep.subr.bf16.mxu1 %v10831_v12  ;;  %v10903_v9 = vpack.c.bf16 %v881_v6, %v880_v5  ;;  %v1411_v6 = vld [vmem:[%s12120_s8 + $0x20] sm:$0xff] }
 0x132   :  { %10858 = vmatpush3.bf16.msra.mxu1 %v10831_v12  ;;  %v798_v12 = vld [vmem:[%s12100_s21 + $0x8] sm:$0xff]  ;;  %s13685_s21 = sld [smem:[#allocation15_spill]] }
 0x133   :  { %10860 = vmatprep.subr.bf16.mxu1 %v10835_v18 }
 0x136   :  { %10862 = vmatpush3.bf16.msra.mxu1 %v10835_v18  ;;  %v10063_v43 = vpop.f32.mrb[4].mxu0  ;;  %v10911_v18 = vpack.c.bf16 %v885_v17, %v884_v16  ;;  %v8830_v17 = vld [vmem:[%s12115_s3 + $0x8] sm:$0xff] }
 0x137   :  { %10864 = vmatprep.subr.bf16.mxu1 %v10863_v33  ;;  %v667_v44 = vpop.f32.mrb[5].mxu0 }
 0x139   :  { %10026 = vmatmul.mubr.msk.f32.vlgmr.msra.gmra.mrb[4].mxu1 %vm166_vm0, %v8763_v36  ;;  %v8809_v36 = vld [vmem:[%s12105_s25 + $0x70] sm:$0xff] }
 0x13a   :  { %10028 = vmatprep.mubr.msk.f32.mxu1 %vm166_vm0, %v8764_v37  ;;  %10866 = vmatpush3.bf16.msra.mxu1 %v10863_v33  ;;  %v10066_v45 = vpop.f32.mrb[6].mxu0  ;;  %v8807_v33 = vld [vmem:[%s12105_s25 + $0x60] sm:$0xff]  ;;  %v8810_v37 = vld [vmem:[%s12105_s25 + $0x78] sm:$0xff] }
 0x13b   :  { %10868 = vmatprep.subr.bf16.mxu1 %v10867_v38  ;;  %v677_v46 = vpop.f32.mrb[7].mxu0  ;;  %v10935_v35 = vpack.c.bf16 %v8808_v34, %v8807_v33  ;;  %v8845_v33 = vld [vmem:[%s12120_s8 + $0x90] sm:$0xff]  ;;  %v8846_v34 = vld [vmem:[%s12120_s8 + $0x98] sm:$0xff] }
 0x13d   :  { %10029 = vmatmul.mubr.msk.f32.gmra.mrb[6].mxu1 %vm166_vm0, %v8765_v39  ;;  %v10939_v39 = vpack.c.bf16 %v8810_v37, %v8809_v36  ;;  %v11004_v37 = vpack.c.bf16 %v8846_v34, %v8845_v33  ;;  %v8873_v33 = vld [vmem:[%s12135_s24 + $0xa8] sm:$0xff] }
 0x13e   :  { %10870 = vmatpush3.bf16.msra.mxu1 %v10867_v38 }
 0x13f   :  { %10888 = vmatprep.subr.bf16.mxu1 %v10887_v42 }
 0x20c   :  { %v10027_v49 = vpop.f32.mrb[4].mxu1 }
 0x20d   :  { %v459_v50 = vpop.f32.mrb[5].mxu1 }
 0x20e   :  { %10039 = vmatprep.mubr.msk.f32.mxu1 %vm268_vm1, %v459_v50  ;;  %v8823_v50 = vld [vmem:[%s12105_s25 + $0xb0] sm:$0xff] }
 0x20f   :  { %10040 = vmatmul.mubr.msk.f32.vlgmr.msra.gmra.mrb[0].mxu1 %vm268_vm1, %v10027_v49  ;;  %v10959_v49 = vpack.c.bf16 %v8822_v48, %v8821_v47  ;;  %v1888_v48 = vld [vmem:[%s12135_s24] sm:$0xff] }
 0x210   :  { %v10030_v52 = vpop.f32.mrb[6].mxu1  ;;  %10890 = vmatpush3.bf16.msra.mxu1 %v10887_v42  ;;  %v8818_v42 = vld [vmem:[%s12105_s25 + $0x88] sm:$0xff] }
 0x211   :  { %v469_v53 = vpop.f32.mrb[7].mxu1  ;;  %10892 = vmatprep.subr.bf16.mxu1 %v10891_v51 }
 0x212   :  { %10042 = vmatprep.mubr.msk.f32.mxu1 %vm268_vm1, %v469_v53  ;;  %v12063_v53 = vmov 0.0|0.0  }
 0x213   :  { %10043 = vmatmul.mubr.msk.f32.gmra.mrb[2].mxu1 %vm268_vm1, %v10030_v52 }
 0x214   :  { %10894 = vmatpush3.bf16.msra.mxu1 %v10891_v51  ;;  %10075 = vmatprep.mubr.msk.f32.mxu1 %vm268_vm1, %v667_v44  ;;  %v8819_v44 = vld [vmem:[%s12105_s25 + $0x90] sm:$0xff]  ;;  %v8824_v51 = vld [vmem:[%s12105_s25 + $0xb8] sm:$0xff] }
 0x215   :  { %v10963_v52 = vpack.c.bf16 %v8824_v51, %v8823_v50  ;;  %v1813_v51 = vld [vmem:[%s12130_s19] sm:$0xf] }
 0x217   :  { %10076 = vmatmul.mubr.msk.f32.vlgmr.msra.gmra.mrb[0].mxu1 %vm268_vm1, %v10063_v43  ;;  %v10951_v43 = vpack.c.bf16 %v8818_v42, %v8817_v41  ;;  %v8849_v41 = vld [vmem:[%s12120_s8 + $0xb0] sm:$0xff]  ;;  %v8850_v42 = vld [vmem:[%s12120_s8 + $0xb8] sm:$0xff] }
 0x218   :  { %10078 = vmatprep.mubr.msk.f32.mxu1 %vm268_vm1, %v677_v46 }
 0x21b   :  { %10079 = vmatmul.mubr.msk.f32.gmra.mrb[2].mxu1 %vm268_vm1, %v10066_v45  ;;  %v8820_v45 = vld [vmem:[%s12105_s25 + $0x98] sm:$0xff]  ;;  %s13686_s25 = sld [smem:[#allocation14_spill]] }
 0x21c   :  { %10119 = vmatprep.mubr.msk.f32.mxu1 %vm268_vm1, %v8799_v55  ;;  %v10955_v46 = vpack.c.bf16 %v8820_v45, %v8819_v44  ;;  %v8798_v55 = vld [vmem:[%s12110_s29] ss:$0 sm:$0xff]  ;;  %s13687_s29 = sld [smem:[#allocation16_spill]] }
 0x21d   :  { %v8829_v44 = vld [vmem:[%s12125_s14] ss:$0 sm:$0xff]  ;;  %s13689_s14 = sld [smem:[#allocation17_spill]] }
 0x2ea   :  { %v10077_v57 = vpop.f32.mrb[0].mxu1 }
 0x2eb   :  { %v11711_v58 = vadd.f32 %v10077_v57, %v8761_v56  ;;  %v769_v59 = vpop.f32.mrb[1].mxu1 }
 0x2ec   :  { %v11712_v60 = vadd.f32 %v8761_v56, %v769_v59 }
 0x2ed   :  { %v793_v61 = vmax.f32 %v11711_v58, 0.0 }
 0x2ee   :  { %v792_v62 = vmax.f32 %v11712_v60, 0.0  ;;  %v10080_v63 = vpop.f32.mrb[2].mxu1 }
 0x2ef   :  { %v11713_v0 = vadd.f32 %v10080_v63, %v8761_v56  ;;  %v779_v1 = vpop.f32.mrb[3].mxu1  ;;  %v1408_v63 = vld [vmem:[%s12120_s8 + $0x8] sm:$0xff] }
 0x2f0   :  { %v10895_v2 = vpack.c.bf16 %v793_v61, %v792_v62  ;;  %v11714_v3 = vadd.f32 %v8761_v56, %v779_v1  ;;  %v1407_v62 = vld [vmem:[%s12120_s8] sm:$0xff] }
 0x2f1   :  { %v795_v4 = vmax.f32 %v11713_v0, 0.0  ;;  %v1332_v1 = vld [vmem:[%s12115_s3] sm:$0xff] }
 0x2f2   :  { %v794_v7 = vmax.f32 %v11714_v3, 0.0  ;;  %10896 = vmatprep.subr.bf16.mxu0 %v10895_v2  ;;  %10920 = vmatprep.subr.bf16.mxu1 %v10895_v2  ;;  %v1409_v3 = vld [vmem:[%s12120_s8 + $0x10] sm:$0xff] }
 0x2f3   :  { %10898 = vmatpush3.bf16.msra.mxu0 %v10895_v2  ;;  %10922 = vmatpush3.bf16.msra.mxu1 %v10895_v2 }
 0x2f4   :  { %v10899_v8 = vpack.c.bf16 %v795_v4, %v794_v7  ;;  %v1410_v4 = vld [vmem:[%s12120_s8 + $0x18] sm:$0xff]  ;;  %v1412_v7 = vld [vmem:[%s12120_s8 + $0x28] sm:$0xff] }
 0x2f5   :  { %v10974_v5 = vpack.c.bf16 %v1410_v4, %v1409_v3  ;;  %v8857_v3 = vld [vmem:[%s12135_s24 + $0x40] sm:$0xff]  ;;  %v8858_v4 = vld [vmem:[%s12135_s24 + $0x48] sm:$0xff] }
 0x2f6   :  { %10900 = vmatprep.subr.bf16.mxu0 %v10899_v8  ;;  %10924 = vmatprep.subr.bf16.mxu1 %v10899_v8 }
 0x2f7   :  { %10902 = vmatpush3.bf16.msra.mxu0 %v10899_v8  ;;  %10926 = vmatpush3.bf16.msra.mxu1 %v10899_v8 }
 0x2f8   :  { %10944 = vmatprep.subr.bf16.mxu1 %v10895_v2  ;;  %10904 = vmatprep.subr.bf16.mxu0 %v10903_v9 }
 0x2fa   :  { %10090 = vmatmul.mubr.msk.f32.vlgmr.msra.gmra.mrb[8].mxu0 %vm268_vm1, %v798_v12  ;;  %10120 = vmatmul.mubr.msk.f32.vlgmr.msra.gmra.mrb[8].mxu1 %vm268_vm1, %v8800_v13  ;;  %v8841_v12 = vld [vmem:[%s12115_s3 + $0x10] sm:$0xff]  ;;  %v8832_v13 = vld [vmem:[%s12120_s8 + $0x40] sm:$0xff]  ;;  %s12066_s3 = smov 126  }
 0x2fb   :  { %10946 = vmatpush3.bf16.msra.mxu1 %v10895_v2  ;;  %10149 = vmatprep.mubr.msk.f32.mxu1 %vm268_vm1, %v8813_v14  ;;  %v10971_v2 = vpack.c.bf16 %v1408_v63, %v1407_v62  ;;  %v8833_v14 = vld [vmem:[%s12120_s8 + $0x48] sm:$0xff]  ;;  %v1894_v63 = vld [vmem:[%s12135_s24 + $0x30] sm:$0xff] }
 0x2fc   :  { %10948 = vmatprep.subr.bf16.mxu1 %v10899_v8  ;;  %10906 = vmatpush3.bf16.msra.mxu0 %v10903_v9  ;;  %v1413_v9 = vld [vmem:[%s12120_s8 + $0x30] sm:$0xff] }
 0x2fd   :  { %10908 = vmatprep.subr.bf16.mxu0 %v10907_v15  ;;  %v10980_v11 = vpack.c.bf16 %v1414_v10, %v1413_v9  ;;  %v8859_v9 = vld [vmem:[%s12135_s24 + $0x50] sm:$0xff]  ;;  %v8860_v10 = vld [vmem:[%s12135_s24 + $0x58] sm:$0xff] }
 0x2ff   :  { %10950 = vmatpush3.bf16.msra.mxu1 %v10899_v8  ;;  %v10977_v8 = vpack.c.bf16 %v1412_v7, %v1411_v6  ;;  %v8855_v7 = vld [vmem:[%s12130_s19 + $0x4] sm:$0xf] }
 0x300   :  { %10910 = vmatpush3.bf16.msra.mxu0 %v10907_v15  ;;  %10967 = vmatprep.subr.bf16.mxu1 %v12063_v53 }
 0x301   :  { %10912 = vmatprep.subr.bf16.mxu0 %v10911_v18 }
 0x302   :  { %10150 = vmatmul.mubr.msk.f32.vlgmr.msra.gmra.mrb[10].mxu1 %vm268_vm1, %v8814_v21  ;;  %v10989_v21 = vpack.c.bf16 %v8835_v20, %v8834_v19 }
 0x303   :  { %10175 = vmatprep.mubr.msk.f32.mxu1 %vm12064_vm2, %v12065_v54 }
 0x304   :  { %10914 = vmatpush3.bf16.msra.mxu0 %v10911_v18  ;;  %v10986_v18 = vpack.c.bf16 %v8833_v14, %v8832_v13  ;;  %v8862_v13 = vld [vmem:[%s12135_s24 + $0x68] sm:$0xff] }
 0x305   :  { %10916 = vmatprep.subr.bf16.mxu0 %v10915_v22 }
 0x308   :  { %10918 = vmatpush3.bf16.msra.mxu0 %v10915_v22  ;;  %v8836_v22 = vld [vmem:[%s12120_s8 + $0x60] sm:$0xff] }
 0x309   :  { %10928 = vmatprep.subr.bf16.mxu0 %v10927_v25  ;;  %v10992_v24 = vpack.c.bf16 %v8837_v23, %v8836_v22 }
 0x3cd   :  { %v10091_v28 = vpop.f32.mrb[8].mxu0  ;;  %v10121_v29 = vpop.f32.mrb[8].mxu1 }
 0x3ce   :  { %v871_v30 = vpop.f32.mrb[9].mxu0  ;;  %v1052_v32 = vpop.f32.mrb[9].mxu1 }
 0x3cf   :  { %10108 = vmatprep.mubr.msk.f32.mxu0 %vm166_vm0, %v871_v30  ;;  %v8843_v30 = vld [vmem:[%s12120_s8 + $0x80] sm:$0xff] }
 0x3d0   :  { %10109 = vmatmul.mubr.msk.f32.vlgmr.msra.gmra.mrb[10].mxu0 %vm166_vm0, %v10091_v28 }
 0x3d1   :  { %10930 = vmatpush3.bf16.msra.mxu0 %v10927_v25  ;;  %10138 = vmatprep.mubr.msk.f32.mxu0 %vm166_vm0, %v1052_v32  ;;  %v8838_v25 = vld [vmem:[%s12120_s8 + $0x70] sm:$0xff] }
 0x3d2   :  { %10932 = vmatprep.subr.bf16.mxu0 %v10931_v31  ;;  %v10995_v27 = vpack.c.bf16 %v8839_v26, %v8838_v25  ;;  %v8869_v25 = vld [vmem:[%s12135_s24 + $0x88] sm:$0xff] }
 0x3d5   :  { %10934 = vmatpush3.bf16.msra.mxu0 %v10931_v31  ;;  %v10151_v38 = vpop.f32.mrb[10].mxu1  ;;  %v8844_v31 = vld [vmem:[%s12120_s8 + $0x88] sm:$0xff] }
 0x3d6   :  { %10936 = vmatprep.subr.bf16.mxu0 %v10935_v35  ;;  %v1228_v40 = vpop.f32.mrb[11].mxu1  ;;  %v11001_v32 = vpack.c.bf16 %v8844_v31, %v8843_v30 }
 0x3d9   :  { %10938 = vmatpush3.bf16.msra.mxu0 %v10935_v35 }
 0x3da   :  { %10940 = vmatprep.subr.bf16.mxu0 %v10939_v39 }
 0x3dd   :  { %10942 = vmatpush3.bf16.msra.mxu0 %v10939_v39  ;;  %v8848_v39 = vld [vmem:[%s12120_s8 + $0xa8] sm:$0xff] }
 0x3de   :  { %10952 = vmatprep.subr.bf16.mxu0 %v10951_v43 }
 0x3e0   :  { %10139 = vmatmul.mubr.msk.f32.vlgmr.msra.gmra.mrb[10].mxu0 %vm166_vm0, %v10121_v29 }
 0x3e1   :  { %10954 = vmatpush3.bf16.msra.mxu0 %v10951_v43  ;;  %10168 = vmatprep.mubr.msk.f32.mxu0 %vm166_vm0, %v1228_v40  ;;  %v11010_v43 = vpack.c.bf16 %v8850_v42, %v8849_v41  ;;  %v8881_v41 = vld [vmem:[%s12135_s24 + $0xd0] sm:$0xff]  ;;  %v8882_v42 = vld [vmem:[%s12135_s24 + $0xd8] sm:$0xff] }
 0x3e2   :  { %10956 = vmatprep.subr.bf16.mxu0 %v10955_v46 }
 0x3e5   :  { %10958 = vmatpush3.bf16.msra.mxu0 %v10955_v46 }
 0x3e6   :  { %10960 = vmatprep.subr.bf16.mxu0 %v10959_v49 }
 0x3e9   :  { %10962 = vmatpush3.bf16.msra.mxu0 %v10959_v49  ;;  %v1889_v49 = vld [vmem:[%s12135_s24 + $0x8] sm:$0xff] }
 0x3ea   :  { %10964 = vmatprep.subr.bf16.mxu0 %v10963_v52 }
 0x3ed   :  { %10966 = vmatpush3.bf16.msra.mxu0 %v10963_v52  ;;  %v8866_v52 = vld [vmem:[%s12130_s19 + $0x8] sm:$0xf] }
 0x3ee   :  { %10997 = vmatprep.subr.bf16.mxu0 %v12063_v53 }
 0x3f0   :  { %10169 = vmatmul.mubr.msk.f32.vlgmr.msra.gmra.mrb[10].mxu0 %vm166_vm0, %v10151_v38  ;;  %v8847_v38 = vld [vmem:[%s12120_s8 + $0xa0] sm:$0xff]  ;;  %s13688_s8 = sld [smem:[#allocation18_spill]] }
 0x3f1   :  { %10227 = vmatprep.mubr.msk.f32.mxu0 %vm12064_vm2, %v12065_v54  ;;  %v11007_v40 = vpack.c.bf16 %v8848_v39, %v8847_v38  ;;  %v8879_v38 = vld [vmem:[%s12135_s24 + $0xc0] sm:$0xff]  ;;  %v8880_v39 = vld [vmem:[%s12135_s24 + $0xc8] sm:$0xff] }
 0x4c3   :  { %v10170_v56 = vpop.f32.mrb[10].mxu0 }
 0x4c4   :  { %v11715_v57 = vadd.f32 %v10170_v56, %v8798_v55  ;;  %v1318_v58 = vpop.f32.mrb[11].mxu0  ;;  %v1890_v56 = vld [vmem:[%s12135_s24 + $0x10] sm:$0xff] }
 0x4c5   :  { %v11716_v59 = vadd.f32 %v8798_v55, %v1318_v58  ;;  %v11013_v55 = vpack.c.bf16 %v1889_v49, %v1888_v48  ;;  %v8877_v58 = vld [vmem:[%s12130_s19 + $0xc] sm:$0xf]  ;;  %v8886_v48 = vld [vmem:[%s12135_s24 + $0xf8] sm:$0xff] }
 0x4c6   :  { %v1330_v60 = vmax.f32 %v11715_v57, 0.0  ;;  %v1891_v57 = vld [vmem:[%s12135_s24 + $0x18] sm:$0xff] }
 0x4c7   :  { %v1329_v61 = vmax.f32 %v11716_v59, 0.0  ;;  %v11016_v59 = vpack.c.bf16 %v1891_v57, %v1890_v56  ;;  %v8893_v56 = vld [vmem:[%s12135_s24 + $0x118] sm:$0xff] }
 0x4c9   :  { %v10968_v0 = vpack.c.bf16 %v1330_v60, %v1329_v61  ;;  %v1892_v60 = vld [vmem:[%s12135_s24 + $0x20] sm:$0xff]  ;;  %v1893_v61 = vld [vmem:[%s12135_s24 + $0x28] sm:$0xff] }
 0x4ca   :  { %v11019_v62 = vpack.c.bf16 %v1893_v61, %v1892_v60  ;;  %v8896_v61 = vld [vmem:[%s12135_s24 + $0x130] sm:$0xff] }
 0x4cb   :  { %10969 = vmatpush3.bf16.msra.mxu1 %v10968_v0  ;;  %10999 = vmatpush3.bf16.msra.mxu0 %v10968_v0 }
 0x4cc   :  { %10970 = vmatprep.subr.bf16.mxu1 %v12063_v53  ;;  %10249 = vmatprep.subr.mxu0 %v12065_v54 }
 0x4ce   :  { %10176 = vmatmul.mubr.msk.f32.vlgmr.msra.gmra.mrb[12].mxu1 %vm1333_vm3, %v1332_v1  ;;  %10228 = vmatmul.mubr.msk.f32.vlgmr.msra.gmra.mrb[12].mxu0 %vm1333_vm3, %v8841_v12  ;;  %v8861_v12 = vld [vmem:[%s12135_s24 + $0x60] sm:$0xff] }
 0x4cf   :  { %10972 = vmatpush3.bf16.msra.mxu1 %v10971_v2  ;;  %10194 = vmatprep.mubr.msk.f32.mxu1 %vm12064_vm2, %v12065_v54  ;;  %v8888_v2 = vld [vmem:[%s12130_s19 + $0x10] sm:$0xf]  ;;  %v11031_v14 = vpack.c.bf16 %v8862_v13, %v8861_v12  ;;  %v8906_v12 = vld [vmem:[%s12150_s12 + $0x20] sm:$0xff]  ;;  %v8907_v13 = vld [vmem:[%s12150_s12 + $0x28] sm:$0xff]  ;;  %s13690_s19 = sld [smem:[#allocation19_spill]] }
 0x4d0   :  { %10973 = vmatprep.subr.bf16.mxu1 %v12063_v53  ;;  %10251 = vmatprep.mubr.msk.f32.mxu0 %vm12064_vm2, %v12065_v54 }
 0x4d3   :  { %10975 = vmatpush3.bf16.msra.mxu1 %v10974_v5 }
 0x4d4   :  { %10976 = vmatprep.subr.bf16.mxu1 %v12063_v53 }
 0x4d7   :  { %10978 = vmatpush3.bf16.msra.mxu1 %v10977_v8  ;;  %v11025_v8 = vpack.c.bf16 %v8858_v4, %v8857_v3  ;;  %v2690_v3 = vld [vmem:[%s12150_s12 + $0x8] sm:$0xff] }
 0x4d8   :  { %10979 = vmatprep.subr.bf16.mxu1 %v12063_v53 }
 0x4db   :  { %10981 = vmatpush3.bf16.msra.mxu1 %v10980_v11  ;;  %v11028_v11 = vpack.c.bf16 %v8860_v10, %v8859_v9  ;;  %v2691_v9 = vld [vmem:[%s12150_s12 + $0x10] sm:$0xff]  ;;  %v2692_v10 = vld [vmem:[%s12150_s12 + $0x18] sm:$0xff] }
 0x4dc   :  { %10982 = vmatprep.subr.bf16.mxu1 %v12063_v53 }
 0x5a1   :  { %v1403_v15 = vpop.f32.mrb[12].mxu1  ;;  %v1724_v28 = vpop.f32.mrb[12].mxu0 }
 0x5a2   :  { %v10177_v16 = vpop.f32.mrb[13].mxu1  ;;  %10195 = vmatmul.mubr.msk.f32.vlgmr.msra.gmra.mrb[14].mxu1 %vm166_vm0, %v1403_v15  ;;  %v10229_v29 = vpop.f32.mrb[13].mxu0  ;;  %v8863_v15 = vld [vmem:[%s12135_s24 + $0x70] sm:$0xff] }
 0x5a3   :  { %10984 = vmatpush3.bf16.msra.mxu1 %v10968_v0  ;;  %10201 = vmatprep.mubr.msk.f32.mxu1 %vm12064_vm2, %v12065_v54  ;;  %v1895_v0 = vld [vmem:[%s12135_s24 + $0x38] sm:$0xff] }
 0x5a4   :  { %10985 = vmatprep.subr.bf16.mxu1 %v12063_v53  ;;  %v11022_v1 = vpack.c.bf16 %v1895_v0, %v1894_v63  ;;  %v8864_v16 = vld [vmem:[%s12135_s24 + $0x78] sm:$0xff]  ;;  %v8854_v0 = vld [vmem:[%s12140_s30] ss:$0 sm:$0xff]  ;;  %s13692_s30 = sld [smem:[#allocation22_spill]] }
 0x5a6   :  { %10202 = vmatmul.mubr.msk.f32.vlgmr.msra.gmra.mrb[16].mxu1 %vm1333_vm3, %v8830_v17  ;;  %v11034_v17 = vpack.c.bf16 %v8864_v16, %v8863_v15  ;;  %v8903_v16 = vld [vmem:[%s13680_s0 + $0x2] sm:$0x3] }
 0x5a7   :  { %10987 = vmatpush3.bf16.msra.mxu1 %v10986_v18  ;;  %10220 = vmatprep.mubr.msk.f32.mxu1 %vm12064_vm2, %v12065_v54 }
 0x5a8   :  { %10988 = vmatprep.subr.bf16.mxu1 %v12063_v53 }
 0x5ab   :  { %10990 = vmatpush3.bf16.msra.mxu1 %v10989_v21 }
 0x5ac   :  { %10991 = vmatprep.subr.bf16.mxu1 %v12063_v53 }
 0x5af   :  { %10993 = vmatpush3.bf16.msra.mxu1 %v10992_v24  ;;  %v8868_v24 = vld [vmem:[%s12135_s24 + $0x80] sm:$0xff] }
 0x5b0   :  { %10994 = vmatprep.subr.bf16.mxu1 %v12063_v53  ;;  %v11037_v26 = vpack.c.bf16 %v8869_v25, %v8868_v24  ;;  %v2929_v24 = vld [vmem:[%s13681_s5 + $0x8] sm:$0xff] }
 0x5b3   :  { %10996 = vmatpush3.bf16.msra.mxu1 %v10995_v27  ;;  %v8870_v27 = vld [vmem:[%s12135_s24 + $0x90] sm:$0xff] }
 0x5b4   :  { %11000 = vmatprep.subr.bf16.mxu1 %v12063_v53 }
 0x679   :  { %v1566_v35 = vpop.f32.mrb[16].mxu1 }
 0x67a   :  { %v10203_v36 = vpop.f32.mrb[17].mxu1  ;;  %10221 = vmatmul.mubr.msk.f32.vlgmr.msra.gmra.mrb[14].mxu1 %vm166_vm0, %v1566_v35  ;;  %v8874_v35 = vld [vmem:[%s12135_s24 + $0xb0] sm:$0xff] }
 0x67b   :  { %11002 = vmatpush3.bf16.msra.mxu1 %v11001_v32  ;;  %10246 = vmatprep.mubr.msk.f32.mxu1 %vm12064_vm2, %v12065_v54  ;;  %v8872_v32 = vld [vmem:[%s12135_s24 + $0xa0] sm:$0xff]  ;;  %v8875_v36 = vld [vmem:[%s12135_s24 + $0xb8] sm:$0xff] }
 0x67c   :  { %11003 = vmatprep.subr.bf16.mxu1 %v12063_v53  ;;  %v11043_v34 = vpack.c.bf16 %v8873_v33, %v8872_v32  ;;  %v3022_v32 = vld [vmem:[%s13683_s13] sm:$0x3] }
 0x67d   :  { %v8911_v33 = vld [vmem:[%s13684_s17] ss:$0 sm:$0xff] }
 0x67f   :  { %11005 = vmatpush3.bf16.msra.mxu1 %v11004_v37  ;;  %v11046_v37 = vpack.c.bf16 %v8875_v36, %v8874_v35 }
 0x680   :  { %11006 = vmatprep.subr.bf16.mxu1 %v12063_v53 }
 0x683   :  { %11008 = vmatpush3.bf16.msra.mxu1 %v11007_v40  ;;  %v11049_v40 = vpack.c.bf16 %v8880_v39, %v8879_v38  ;;  %v8938_v38 = vld [vmem:[%s13685_s21 + $0x20] sm:$0xff] }
 0x684   :  { %11009 = vmatprep.subr.bf16.mxu1 %v12063_v53 }
 0x687   :  { %11011 = vmatpush3.bf16.msra.mxu1 %v11010_v43  ;;  %v11052_v43 = vpack.c.bf16 %v8882_v42, %v8881_v41  ;;  %v3196_v42 = vld [vmem:[%s13687_s29] sm:$0xff] }
 0x688   :  { %10297 = vmatprep.subr.mxu1 %v12065_v54 }
 0x68a   :  { %10247 = vmatmul.mubr.msk.f32.vlgmr.msra.gmra.mrb[14].mxu1 %vm166_vm0, %v1724_v28  ;;  %v8871_v28 = vld [vmem:[%s12135_s24 + $0x98] sm:$0xff] }
 0x68b   :  { %10299 = vmatprep.mubr.msk.f32.mxu1 %vm12064_vm2, %v12065_v54  ;;  %v11040_v31 = vpack.c.bf16 %v8871_v28, %v8870_v27  ;;  %v8902_v27 = vld [vmem:[%s13682_s9] ss:$0 sm:$0xff] }
 0x75d   :  { %v1806_v45 = vpop.f32.mrb[14].mxu1 }
 0x75e   :  { %v11717_v46 = vadd.f32 %v8829_v44, %v1806_v45  ;;  %v10248_v47 = vpop.f32.mrb[15].mxu1  ;;  %v8883_v44 = vld [vmem:[%s12135_s24 + $0xe0] sm:$0xff]  ;;  %v8884_v45 = vld [vmem:[%s12135_s24 + $0xe8] sm:$0xff] }
 0x75f   :  { %v8885_v47 = vld [vmem:[%s12135_s24 + $0xf0] sm:$0xff] }
 0x760   :  { %v1811_v50 = vmax.f32 %v11717_v46, 0.0  ;;  %v11055_v46 = vpack.c.bf16 %v8884_v45, %v8883_v44  ;;  %v11058_v49 = vpack.c.bf16 %v8886_v48, %v8885_v47  ;;  %v3111_v48 = vld [vmem:[%s13685_s21 + $0x8] sm:$0xff] }
 0x762   :  { %10250 = vmatpush3.msra.mxu0 %v1811_v50  ;;  %10298 = vmatpush3.msra.mxu1 %v1811_v50 }
 0x763   :  { %10252 = vmatmul.mubr.msk.f32.vlgmr.msra.gmra.mrb[14].mxu0 %vm1814_vm4, %v1813_v51  ;;  %10300 = vmatmul.mubr.msk.f32.vlgmr.msra.gmra.mrb[18].mxu1 %vm1814_vm4, %v8866_v52  ;;  %v8891_v51 = vld [vmem:[%s12135_s24 + $0x108] sm:$0xff] }
 0x764   :  { %10321 = vmatprep.subr.mxu1 %v12065_v54  ;;  %10323 = vmatprep.mubr.msk.f32.mxu1 %vm12064_vm2, %v12065_v54 }
 0x765   :  { %10322 = vmatpush3.msra.mxu1 %v1811_v50  ;;  %11012 = vmatprep.subr.bf16.mxu0 %v12063_v53 }
 0x766   :  { %10345 = vmatprep.subr.mxu1 %v12065_v54  ;;  %11014 = vmatpush3.bf16.msra.mxu0 %v11013_v55  ;;  %v8892_v55 = vld [vmem:[%s12135_s24 + $0x110] sm:$0xff] }
 0x767   :  { %10324 = vmatmul.mubr.msk.f32.vlgmr.msra.gmra.mrb[20].mxu1 %vm1814_vm4, %v8877_v58  ;;  %11015 = vmatprep.subr.bf16.mxu0 %v12063_v53  ;;  %v11064_v57 = vpack.c.bf16 %v8893_v56, %v8892_v55  ;;  %v8894_v58 = vld [vmem:[%s12135_s24 + $0x120] sm:$0xff] }
 0x768   :  { %10346 = vmatpush3.msra.mxu1 %v1811_v50  ;;  %10270 = vmatprep.mubr.msk.f32.mxu0 %vm12064_vm2, %v12065_v54  ;;  %v3200_v56 = vld [vmem:[%s13687_s29 + $0x20] sm:$0xff] }
 0x769   :  { %10347 = vmatprep.mubr.msk.f32.mxu1 %vm12064_vm2, %v12065_v54  ;;  %10369 = vmatprep.subr.mxu1 %v12065_v54 }
 0x76a   :  { %11017 = vmatpush3.bf16.msra.mxu0 %v11016_v59  ;;  %v8895_v59 = vld [vmem:[%s12135_s24 + $0x128] sm:$0xff] }
 0x76b   :  { %11018 = vmatprep.subr.bf16.mxu0 %v12063_v53  ;;  %10348 = vmatmul.mubr.msk.f32.vlgmr.msra.gmra.mrb[22].mxu1 %vm1814_vm4, %v8888_v2  ;;  %v11067_v60 = vpack.c.bf16 %v8895_v59, %v8894_v58  ;;  %v2689_v2 = vld [vmem:[%s12150_s12] sm:$0xff]  ;;  %v8954_v58 = vld [vmem:[%s13685_s21 + $0x38] sm:$0xff] }
 0x76c   :  { %10371 = vmatprep.mubr.msk.f32.mxu1 %vm12064_vm2, %v12065_v54  ;;  %v8968_v59 = vld [vmem:[%s13685_s21 + $0x40] sm:$0xff] }
 0x76e   :  { %11020 = vmatpush3.bf16.msra.mxu0 %v11019_v62  ;;  %v8897_v62 = vld [vmem:[%s12135_s24 + $0x138] sm:$0xff] }
 0x76f   :  { %11021 = vmatprep.subr.bf16.mxu0 %v12063_v53  ;;  %v11070_v63 = vpack.c.bf16 %v8897_v62, %v8896_v61  ;;  %v8969_v61 = vld [vmem:[%s13685_s21 + $0x48] sm:$0xff]  ;;  %v8983_v62 = vld [vmem:[%s13685_s21 + $0x50] sm:$0xff] }
 0x772   :  { %11023 = vmatpush3.bf16.msra.mxu0 %v11022_v1 }
 0x773   :  { %10273 = vmatprep.subr.mxu0 %v12065_v54 }
 0x836   :  { %v1884_v5 = vpop.f32.mrb[14].mxu0  ;;  %v2205_v18 = vpop.f32.mrb[18].mxu1 }
 0x837   :  { %v10253_v6 = vpop.f32.mrb[15].mxu0  ;;  %10271 = vmatmul.mubr.msk.f32.vlgmr.msra.gmra.mrb[16].mxu0 %vm166_vm0, %v1884_v5  ;;  %v10301_v19 = vpop.f32.mrb[19].mxu1 }
 0x838   :  { %10274 = vmatpush3.msra.mxu0 %v1811_v50  ;;  %10275 = vmatprep.mubr.msk.f32.mxu0 %vm12064_vm2, %v12065_v54  ;;  %v8890_v50 = vld [vmem:[%s12135_s24 + $0x100] sm:$0xff]  ;;  %v8909_v19 = vld [vmem:[%s12150_s12 + $0x38] sm:$0xff]  ;;  %s13691_s24 = sld [smem:[#allocation20_spill]] }
 0x839   :  { %11024 = vmatprep.subr.bf16.mxu0 %v12063_v53  ;;  %v11061_v52 = vpack.c.bf16 %v8891_v51, %v8890_v50  ;;  %v3199_v50 = vld [vmem:[%s13687_s29 + $0x18] sm:$0xff]  ;;  %v8939_v51 = vld [vmem:[%s13685_s21 + $0x28] sm:$0xff] }
 0x83a   :  { %v2363_v20 = vpop.f32.mrb[20].mxu1 }
 0x83b   :  { %10276 = vmatmul.mubr.msk.f32.vlgmr.msra.gmra.mrb[18].mxu0 %vm1814_vm4, %v8855_v7  ;;  %v10325_v21 = vpop.f32.mrb[21].mxu1  ;;  %v2610_v7 = vld [vmem:[%s13680_s0] sm:$0x3] }
 0x83c   :  { %11026 = vmatpush3.bf16.msra.mxu0 %v11025_v8  ;;  %10294 = vmatprep.mubr.msk.f32.mxu0 %vm12064_vm2, %v12065_v54  ;;  %v11073_v8 = vpack.c.bf16 %v2690_v3, %v2689_v2  ;;  %v8999_v2 = vld [vmem:[%s13685_s21 + $0x68] sm:$0xff]  ;;  %v9013_v3 = vld [vmem:[%s13685_s21 + $0x70] sm:$0xff] }
 0x83d   :  { %11027 = vmatprep.subr.bf16.mxu0 %v12063_v53 }
 0x83e   :  { %v12494_v22 = vpop.f32.mrb[22].mxu1 }
 0x83f   :  { %v10349_v23 = vpop.f32.mrb[23].mxu1 }
 0x840   :  { %11029 = vmatpush3.bf16.msra.mxu0 %v11028_v11  ;;  %v11076_v11 = vpack.c.bf16 %v2692_v10, %v2691_v9  ;;  %v2928_v23 = vld [vmem:[%s13681_s5] sm:$0xff]  ;;  %v8923_v9 = vld [vmem:[%s13685_s21 + $0x10] sm:$0xff] }
 0x841   :  { %11030 = vmatprep.subr.bf16.mxu0 %v12063_v53  ;;  %v11085_v25 = vpack.c.bf16 %v2929_v24, %v2928_v23 }
 0x844   :  { %11032 = vmatpush3.bf16.msra.mxu0 %v11031_v14 }
 0x845   :  { %11033 = vmatprep.subr.bf16.mxu0 %v12063_v53 }
 0x848   :  { %11035 = vmatpush3.bf16.msra.mxu0 %v11034_v17  ;;  %v11079_v17 = vpack.c.bf16 %v8907_v13, %v8906_v12  ;;  %v8931_v12 = vld [vmem:[%s13687_s29 + $0x50] sm:$0xff]  ;;  %v8924_v13 = vld [vmem:[%s13685_s21 + $0x18] sm:$0xff] }
 0x849   :  { %11036 = vmatprep.subr.bf16.mxu0 %v12063_v53 }
 0x90e   :  { %v2047_v29 = vpop.f32.mrb[18].mxu0 }
 0x90f   :  { %v10277_v30 = vpop.f32.mrb[19].mxu0  ;;  %10295 = vmatmul.mubr.msk.f32.vlgmr.msra.gmra.mrb[16].mxu0 %vm166_vm0, %v2047_v29 }
 0x910   :  { %11038 = vmatpush3.bf16.msra.mxu0 %v11037_v26  ;;  %10318 = vmatprep.mubr.msk.f32.mxu0 %vm12064_vm2, %v12065_v54  ;;  %v2930_v26 = vld [vmem:[%s13681_s5 + $0x10] sm:$0xf] }
 0x911   :  { %11039 = vmatprep.subr.bf16.mxu0 %v12063_v53 }
 0x914   :  { %11041 = vmatpush3.bf16.msra.mxu0 %v11040_v31 }
 0x915   :  { %11042 = vmatprep.subr.bf16.mxu0 %v12063_v53 }
 0x918   :  { %11044 = vmatpush3.bf16.msra.mxu0 %v11043_v34 }
 0x919   :  { %11045 = vmatprep.subr.bf16.mxu0 %v12063_v53 }
 0x91c   :  { %11047 = vmatpush3.bf16.msra.mxu0 %v11046_v37  ;;  %v3110_v37 = vld [vmem:[%s13685_s21] sm:$0xff] }
 0x91d   :  { %11048 = vmatprep.subr.bf16.mxu0 %v12063_v53 }
 0x91f   :  { %10319 = vmatmul.mubr.msk.f32.vlgmr.msra.gmra.mrb[16].mxu0 %vm166_vm0, %v2205_v18  ;;  %v8908_v18 = vld [vmem:[%s12150_s12 + $0x30] sm:$0xff]  ;;  %s13693_s12 = sld [smem:[#allocation21_spill]] }
 0x920   :  { %11050 = vmatpush3.bf16.msra.mxu0 %v11049_v40  ;;  %10342 = vmatprep.mubr.msk.f32.mxu0 %vm12064_vm2, %v12065_v54  ;;  %v8914_v40 = vld [vmem:[%s13686_s25] ss:$0 sm:$0xff] }
 0x921   :  { %11051 = vmatprep.subr.bf16.mxu0 %v12063_v53 }
 0x924   :  { %11053 = vmatpush3.bf16.msra.mxu0 %v11052_v43  ;;  %v3197_v43 = vld [vmem:[%s13687_s29 + $0x8] sm:$0xff] }
 0x925   :  { %11054 = vmatprep.subr.bf16.mxu0 %v12063_v53  ;;  %v11087_v47 = vpack.c.bf16 %v3197_v43, %v3196_v42  ;;  %v8949_v42 = vld [vmem:[%s13687_s29 + $0xa0] sm:$0x3]  ;;  %v8958_v43 = vld [vmem:[%s13687_s29 + $0xa8] sm:$0xff] }
 0x928   :  { %11056 = vmatpush3.bf16.msra.mxu0 %v11055_v46 }
 0x929   :  { %11057 = vmatprep.subr.bf16.mxu0 %v12063_v53 }
 0x92c   :  { %11059 = vmatpush3.bf16.msra.mxu0 %v11058_v49  ;;  %v3198_v49 = vld [vmem:[%s13687_s29 + $0x10] sm:$0xff] }
 0x92d   :  { %11060 = vmatprep.subr.bf16.mxu0 %v12063_v53  ;;  %v11091_v55 = vpack.c.bf16 %v3199_v50, %v3198_v49  ;;  %v8962_v49 = vld [vmem:[%s13687_s29 + $0xc8] sm:$0xff]  ;;  %v8963_v50 = vld [vmem:[%s13687_s29 + $0xd0] sm:$0xff] }
 0x92f   :  { %10343 = vmatmul.mubr.msk.f32.vlgmr.msra.gmra.mrb[16].mxu0 %vm166_vm0, %v2363_v20  ;;  %v11082_v20 = vpack.c.bf16 %v8909_v19, %v8908_v18  ;;  %v8934_v18 = vld [vmem:[%s13687_s29 + $0x68] sm:$0x3]  ;;  %v8943_v19 = vld [vmem:[%s13687_s29 + $0x70] sm:$0xff] }
 0x930   :  { %11062 = vmatpush3.bf16.msra.mxu0 %v11061_v52  ;;  %10366 = vmatprep.mubr.msk.f32.mxu0 %vm12064_vm2, %v12065_v54  ;;  %v8953_v52 = vld [vmem:[%s13685_s21 + $0x30] sm:$0xff] }
 0x931   :  { %11063 = vmatprep.subr.bf16.mxu0 %v12063_v53 }
 0x934   :  { %11065 = vmatpush3.bf16.msra.mxu0 %v11064_v57  ;;  %v3201_v57 = vld [vmem:[%s13687_s29 + $0x28] sm:$0xff] }
 0x935   :  { %11066 = vmatprep.subr.bf16.mxu0 %v12063_v53 }
 0x938   :  { %11068 = vmatpush3.bf16.msra.mxu0 %v11067_v60  ;;  %v11095_v60 = vpack.c.bf16 %v3201_v57, %v3200_v56  ;;  %v8974_v56 = vld [vmem:[%s13687_s29 + $0xe8] sm:$0xff]  ;;  %v8975_v57 = vld [vmem:[%s13687_s29 + $0xf0] sm:$0xff] }
 0x939   :  { %11069 = vmatprep.subr.bf16.mxu0 %v12063_v53 }
 0x93c   :  { %11071 = vmatpush3.bf16.msra.mxu0 %v11070_v63  ;;  %v3202_v63 = vld [vmem:[%s13687_s29 + $0x30] sm:$0x3] }
 0x93f   :  { %10367 = vmatmul.mubr.msk.f32.vlgmr.msra.gmra.mrb[16].mxu0 %vm166_vm0, %v12494_v22 }
 0x940   :  { %10461 = vmatprep.mubr.msk.f32.mxu0 %vm3030_vm9, %v8938_v38 }
 0xa12   :  { %v2603_v1 = vpop.f32.mrb[16].mxu0 }
 0xa13   :  { %v11718_v4 = vadd.f32 %v8854_v0, %v2603_v1  ;;  %v10368_v5 = vpop.f32.mrb[17].mxu0  ;;  %v8984_v0 = vld [vmem:[%s13685_s21 + $0x58] sm:$0xff]  ;;  %v8998_v1 = vld [vmem:[%s13685_s21 + $0x60] sm:$0xff] }
 0xa14   :  { %v8928_v5 = vld [vmem:[%s13687_s29 + $0x38] sm:$0xff] }
 0xa15   :  { %v2608_v6 = vmax.f32 %v11718_v4, 0.0  ;;  %v9014_v4 = vld [vmem:[%s13685_s21 + $0x78] sm:$0xff] }
 0xa17   :  { %10370 = vmatpush3.msk.msra.mxu1 %vm2615_vm5, %v2608_v6 }
 0xa18   :  { %10372 = vmatmul.mubr.msk.f32.vlgmr.msra.gmra.mrb[24].mxu1 %vm2611_vm6, %v2610_v7  ;;  %11072 = vmatprep.subr.bf16.mxu1 %v12063_v53 }
 0xa19   :  { %11074 = vmatpush3.bf16.msra.mxu1 %v11073_v8  ;;  %10382 = vmatprep.mubr.msk.f32.mxu1 %vm12064_vm2, %v12065_v54 }
 0xa1a   :  { %11075 = vmatprep.subr.bf16.mxu1 %v12063_v53 }
 0xa1d   :  { %11077 = vmatpush3.bf16.msra.mxu1 %v11076_v11  ;;  %v8930_v11 = vld [vmem:[%s13687_s29 + $0x48] sm:$0xff] }
 0xa1e   :  { %10385 = vmatprep.subr.mxu1 %v12065_v54 }
 0xaeb   :  { %v2685_v14 = vpop.f32.mrb[24].mxu1 }
 0xaec   :  { %v10373_v15 = vpop.f32.mrb[25].mxu1  ;;  %10383 = vmatmul.mubr.msk.f32.vlgmr.msra.gmra.mrb[26].mxu1 %vm268_vm1, %v2685_v14  ;;  %v11103_v14 = vpack.c.bf16 %v8931_v12, %v8930_v11  ;;  %v9003_v11 = vld [vmem:[%s13687_s29 + $0x150] sm:$0xff]  ;;  %v9004_v12 = vld [vmem:[%s13687_s29 + $0x158] sm:$0xff] }
 0xaed   :  { %10386 = vmatpush3.msk.msra.mxu1 %vm2615_vm5, %v2608_v6  ;;  %10387 = vmatprep.mubr.msk.f32.mxu1 %vm12064_vm2, %v12065_v54  ;;  %v8929_v6 = vld [vmem:[%s13687_s29 + $0x40] sm:$0xff]  ;;  %v8932_v15 = vld [vmem:[%s13687_s29 + $0x58] sm:$0xff] }
 0xaee   :  { %11078 = vmatprep.subr.bf16.mxu1 %v12063_v53  ;;  %v11099_v10 = vpack.c.bf16 %v8929_v6, %v8928_v5 }
 0xaf0   :  { %10388 = vmatmul.mubr.msk.f32.vlgmr.msra.gmra.mrb[28].mxu1 %vm2611_vm6, %v8903_v16  ;;  %v8933_v16 = vld [vmem:[%s13687_s29 + $0x60] sm:$0xff] }
 0xaf1   :  { %11080 = vmatpush3.bf16.msra.mxu1 %v11079_v17  ;;  %10398 = vmatprep.mubr.msk.f32.mxu1 %vm12064_vm2, %v12065_v54  ;;  %v11107_v17 = vpack.c.bf16 %v8933_v16, %v8932_v15  ;;  %v11159_v15 = vpack.c.bf16 %v9004_v12, %v9003_v11  ;;  %v9067_v11 = vld [vmem:[%s13688_s8 + $0x78] sm:$0xff] }
 0xaf2   :  { %11081 = vmatprep.subr.bf16.mxu1 %v12063_v53  ;;  %v9073_v12 = vld [vmem:[%s13690_s19 + $0x38] sm:$0xff] }
 0xaf5   :  { %11083 = vmatpush3.bf16.msra.mxu1 %v11082_v20  ;;  %v8944_v20 = vld [vmem:[%s13687_s29 + $0x78] sm:$0xff] }
 0xaf6   :  { %11084 = vmatprep.subr.bf16.mxu1 %v12063_v53 }
 0xbc3   :  { %v2844_v21 = vpop.f32.mrb[28].mxu1 }
 0xbc4   :  { %v10389_v22 = vpop.f32.mrb[29].mxu1  ;;  %10399 = vmatmul.mubr.msk.f32.vlgmr.msra.gmra.mrb[26].mxu1 %vm268_vm1, %v2844_v21  ;;  %v11111_v21 = vpack.c.bf16 %v8944_v20, %v8943_v19  ;;  %v9009_v20 = vld [vmem:[%s13687_s29 + $0x180] sm:$0x3] }
 0xbc5   :  { %10407 = vmatprep.mubr.msk.f32.mxu1 %vm12064_vm2, %v12065_v54  ;;  %11086 = vmatpush3.bf16.msra.mxu1 %v11085_v25 }
 0xbc6   :  { %10405 = vmatprep.subr.mxu1 %v12065_v54 }
 0xbc9   :  { %10406 = vmatpush3.msk.msra.mxu1 %vm2615_vm5, %v2930_v26 }
 0xbca   :  { %10410 = vmatprep.subr.mxu1 %v12065_v54 }
 0xc97   :  { %v2922_v28 = vpop.f32.mrb[26].mxu1 }
 0xc98   :  { %v11719_v29 = vadd.f32 %v8902_v27, %v2922_v28  ;;  %v10400_v30 = vpop.f32.mrb[27].mxu1 }
 0xc9a   :  { %v2927_v31 = vmax.f32 %v11719_v29, 0.0 }
 0xc9c   :  { %10408 = vmatmul.mubr.msk.f32.vlgmr.msra.gmra.mrb[30].mxu1 %vm2938_vm7, %v2927_v31 }
 0xc9d   :  { %10412 = vmatprep.mubr.msk.f32.mxu1 %vm12064_vm2, %v12065_v54  ;;  %10411 = vmatpush3.msk.msra.mxu1 %vm3033_vm8, %v3022_v32 }
 0xd6f   :  { %v3011_v34 = vpop.f32.mrb[30].mxu1 }
 0xd70   :  { %v3012_v35 = vadd.f32 %v8911_v33, %v3011_v34  ;;  %v10409_v36 = vpop.f32.mrb[31].mxu1  ;;  %v8945_v34 = vld [vmem:[%s13687_s29 + $0x80] sm:$0xff] }
 0xd72   :  { %3018 = vrot.lane.b32.xlu0 %v3012_v35, %s12066_s3  ;;  %10413 = vmatmul.mubr.msk.f32.vlgmr.msra.gmra.mrb[32].mxu1 %vm3030_vm9, %v3012_v35  ;;  %3016 = vst.msk [vmem:[#allocation4] sm:$0x3] %vm3015_vm10, %v3012_v35  ;;  %v8946_v35 = vld [vmem:[%s13687_s29 + $0x88] sm:$0xff] }
 0xd73   :  { %10417 = vmatprep.mubr.msk.f32.mxu1 %vm3030_vm9, %v3110_v37  ;;  %v11115_v38 = vpack.c.bf16 %v8946_v35, %v8945_v34  ;;  %v3108_v34 = vld [vmem:[%s13689_s14] sm:$0xff] }
 0xde4   :  { %v3019_v39 = vpop.permute.xlu0 %3018 }
 0xde5   :  { %3021 = vst.msk [vmem:[#allocation6] sm:$0x3] %vm3015_vm10, %v3019_v39  ;;  %v8947_v39 = vld [vmem:[%s13687_s29 + $0x90] sm:$0xff] }
 0xe45   :  { %v3103_v41 = vpop.f32.mrb[32].mxu1 }
 0xe46   :  { %v3104_v44 = vadd.f32 %v8914_v40, %v3103_v41  ;;  %v10414_v45 = vpop.f32.mrb[33].mxu1  ;;  %v8948_v40 = vld [vmem:[%s13687_s29 + $0x98] sm:$0xff] }
 0xe47   :  { %v11119_v41 = vpack.c.bf16 %v8948_v40, %v8947_v39  ;;  %v8960_v45 = vld [vmem:[%s13687_s29 + $0xb8] sm:$0xff] }
 0xe48   :  { %v12593_v46 = vmax.f32 %v3104_v44, 0.0  ;;  %v8959_v44 = vld [vmem:[%s13687_s29 + $0xb0] sm:$0xff] }
 0xe4a   :  { %10415 = vmatprep.subr.msk.mxu1 %vm3033_vm8, %v12593_v46  ;;  %10459 = vmatprep.subr.msk.mxu0 %vm3033_vm8, %v12593_v46 }
 0xe4b   :  { %10416 = vmatpush3.msk.msra.mxu1 %vm3033_vm8, %v12593_v46  ;;  %10460 = vmatpush3.msk.msra.mxu0 %vm3033_vm8, %v12593_v46 }
 0xe4c   :  { %10418 = vmatmul.mubr.msk.f32.vlgmr.msra.gmra.mrb[34].mxu1 %vm3030_vm9, %v3111_v48  ;;  %11088 = vmatprep.subr.bf16.mxu1 %v11087_v47 }
 0xe4d   :  { %10462 = vmatmul.mubr.msk.f32.vlgmr.msra.gmra.mrb[20].mxu0 %vm3030_vm9, %v8939_v51  ;;  %10481 = vmatprep.subr.msk.mxu0 %vm3033_vm8, %v12593_v46  ;;  %v11131_v51 = vpack.c.bf16 %v8963_v50, %v8962_v49 }
 0xe4e   :  { %11090 = vmatpush3.bf16.msra.mxu1 %v11087_v47  ;;  %10482 = vmatpush3.msk.msra.mxu0 %vm3033_vm8, %v12593_v46  ;;  %v11123_v47 = vpack.c.bf16 %v8959_v44, %v8958_v43  ;;  %v4640_v43 = vld [vmem:[%s13690_s19] sm:$0xff]  ;;  %v4541_v44 = vld [vmem:[%s13688_s8 + $0x10] sm:$0xff] }
 0xe4f   :  { %10503 = vmatprep.subr.msk.mxu0 %vm3033_vm8, %v12593_v46  ;;  %10483 = vmatprep.mubr.msk.f32.mxu0 %vm3030_vm9, %v8953_v52  ;;  %v8964_v52 = vld [vmem:[%s13687_s29 + $0xd8] sm:$0x3] }
 0xe50   :  { %11092 = vmatprep.subr.bf16.mxu1 %v11091_v55 }
 0xe51   :  { %10484 = vmatmul.mubr.msk.f32.vlgmr.msra.gmra.mrb[22].mxu0 %vm3030_vm9, %v8954_v58  ;;  %v8976_v58 = vld [vmem:[%s13687_s29 + $0xf8] sm:$0xff] }
 0xe52   :  { %10504 = vmatpush3.msk.msra.mxu0 %vm3033_vm8, %v12593_v46  ;;  %11094 = vmatpush3.bf16.msra.mxu1 %v11091_v55  ;;  %v8973_v55 = vld [vmem:[%s13687_s29 + $0xe0] sm:$0xff] }
 0xe53   :  { %10525 = vmatprep.subr.msk.mxu0 %vm3033_vm8, %v12593_v46  ;;  %10505 = vmatprep.mubr.msk.f32.mxu0 %vm3030_vm9, %v8968_v59  ;;  %v11135_v59 = vpack.c.bf16 %v8974_v56, %v8973_v55  ;;  %v9044_v55 = vld [vmem:[%s13690_s19 + $0x10] sm:$0xff] }
 0xe54   :  { %11096 = vmatprep.subr.bf16.mxu1 %v11095_v60  ;;  %v9038_v56 = vld [vmem:[%s13688_s8 + $0x30] sm:$0xff] }
 0xe55   :  { %10506 = vmatmul.mubr.msk.f32.vlgmr.msra.gmra.mrb[24].mxu0 %vm3030_vm9, %v8969_v61  ;;  %v8977_v61 = vld [vmem:[%s13687_s29 + $0x100] sm:$0xff] }
 0xe56   :  { %10526 = vmatpush3.msk.msra.mxu0 %vm3033_vm8, %v12593_v46  ;;  %11098 = vmatpush3.bf16.msra.mxu1 %v11095_v60  ;;  %v11139_v60 = vpack.c.bf16 %v8976_v58, %v8975_v57  ;;  %v9039_v57 = vld [vmem:[%s13688_s8 + $0x38] sm:$0xff] }
 0xe57   :  { %10547 = vmatprep.subr.msk.mxu0 %vm3033_vm8, %v12593_v46  ;;  %10527 = vmatprep.mubr.msk.f32.mxu0 %vm3030_vm9, %v8983_v62  ;;  %v8978_v62 = vld [vmem:[%s13687_s29 + $0x108] sm:$0xff] }
 0xe58   :  { %10432 = vmatprep.subr.msk.mxu1 %vm3033_vm8, %v3202_v63 }
 0xe59   :  { %10528 = vmatmul.mubr.msk.f32.vlgmr.msra.gmra.mrb[26].mxu0 %vm3030_vm9, %v8984_v0  ;;  %v8979_v0 = vld [vmem:[%s13687_s29 + $0x110] sm:$0x3] }
 0xe5a   :  { %10548 = vmatpush3.msk.msra.mxu0 %vm3033_vm8, %v12593_v46  ;;  %10433 = vmatpush3.msk.msra.mxu1 %vm3033_vm8, %v3202_v63  ;;  %v11143_v63 = vpack.c.bf16 %v8978_v62, %v8977_v61 }
 0xe5b   :  { %10569 = vmatprep.subr.msk.mxu0 %vm3033_vm8, %v12593_v46  ;;  %10437 = vmatprep.subr.msk.mxu1 %vm3033_vm8, %v12593_v46 }
 0xe5c   :  { %10549 = vmatprep.mubr.msk.f32.mxu0 %vm3030_vm9, %v8998_v1  ;;  %v8988_v1 = vld [vmem:[%s13687_s29 + $0x118] sm:$0xff] }
 0xe5d   :  { %10550 = vmatmul.mubr.msk.f32.vlgmr.msra.gmra.mrb[28].mxu0 %vm3030_vm9, %v8999_v2  ;;  %v8989_v2 = vld [vmem:[%s13687_s29 + $0x120] sm:$0xff] }
 0xe5e   :  { %10570 = vmatpush3.msk.msra.mxu0 %vm3033_vm8, %v12593_v46  ;;  %10571 = vmatprep.mubr.msk.f32.mxu0 %vm3030_vm9, %v9013_v3  ;;  %v8990_v3 = vld [vmem:[%s13687_s29 + $0x128] sm:$0xff]  ;;  %v11147_v5 = vpack.c.bf16 %v8989_v2, %v8988_v1  ;;  %v9058_v1 = vld [vmem:[%s13690_s19 + $0x20] sm:$0xff]  ;;  %v9052_v2 = vld [vmem:[%s13688_s8 + $0x50] sm:$0xff] }
 0xe61   :  { %10572 = vmatmul.mubr.msk.f32.vlgmr.msra.gmra.mrb[30].mxu0 %vm3030_vm9, %v9014_v4  ;;  %v8991_v4 = vld [vmem:[%s13687_s29 + $0x130] sm:$0xff] }
 0xe62   :  { %v11151_v6 = vpack.c.bf16 %v8991_v4, %v8990_v3  ;;  %v9053_v3 = vld [vmem:[%s13688_s8 + $0x58] sm:$0xff] }
 0xf1f   :  { %v10419_v7 = vpop.f32.mrb[34].mxu1 }
 0xf20   :  { %v3187_v8 = vpop.f32.mrb[35].mxu1  ;;  %v10463_v22 = vpop.f32.mrb[20].mxu0 }
 0xf21   :  { %10434 = vmatprep.mubr.msk.f32.mxu1 %vm3203_vm11, %v3187_v8  ;;  %v3543_v23 = vpop.f32.mrb[21].mxu0  ;;  %v8993_v8 = vld [vmem:[%s13687_s29 + $0x140] sm:$0xff] }
 0xf22   :  { %10435 = vmatmul.mubr.msk.f32.vlgmr.msra.gmra.mrb[36].mxu1 %vm3203_vm11, %v10419_v7  ;;  %v8992_v7 = vld [vmem:[%s13687_s29 + $0x138] sm:$0xff] }
 0xf23   :  { %10438 = vmatpush3.msk.msra.mxu1 %vm3033_vm8, %v12593_v46  ;;  %10439 = vmatprep.mubr.msk.f32.mxu1 %vm3030_vm9, %v8923_v9  ;;  %v8961_v46 = vld [vmem:[%s13687_s29 + $0xc0] sm:$0xff]  ;;  %v11155_v9 = vpack.c.bf16 %v8993_v8, %v8992_v7 }
 0xf24   :  { %11100 = vmatprep.subr.bf16.mxu1 %v11099_v10  ;;  %v10485_v24 = vpop.f32.mrb[22].mxu0  ;;  %v11127_v48 = vpack.c.bf16 %v8961_v46, %v8960_v45  ;;  %v4542_v45 = vld [vmem:[%s13688_s8 + $0x18] sm:$0xff]  ;;  %v9064_v8 = vld [vmem:[%s13688_s8 + $0x60] sm:$0xff] }
 0xf25   :  { %v3721_v25 = vpop.f32.mrb[23].mxu0 }
 0xf26   :  { %10440 = vmatmul.mubr.msk.f32.vlgmr.msra.gmra.mrb[38].mxu1 %vm3030_vm9, %v8924_v13  ;;  %v9005_v13 = vld [vmem:[%s13687_s29 + $0x160] sm:$0xff] }
 0xf27   :  { %11102 = vmatpush3.bf16.msra.mxu1 %v11099_v10  ;;  %v8994_v10 = vld [vmem:[%s13687_s29 + $0x148] sm:$0x3] }
 0xf28   :  { %11104 = vmatprep.subr.bf16.mxu1 %v11103_v14  ;;  %v12675_v26 = vpop.f32.mrb[24].mxu0 }
 0xf29   :  { %v3899_v27 = vpop.f32.mrb[25].mxu0 }
 0xf2b   :  { %11106 = vmatpush3.bf16.msra.mxu1 %v11103_v14  ;;  %v9006_v14 = vld [vmem:[%s13687_s29 + $0x168] sm:$0xff] }
 0xf2c   :  { %11108 = vmatprep.subr.bf16.mxu1 %v11107_v17  ;;  %v12677_v28 = vpop.f32.mrb[26].mxu0  ;;  %v11163_v16 = vpack.c.bf16 %v9006_v14, %v9005_v13  ;;  %v9072_v13 = vld [vmem:[%s13690_s19 + $0x30] sm:$0xff] }
 0xf2d   :  { %v12679_v29 = vpop.f32.mrb[27].mxu0 }
 0xf2f   :  { %11110 = vmatpush3.bf16.msra.mxu1 %v11107_v17  ;;  %v9007_v17 = vld [vmem:[%s13687_s29 + $0x170] sm:$0xff] }
 0xf30   :  { %10454 = vmatprep.subr.msk.mxu1 %vm3033_vm8, %v8934_v18  ;;  %v12681_v30 = vpop.f32.mrb[28].mxu0 }
 0xf31   :  { %v12683_v31 = vpop.f32.mrb[29].mxu0 }
 0xf33   :  { %10455 = vmatpush3.msk.msra.mxu1 %vm3033_vm8, %v8934_v18  ;;  %v9008_v18 = vld [vmem:[%s13687_s29 + $0x178] sm:$0xff] }
 0xf34   :  { %11112 = vmatprep.subr.bf16.mxu1 %v11111_v21  ;;  %v12685_v32 = vpop.f32.mrb[30].mxu0  ;;  %v11167_v19 = vpack.c.bf16 %v9008_v18, %v9007_v17  ;;  %v4744_v18 = vlaneseq }
 0xf35   :  { %v12687_v33 = vpop.f32.mrb[31].mxu0 }
 0xff9   :  { %v10441_v36 = vpop.f32.mrb[38].mxu1 }
 0xffa   :  { %v3365_v37 = vpop.f32.mrb[39].mxu1 }
 0xffb   :  { %10456 = vmatprep.mubr.msk.f32.mxu1 %vm3203_vm11, %v3365_v37 }
 0xffc   :  { %10457 = vmatmul.mubr.msk.f32.vlgmr.msra.gmra.mrb[36].mxu1 %vm3203_vm11, %v10441_v36 }
 0xffd   :  { %11114 = vmatpush3.bf16.msra.mxu1 %v11111_v21  ;;  %10478 = vmatprep.mubr.msk.f32.mxu1 %vm3203_vm11, %v3543_v23  ;;  %v9018_v21 = vld [vmem:[%s13687_s29 + $0x188] sm:$0xff]  ;;  %v9020_v23 = vld [vmem:[%s13687_s29 + $0x198] sm:$0xff] }
 0xffe   :  { %11116 = vmatprep.subr.bf16.mxu1 %v11115_v38 }
0x1001   :  { %11118 = vmatpush3.bf16.msra.mxu1 %v11115_v38 }
0x1002   :  { %11120 = vmatprep.subr.bf16.mxu1 %v11119_v41 }
0x1005   :  { %11122 = vmatpush3.bf16.msra.mxu1 %v11119_v41 }
0x1006   :  { %10476 = vmatprep.subr.msk.mxu1 %vm3033_vm8, %v8949_v42 }
0x1009   :  { %10477 = vmatpush3.msk.msra.mxu1 %vm3033_vm8, %v8949_v42  ;;  %v4540_v42 = vld [vmem:[%s13688_s8 + $0x8] sm:$0xff] }
0x100a   :  { %10479 = vmatmul.mubr.msk.f32.vlgmr.msra.gmra.mrb[36].mxu1 %vm3203_vm11, %v10463_v22  ;;  %11124 = vmatprep.subr.bf16.mxu1 %v11123_v47  ;;  %v9019_v22 = vld [vmem:[%s13687_s29 + $0x190] sm:$0xff] }
0x100b   :  { %11126 = vmatpush3.bf16.msra.mxu1 %v11123_v47  ;;  %10500 = vmatprep.mubr.msk.f32.mxu1 %vm3203_vm11, %v3721_v25  ;;  %v11171_v25 = vpack.c.bf16 %v9019_v22, %v9018_v21  ;;  %v4538_v21 = vld [vmem:[%s13691_s24] sm:$0x3] }
0x100c   :  { %11128 = vmatprep.subr.bf16.mxu1 %v11127_v48 }
0x100f   :  { %11130 = vmatpush3.bf16.msra.mxu1 %v11127_v48  ;;  %v9045_v48 = vld [vmem:[%s13690_s19 + $0x18] sm:$0xff] }
0x1010   :  { %11132 = vmatprep.subr.bf16.mxu1 %v11131_v51 }
0x1013   :  { %11134 = vmatpush3.bf16.msra.mxu1 %v11131_v51  ;;  %v9036_v51 = vld [vmem:[%s13688_s8 + $0x20] sm:$0xff] }
0x1014   :  { %10498 = vmatprep.subr.msk.mxu1 %vm3033_vm8, %v8964_v52 }
0x1017   :  { %10499 = vmatpush3.msk.msra.mxu1 %vm3033_vm8, %v8964_v52  ;;  %v9037_v52 = vld [vmem:[%s13688_s8 + $0x28] sm:$0xff] }
0x1018   :  { %10501 = vmatmul.mubr.msk.f32.vlgmr.msra.gmra.mrb[36].mxu1 %vm3203_vm11, %v10485_v24  ;;  %11136 = vmatprep.subr.bf16.mxu1 %v11135_v59  ;;  %v9021_v24 = vld [vmem:[%s13687_s29 + $0x1a0] sm:$0xff] }
0x1019   :  { %11138 = vmatpush3.bf16.msra.mxu1 %v11135_v59  ;;  %10522 = vmatprep.mubr.msk.f32.mxu1 %vm3203_vm11, %v3899_v27  ;;  %v9022_v27 = vld [vmem:[%s13687_s29 + $0x1a8] sm:$0xff] }
0x101a   :  { %11140 = vmatprep.subr.bf16.mxu1 %v11139_v60 }
0x101d   :  { %11142 = vmatpush3.bf16.msra.mxu1 %v11139_v60  ;;  %v9059_v60 = vld [vmem:[%s13690_s19 + $0x28] sm:$0xff] }
0x101e   :  { %11144 = vmatprep.subr.bf16.mxu1 %v11143_v63 }
0x1021   :  { %11146 = vmatpush3.bf16.msra.mxu1 %v11143_v63  ;;  %v9050_v63 = vld [vmem:[%s13688_s8 + $0x40] sm:$0xff] }
0x1022   :  { %10520 = vmatprep.subr.msk.mxu1 %vm3033_vm8, %v8979_v0 }
0x1025   :  { %10521 = vmatpush3.msk.msra.mxu1 %vm3033_vm8, %v8979_v0  ;;  %v9051_v0 = vld [vmem:[%s13688_s8 + $0x48] sm:$0xff] }
0x1026   :  { %10523 = vmatmul.mubr.msk.f32.vlgmr.msra.gmra.mrb[36].mxu1 %vm3203_vm11, %v12675_v26  ;;  %11148 = vmatprep.subr.bf16.mxu1 %v11147_v5  ;;  %v11175_v26 = vpack.c.bf16 %v9021_v24, %v9020_v23 }
0x1027   :  { %11150 = vmatpush3.bf16.msra.mxu1 %v11147_v5  ;;  %10544 = vmatprep.mubr.msk.f32.mxu1 %vm3203_vm11, %v12679_v29 }
0x1028   :  { %11152 = vmatprep.subr.bf16.mxu1 %v11151_v6 }
0x102b   :  { %11154 = vmatpush3.bf16.msra.mxu1 %v11151_v6 }
0x102c   :  { %11156 = vmatprep.subr.bf16.mxu1 %v11155_v9 }
0x102f   :  { %11158 = vmatpush3.bf16.msra.mxu1 %v11155_v9  ;;  %v9065_v9 = vld [vmem:[%s13688_s8 + $0x68] sm:$0xff] }
0x1030   :  { %10542 = vmatprep.subr.msk.mxu1 %vm3033_vm8, %v8994_v10 }
0x1033   :  { %10543 = vmatpush3.msk.msra.mxu1 %vm3033_vm8, %v8994_v10  ;;  %v9066_v10 = vld [vmem:[%s13688_s8 + $0x70] sm:$0xff] }
0x1034   :  { %10545 = vmatmul.mubr.msk.f32.vlgmr.msra.gmra.mrb[36].mxu1 %vm3203_vm11, %v12677_v28  ;;  %11160 = vmatprep.subr.bf16.mxu1 %v11159_v15  ;;  %v9023_v28 = vld [vmem:[%s13687_s29 + $0x1b0] sm:$0xff] }
0x1035   :  { %11162 = vmatpush3.bf16.msra.mxu1 %v11159_v15  ;;  %10566 = vmatprep.mubr.msk.f32.mxu1 %vm3203_vm11, %v12683_v31  ;;  %v11179_v29 = vpack.c.bf16 %v9023_v28, %v9022_v27  ;;  %v9024_v31 = vld [vmem:[%s13687_s29 + $0x1b8] sm:$0x3] }
0x1036   :  { %11164 = vmatprep.subr.bf16.mxu1 %v11163_v16 }
0x1039   :  { %11166 = vmatpush3.bf16.msra.mxu1 %v11163_v16 }
0x103a   :  { %11168 = vmatprep.subr.bf16.mxu1 %v11167_v19 }
0x103d   :  { %11170 = vmatpush3.bf16.msra.mxu1 %v11167_v19  ;;  %v12848_v19 = vshrl.u32 %v4744_v18, 7 }
0x103e   :  { %10564 = vmatprep.subr.msk.mxu1 %vm3033_vm8, %v9009_v20 }
0x103f   :  { %v4750_v22 = vsub.s32 1, %v12848_v19 }
0x1041   :  { %10565 = vmatpush3.msk.msra.mxu1 %vm3033_vm8, %v9009_v20  ;;  %v4746_v20 = vsub.s32 0, %v12848_v19 }
0x1042   :  { %10567 = vmatmul.mubr.msk.f32.vlgmr.msra.gmra.mrb[36].mxu1 %vm3203_vm11, %v12681_v30  ;;  %11172 = vmatprep.subr.bf16.mxu1 %v11171_v25  ;;  %v4539_v30 = vld [vmem:[%s13688_s8] sm:$0xff] }
0x1043   :  { %11174 = vmatpush3.bf16.msra.mxu1 %v11171_v25  ;;  %10588 = vmatprep.mubr.msk.f32.mxu1 %vm3203_vm11, %v12687_v33  ;;  %v3109_v33 = vld [vmem:[%s13689_s14 + $0x8] sm:$0xff]  ;;  %v4747_v23 = vrot.slane %v4538_v21, %v4746_v20  ;;  %v4751_v25 = vrot.slane %v4538_v21, %v4750_v22 }
0x1044   :  { %11176 = vmatprep.subr.bf16.mxu1 %v11175_v26  ;;  %10595 = vmatprep.mubr.msk.f32.mxu0 %vm1333_vm3, %v4539_v30 }
0x1047   :  { %11178 = vmatpush3.bf16.msra.mxu1 %v11175_v26 }
0x1048   :  { %11180 = vmatprep.subr.bf16.mxu1 %v11179_v29 }
0x104b   :  { %11182 = vmatpush3.bf16.msra.mxu1 %v11179_v29 }
0x104c   :  { %10586 = vmatprep.subr.msk.mxu1 %vm3033_vm8, %v9024_v31 }
0x104f   :  { %10587 = vmatpush3.msk.msra.mxu1 %vm3033_vm8, %v9024_v31 }
0x1050   :  { %10589 = vmatmul.mubr.msk.f32.vlgmr.msra.gmra.mrb[36].mxu1 %vm3203_vm11, %v12685_v32  ;;  %v4641_v32 = vld [vmem:[%s13690_s19 + $0x8] sm:$0xff] }
0x1051   :  { %5497 = vmatprep.mubr.f32.mxu1 %v12065_v54 }
0x1123   :  { %v10590_v35 = vpop.f32.mrb[36].mxu1 }
0x1124   :  { %v11720_v36 = vadd.f32 %v10590_v35, %v3109_v33  ;;  %v4525_v37 = vpop.f32.mrb[37].mxu1 }
0x1125   :  { %v11721_v38 = vadd.f32 %v4525_v37, %v3108_v34 }
0x1126   :  { %v4537_v39 = vmax.f32 %v11720_v36, 0.0 }
0x1127   :  { %v4536_v40 = vmax.f32 %v11721_v38, 0.0 }
0x1129   :  { %v12767_v41 = vpack.c.bf16 %v4537_v39, %v4536_v40 }
0x112b   :  { %11184 = vmatprep.subr.bf16.mxu0 %v12767_v41 }
0x112c   :  { %11186 = vmatpush3.bf16.msra.mxu0 %v12767_v41 }
0x112d   :  { %4654 = vmatprep.subr.mxu0 %v4641_v32 }
0x112f   :  { %10596 = vmatmul.mubr.msk.f32.vlgmr.msra.gmra.mrb[32].mxu0 %vm1333_vm3, %v4540_v42 }
0x1130   :  { %4655 = vmatpush1.msra.mxu0 %v4640_v43  ;;  %10598 = vmatprep.mubr.msk.f32.mxu0 %vm1333_vm3, %v4541_v44 }
0x1131   :  { %11188 = vmatprep.subr.bf16.mxu0 %v12767_v41 }
0x1133   :  { %10599 = vmatmul.mubr.msk.f32.gmra.mrb[34].mxu0 %vm1333_vm3, %v4542_v45 }
0x1134   :  { %4718 = vmatprep.mubr.f32.mxu0 %v12065_v54 }
0x1202   :  { %v10597_v46 = vpop.f32.mrb[32].mxu0 }
0x1203   :  { %v4621_v47 = vpop.f32.mrb[33].mxu0 }
0x1204   :  { %9032 = vmatmul.mubr.msk.f32.vlgmr.msra.gmra.mrb[36].mxu0 %vm1814_vm4, %v4621_v47 }
0x1205   :  { %11190 = vmatpush3.bf16.msra.mxu0 %v12767_v41  ;;  %4724 = vmatprep.mubr.f32.mxu0 %v12065_v54 }
0x1206   :  { %v10600_v49 = vpop.f32.mrb[34].mxu0  ;;  %4879 = vmatprep.subr.mxu0 %v9045_v48 }
0x1207   :  { %v4631_v50 = vpop.f32.mrb[35].mxu0 }
0x1208   :  { %9033 = vmatmul.mubr.msk.f32.gmra.mrb[38].mxu0 %vm1814_vm4, %v10597_v46 }
0x1209   :  { %4730 = vmatprep.mubr.f32.mxu0 %v12065_v54 }
0x120c   :  { %9034 = vmatmul.mubr.msk.f32.gmra.mrb[40].mxu0 %vm1814_vm4, %v4631_v50  ;;  %v5531_v50 = vld [vmem:[%s13692_s30 + $0x18] sm:$0xff] }
0x120d   :  { %4736 = vmatprep.mubr.f32.mxu0 %v12065_v54 }
0x1210   :  { %9035 = vmatmul.mubr.msk.f32.gmra.mrb[42].mxu0 %vm1814_vm4, %v10600_v49  ;;  %v5529_v49 = vld [vmem:[%s13692_s30 + $0x8] sm:$0xff] }
0x1211   :  { %10605 = vmatprep.mubr.msk.f32.mxu0 %vm1333_vm3, %v9036_v51 }
0x1214   :  { %10606 = vmatmul.mubr.msk.f32.vlgmr.msra.gmra.mrb[44].mxu0 %vm1333_vm3, %v9037_v52 }
0x1215   :  { %4880 = vmatpush1.msra.mxu0 %v9044_v55  ;;  %10608 = vmatprep.mubr.msk.f32.mxu0 %vm1333_vm3, %v9038_v56 }
0x1216   :  { %11192 = vmatprep.subr.bf16.mxu0 %v12767_v41 }
0x1218   :  { %10609 = vmatmul.mubr.msk.f32.gmra.mrb[46].mxu0 %vm1333_vm3, %v9039_v57  ;;  %v11207_v57 = vpack.c.bf16 %v5531_v50, %v5529_v49  ;;  %v9159_v49 = vld [vmem:[%s13693_s12 + $0x60] sm:$0xff] }
0x1219   :  { %4943 = vmatprep.mubr.f32.mxu0 %v12065_v54 }
0x12e7   :  { %v10607_v58 = vpop.f32.mrb[44].mxu0 }
0x12e8   :  { %v4845_v59 = vpop.f32.mrb[45].mxu0 }
0x12e9   :  { %9046 = vmatmul.mubr.msk.f32.vlgmr.msra.gmra.mrb[36].mxu0 %vm1814_vm4, %v4845_v59  ;;  %v5530_v59 = vld [vmem:[%s13692_s30 + $0x10] sm:$0xff] }
0x12ea   :  { %11194 = vmatpush3.bf16.msra.mxu0 %v12767_v41  ;;  %4949 = vmatprep.mubr.f32.mxu0 %v12065_v54 }
0x12eb   :  { %v10610_v61 = vpop.f32.mrb[46].mxu0  ;;  %5093 = vmatprep.subr.mxu0 %v9059_v60  ;;  %v5413_v60 = vld [vmem:[%s13693_s12] sm:$0xff] }
0x12ec   :  { %v4855_v62 = vpop.f32.mrb[47].mxu0 }
0x12ed   :  { %9047 = vmatmul.mubr.msk.f32.gmra.mrb[38].mxu0 %vm1814_vm4, %v10607_v58  ;;  %v5528_v58 = vld [vmem:[%s13692_s30] sm:$0xff] }
0x12ee   :  { %4955 = vmatprep.mubr.f32.mxu0 %v12065_v54 }
0x12f1   :  { %9048 = vmatmul.mubr.msk.f32.gmra.mrb[40].mxu0 %vm1814_vm4, %v4855_v62  ;;  %v11209_v62 = vpack.c.bf16 %v5530_v59, %v5528_v58  ;;  %v5563_v58 = vld [vmem:[%s13692_s30 + $0x118] sm:$0xff] }
0x12f2   :  { %4961 = vmatprep.mubr.f32.mxu0 %v12065_v54 }
0x12f5   :  { %9049 = vmatmul.mubr.msk.f32.gmra.mrb[42].mxu0 %vm1814_vm4, %v10610_v61  ;;  %v9083_v61 = vld [vmem:[%s13693_s12 + $0x28] sm:$0xff] }
0x12f6   :  { %10615 = vmatprep.mubr.msk.f32.mxu0 %vm1333_vm3, %v9050_v63  ;;  %v5533_v63 = vld [vmem:[%s13692_s30 + $0x28] sm:$0xff] }
0x12f9   :  { %10616 = vmatmul.mubr.msk.f32.vlgmr.msra.gmra.mrb[48].mxu0 %vm1333_vm3, %v9051_v0  ;;  %v5535_v0 = vld [vmem:[%s13692_s30 + $0x38] sm:$0xff] }
0x12fa   :  { %5094 = vmatpush1.msra.mxu0 %v9058_v1  ;;  %10618 = vmatprep.mubr.msk.f32.mxu0 %vm1333_vm3, %v9052_v2  ;;  %v9084_v1 = vld [vmem:[%s13693_s12 + $0x30] sm:$0xff]  ;;  %v5414_v2 = vld [vmem:[%s13693_s12 + $0x8] sm:$0xff] }
0x12fb   :  { %11196 = vmatprep.subr.bf16.mxu0 %v12767_v41 }
0x12fd   :  { %10619 = vmatmul.mubr.msk.f32.gmra.mrb[50].mxu0 %vm1333_vm3, %v9053_v3  ;;  %v11211_v3 = vpack.c.bf16 %v5535_v0, %v5533_v63  ;;  %v5565_v63 = vld [vmem:[%s13692_s30 + $0x128] sm:$0xff]  ;;  %v5567_v0 = vld [vmem:[%s13692_s30 + $0x138] sm:$0xff] }
0x12fe   :  { %5157 = vmatprep.mubr.f32.mxu0 %v12065_v54 }
0x13cc   :  { %v10617_v4 = vpop.f32.mrb[48].mxu0 }
0x13cd   :  { %v5059_v5 = vpop.f32.mrb[49].mxu0 }
0x13ce   :  { %9060 = vmatmul.mubr.msk.f32.vlgmr.msra.gmra.mrb[36].mxu0 %vm1814_vm4, %v5059_v5  ;;  %v5534_v5 = vld [vmem:[%s13692_s30 + $0x30] sm:$0xff] }
0x13cf   :  { %11198 = vmatpush3.bf16.msra.mxu0 %v12767_v41  ;;  %5163 = vmatprep.mubr.f32.mxu0 %v12065_v54 }
0x13d0   :  { %v10620_v6 = vpop.f32.mrb[50].mxu0  ;;  %5307 = vmatprep.subr.mxu0 %v9073_v12  ;;  %v5536_v12 = vld [vmem:[%s13692_s30 + $0x40] sm:$0xff] }
0x13d1   :  { %v5069_v7 = vpop.f32.mrb[51].mxu0 }
0x13d2   :  { %9061 = vmatmul.mubr.msk.f32.gmra.mrb[38].mxu0 %vm1814_vm4, %v10617_v4  ;;  %v5532_v4 = vld [vmem:[%s13692_s30 + $0x20] sm:$0xff] }
0x13d3   :  { %5169 = vmatprep.mubr.f32.mxu0 %v12065_v54 }
0x13d6   :  { %9062 = vmatmul.mubr.msk.f32.gmra.mrb[40].mxu0 %vm1814_vm4, %v5069_v7  ;;  %v5539_v7 = vld [vmem:[%s13692_s30 + $0x58] sm:$0xff] }
0x13d7   :  { %5175 = vmatprep.mubr.f32.mxu0 %v12065_v54 }
0x13da   :  { %9063 = vmatmul.mubr.msk.f32.gmra.mrb[42].mxu0 %vm1814_vm4, %v10620_v6  ;;  %v5537_v6 = vld [vmem:[%s13692_s30 + $0x48] sm:$0xff] }
0x13db   :  { %10625 = vmatprep.mubr.msk.f32.mxu0 %vm1333_vm3, %v9064_v8  ;;  %v9085_v8 = vld [vmem:[%s13693_s12 + $0x38] sm:$0xff] }
0x13de   :  { %10626 = vmatmul.mubr.msk.f32.vlgmr.msra.gmra.mrb[52].mxu0 %vm1333_vm3, %v9065_v9  ;;  %v5415_v9 = vld [vmem:[%s13693_s12 + $0x10] sm:$0xff] }
0x13df   :  { %10628 = vmatprep.mubr.msk.f32.mxu0 %vm1333_vm3, %v9066_v10  ;;  %5308 = vmatpush1.msra.mxu0 %v9072_v13  ;;  %v11213_v10 = vpack.c.bf16 %v5534_v5, %v5532_v4  ;;  %v5538_v13 = vld [vmem:[%s13692_s30 + $0x50] sm:$0xff]  ;;  %v5564_v4 = vld [vmem:[%s13692_s30 + $0x120] sm:$0xff] }
0x13e0   :  { %v11217_v18 = vpack.c.bf16 %v5538_v13, %v5536_v12  ;;  %v5566_v5 = vld [vmem:[%s13692_s30 + $0x130] sm:$0xff]  ;;  %v5573_v13 = vld [vmem:[%s13692_s30 + $0x168] sm:$0xff] }
0x13e1   :  { %v5570_v12 = vld [vmem:[%s13692_s30 + $0x150] sm:$0xff] }
0x13e2   :  { %10629 = vmatmul.mubr.msk.f32.gmra.mrb[54].mxu0 %vm1333_vm3, %v9067_v11  ;;  %v11215_v11 = vpack.c.bf16 %v5539_v7, %v5537_v6  ;;  %v5569_v6 = vld [vmem:[%s13692_s30 + $0x148] sm:$0xff]  ;;  %v5571_v7 = vld [vmem:[%s13692_s30 + $0x158] sm:$0xff] }
0x13e3   :  { %5371 = vmatprep.mubr.f32.mxu0 %v12065_v54 }
0x14b1   :  { %v10627_v14 = vpop.f32.mrb[52].mxu0 }
0x14b2   :  { %v5273_v15 = vpop.f32.mrb[53].mxu0 }
0x14b3   :  { %9074 = vmatmul.mubr.msk.f32.vlgmr.msra.gmra.mrb[36].mxu0 %vm1814_vm4, %v5273_v15  ;;  %v5543_v15 = vld [vmem:[%s13692_s30 + $0x78] sm:$0xff] }
0x14b4   :  { %5377 = vmatprep.mubr.f32.mxu0 %v12065_v54 }
0x14b5   :  { %v10630_v16 = vpop.f32.mrb[54].mxu0 }
0x14b6   :  { %v5283_v17 = vpop.f32.mrb[55].mxu0 }
0x14b7   :  { %9075 = vmatmul.mubr.msk.f32.gmra.mrb[38].mxu0 %vm1814_vm4, %v10627_v14  ;;  %v5541_v14 = vld [vmem:[%s13692_s30 + $0x68] sm:$0xff] }
0x14b8   :  { %5383 = vmatprep.mubr.f32.mxu0 %v12065_v54  ;;  %v11219_v21 = vpack.c.bf16 %v5543_v15, %v5541_v14  ;;  %v5575_v14 = vld [vmem:[%s13692_s30 + $0x178] sm:$0xff]  ;;  %v9232_v15 = vld [vmem:[%s13693_s12 + $0x80] sm:$0xff] }
0x14bb   :  { %9076 = vmatmul.mubr.msk.f32.gmra.mrb[40].mxu0 %vm1814_vm4, %v5283_v17  ;;  %v5416_v17 = vld [vmem:[%s13693_s12 + $0x18] sm:$0xff] }
0x14bc   :  { %5389 = vmatprep.mubr.f32.mxu0 %v12065_v54 }
0x14bf   :  { %9077 = vmatmul.mubr.msk.f32.gmra.mrb[42].mxu0 %vm1814_vm4, %v10630_v16  ;;  %v9086_v16 = vld [vmem:[%s13693_s12 + $0x40] sm:$0xff] }
0x14c0   :  { %5793 = vmatprep.mubr.f32.mxu0 %v12065_v54 }
0x1586   :  { %v5373_v24 = vpop.f32.mrb[36].mxu0 }
0x1587   :  { %v5375_v26 = vpop.f32.mrb[37].mxu0  ;;  %v11722_v27 = vadd.f32 %v5373_v24, %v4747_v23  ;;  %v5542_v24 = vld [vmem:[%s13692_s30 + $0x70] sm:$0xff] }
0x1588   :  { %v11723_v28 = vadd.f32 %v5375_v26, %v4751_v25  ;;  %v5547_v26 = vld [vmem:[%s13692_s30 + $0x98] sm:$0xff] }
0x1589   :  { %v5404_v34 = vmax.f32 %v11722_v27, 0.0  ;;  %v9087_v27 = vld [vmem:[%s13693_s12 + $0x48] sm:$0x3] }
0x158a   :  { %v5379_v29 = vpop.f32.mrb[38].mxu0  ;;  %v5405_v36 = vmax.f32 %v11723_v28, 0.0  ;;  %v5417_v28 = vld [vmem:[%s13693_s12 + $0x20] sm:$0x3] }
0x158b   :  { %v11724_v31 = vadd.f32 %v5379_v29, %v4747_v23  ;;  %v5381_v30 = vpop.f32.mrb[39].mxu0 }
0x158c   :  { %v11725_v33 = vadd.f32 %v5381_v30, %v4751_v25  ;;  %v5544_v30 = vld [vmem:[%s13692_s30 + $0x80] sm:$0xff] }
0x158d   :  { %v5406_v35 = vmax.f32 %v11724_v31, 0.0 }
0x158e   :  { %v5407_v37 = vmax.f32 %v11725_v33, 0.0  ;;  %v5385_v38 = vpop.f32.mrb[40].mxu0  ;;  %v5546_v33 = vld [vmem:[%s13692_s30 + $0x90] sm:$0xff] }
0x158f   :  { %v12857_v39 = vpack.c.bf16 %v5406_v35, %v5404_v34  ;;  %v5387_v40 = vpop.f32.mrb[41].mxu0  ;;  %v11726_v32 = vadd.f32 %v5385_v38, %v4747_v23  ;;  %v5549_v34 = vld [vmem:[%s13692_s30 + $0xa8] sm:$0xff]  ;;  %v5551_v35 = vld [vmem:[%s13692_s30 + $0xb8] sm:$0xff] }
0x1590   :  { %v11199_v41 = vpack.c.bf16 %v5407_v37, %v5405_v36  ;;  %v11727_v42 = vadd.f32 %v5387_v40, %v4751_v25  ;;  %v9157_v36 = vld [vmem:[%s13693_s12 + $0x50] sm:$0xff]  ;;  %v11225_v37 = vpack.c.bf16 %v5546_v33, %v5544_v30  ;;  %v11227_v38 = vpack.c.bf16 %v5551_v35, %v5549_v34  ;;  %v5548_v40 = vld [vmem:[%s13692_s30 + $0xa0] sm:$0xff]  ;;  %v5583_v30 = vld [vmem:[%s13692_s30 + $0x1b8] sm:$0xff] }
0x1591   :  { %v5408_v47 = vmax.f32 %v11726_v32, 0.0  ;;  %v5553_v32 = vld [vmem:[%s13692_s30 + $0xc8] sm:$0xff]  ;;  %v9234_v33 = vld [vmem:[%s13693_s12 + $0x90] sm:$0xff] }
0x1592   :  { %v5391_v43 = vpop.f32.mrb[42].mxu0  ;;  %11200 = vmatprep.subr.bf16.mxu1 %v11199_v41  ;;  %11272 = vmatprep.subr.bf16.mxu0 %v11199_v41  ;;  %v5409_v51 = vmax.f32 %v11727_v42, 0.0  ;;  %v5555_v42 = vld [vmem:[%s13692_s30 + $0xd8] sm:$0xff] }
0x1593   :  { %v11728_v44 = vadd.f32 %v5391_v43, %v4747_v23  ;;  %v5393_v45 = vpop.f32.mrb[43].mxu0  ;;  %11202 = vmatpush1.bf16.msra.mxu1 %v12857_v39  ;;  %11274 = vmatpush1.bf16.msra.mxu0 %v12857_v39  ;;  %v5540_v23 = vld [vmem:[%s13692_s30 + $0x60] sm:$0xff]  ;;  %v9158_v43 = vld [vmem:[%s13693_s12 + $0x58] sm:$0xff] }
0x1594   :  { %v11729_v46 = vadd.f32 %v5393_v45, %v4751_v25  ;;  %v5545_v25 = vld [vmem:[%s13692_s30 + $0x88] sm:$0xff]  ;;  %v11221_v29 = vpack.c.bf16 %v5542_v24, %v5540_v23  ;;  %v11231_v45 = vpack.c.bf16 %v5555_v42, %v5553_v32  ;;  %v5579_v24 = vld [vmem:[%s13692_s30 + $0x198] sm:$0xff] }
0x1595   :  { %v5410_v48 = vmax.f32 %v11728_v44, 0.0  ;;  %v11223_v31 = vpack.c.bf16 %v5547_v26, %v5545_v25  ;;  %v5577_v23 = vld [vmem:[%s13692_s30 + $0x188] sm:$0xff] }
0x1596   :  { %v5411_v52 = vmax.f32 %v11729_v46, 0.0  ;;  %v5552_v46 = vld [vmem:[%s13692_s30 + $0xc0] sm:$0xff]  ;;  %v9233_v25 = vld [vmem:[%s13693_s12 + $0x88] sm:$0xff] }
0x1597   :  { %v12863_v55 = vpack.c.bf16 %v5410_v48, %v5408_v47  ;;  %v5554_v47 = vld [vmem:[%s13692_s30 + $0xd0] sm:$0xff]  ;;  %v5557_v48 = vld [vmem:[%s13692_s30 + $0xe8] sm:$0xff] }
0x1598   :  { %v12865_v56 = vpack.c.bf16 %v5411_v52, %v5409_v51  ;;  %v11233_v50 = vpack.c.bf16 %v5554_v47, %v5552_v46  ;;  %v5556_v52 = vld [vmem:[%s13692_s30 + $0xe0] sm:$0xff]  ;;  %v5591_v46 = vld [vmem:[%s13692_s30 + $0x1f8] sm:$0xff] }
0x159a   :  { %11204 = vmatprep.subr.bf16.mxu1 %v12865_v56  ;;  %11276 = vmatprep.subr.bf16.mxu0 %v12865_v56 }
0x159b   :  { %11206 = vmatpush1.bf16.msra.mxu1 %v12863_v55  ;;  %11278 = vmatpush1.bf16.msra.mxu0 %v12863_v55 }
0x159c   :  { %11344 = vmatprep.subr.bf16.mxu0 %v11199_v41  ;;  %11208 = vmatprep.subr.bf16.mxu1 %v11207_v57  ;;  %v5561_v57 = vld [vmem:[%s13692_s30 + $0x108] sm:$0xff] }
0x159e   :  { %9078 = vmatmul.mubr.msk.f32.vlgmr.msra.gmra.mrb[40].mxu1 %vm268_vm1, %v5413_v60  ;;  %9088 = vmatmul.mubr.msk.f32.vlgmr.msra.gmra.mrb[56].mxu0 %vm268_vm1, %v9083_v61  ;;  %v11239_v60 = vpack.c.bf16 %v5563_v58, %v5561_v57  ;;  %v5560_v61 = vld [vmem:[%s13692_s30 + $0x100] sm:$0xff]  ;;  %v9095_v58 = vld [vmem:[%s13692_s30 + $0x210] sm:$0xff] }
0x159f   :  { %11346 = vmatpush1.bf16.msra.mxu0 %v12857_v39  ;;  %5799 = vmatprep.mubr.f32.mxu0 %v12065_v54  ;;  %v9093_v57 = vld [vmem:[%s13692_s30 + $0x200] sm:$0xff] }
0x15a0   :  { %11348 = vmatprep.subr.bf16.mxu0 %v12865_v56  ;;  %5503 = vmatprep.mubr.f32.mxu1 %v12065_v54 }
0x15a1   :  { %11210 = vmatpush1.bf16.msra.mxu1 %v11209_v62  ;;  %v5562_v62 = vld [vmem:[%s13692_s30 + $0x110] sm:$0xff] }
0x15a2   :  { %9089 = vmatmul.mubr.msk.f32.gmra.mrb[58].mxu0 %vm268_vm1, %v9084_v1  ;;  %9079 = vmatmul.mubr.msk.f32.gmra.mrb[42].mxu1 %vm268_vm1, %v5414_v2  ;;  %v9161_v1 = vld [vmem:[%s13693_s12 + $0x70] sm:$0x3]  ;;  %v11241_v2 = vpack.c.bf16 %v5562_v62, %v5560_v61  ;;  %v11281_v61 = vpack.c.bf16 %v9095_v58, %v9093_v57  ;;  %v9122_v58 = vld [vmem:[%s13692_s30 + $0x2e8] sm:$0xff] }
0x15a3   :  { %11350 = vmatpush1.bf16.msra.mxu0 %v12863_v55  ;;  %5805 = vmatprep.mubr.f32.mxu0 %v12065_v54 }
0x15a4   :  { %11416 = vmatprep.subr.bf16.mxu0 %v11199_v41  ;;  %5509 = vmatprep.mubr.f32.mxu1 %v12065_v54  ;;  %v5550_v41 = vld [vmem:[%s13692_s30 + $0xb0] sm:$0xff] }
0x15a5   :  { %11212 = vmatprep.subr.bf16.mxu1 %v11211_v3  ;;  %v11229_v44 = vpack.c.bf16 %v5550_v41, %v5548_v40  ;;  %v11243_v3 = vpack.c.bf16 %v5567_v0, %v5565_v63  ;;  %v5587_v40 = vld [vmem:[%s13692_s30 + $0x1d8] sm:$0xff] }
0x15a6   :  { %9090 = vmatmul.mubr.msk.f32.gmra.mrb[60].mxu0 %vm268_vm1, %v9085_v8  ;;  %9080 = vmatmul.mubr.msk.f32.gmra.mrb[44].mxu1 %vm268_vm1, %v5415_v9  ;;  %v9231_v8 = vld [vmem:[%s13693_s12 + $0x78] sm:$0xff]  ;;  %v11245_v9 = vpack.c.bf16 %v5566_v5, %v5564_v4  ;;  %v9102_v4 = vld [vmem:[%s13692_s30 + $0x248] sm:$0xff] }
0x15a7   :  { %5811 = vmatprep.mubr.f32.mxu0 %v12065_v54  ;;  %5515 = vmatprep.mubr.f32.mxu1 %v12065_v54  ;;  %v9235_v41 = vld [vmem:[%s13693_s12 + $0x98] sm:$0x3] }
0x15a8   :  { %11214 = vmatpush1.bf16.msra.mxu1 %v11213_v10  ;;  %v11247_v10 = vpack.c.bf16 %v5571_v7, %v5569_v6  ;;  %v9104_v5 = vld [vmem:[%s13692_s30 + $0x258] sm:$0xff] }
0x15a9   :  { %11216 = vmatprep.subr.bf16.mxu1 %v11215_v11  ;;  %v5568_v11 = vld [vmem:[%s13692_s30 + $0x140] sm:$0xff] }
0x15aa   :  { %9091 = vmatmul.mubr.msk.f32.gmra.mrb[62].mxu0 %vm268_vm1, %v9086_v16  ;;  %9081 = vmatmul.mubr.msk.f32.gmra.mrb[46].mxu1 %vm268_vm1, %v5416_v17  ;;  %v11249_v16 = vpack.c.bf16 %v5570_v12, %v5568_v11  ;;  %v11251_v17 = vpack.c.bf16 %v5575_v14, %v5573_v13  ;;  %v9103_v11 = vld [vmem:[%s13692_s30 + $0x250] sm:$0xff]  ;;  %v9106_v14 = vld [vmem:[%s13692_s30 + $0x268] sm:$0xff] }
0x15ab   :  { %5817 = vmatprep.mubr.f32.mxu0 %v12065_v54  ;;  %5521 = vmatprep.mubr.f32.mxu1 %v12065_v54 }
0x15ac   :  { %11218 = vmatpush1.bf16.msra.mxu1 %v11217_v18  ;;  %v5572_v18 = vld [vmem:[%s13692_s30 + $0x160] sm:$0xff] }
0x15ad   :  { %11220 = vmatprep.subr.bf16.mxu1 %v11219_v21  ;;  %v5574_v21 = vld [vmem:[%s13692_s30 + $0x170] sm:$0xff] }
0x15ae   :  { %9092 = vmatmul.mubr.msk.f32.gmra.mrb[64].mxu0 %vm268_vm1, %v9087_v27  ;;  %9082 = vmatmul.mubr.msk.f32.gmra.mrb[48].mxu1 %vm268_vm1, %v5417_v28  ;;  %v11253_v26 = vpack.c.bf16 %v5574_v21, %v5572_v18  ;;  %v11255_v27 = vpack.c.bf16 %v5579_v24, %v5577_v23  ;;  %v5576_v28 = vld [vmem:[%s13692_s30 + $0x180] sm:$0xff]  ;;  %v9107_v24 = vld [vmem:[%s13692_s30 + $0x270] sm:$0xff] }
0x15af   :  { %6079 = vmatprep.mubr.f32.mxu0 %v12065_v54  ;;  %v9105_v23 = vld [vmem:[%s13692_s30 + $0x260] sm:$0xff] }
0x15b0   :  { %11222 = vmatpush1.bf16.msra.mxu1 %v11221_v29  ;;  %v5578_v29 = vld [vmem:[%s13692_s30 + $0x190] sm:$0xff] }
0x15b1   :  { %11224 = vmatprep.subr.bf16.mxu1 %v11223_v31  ;;  %v5581_v31 = vld [vmem:[%s13692_s30 + $0x1a8] sm:$0xff]  ;;  %v11257_v34 = vpack.c.bf16 %v5578_v29, %v5576_v28  ;;  %v9112_v28 = vld [vmem:[%s13692_s30 + $0x298] sm:$0xff]  ;;  %v11293_v29 = vpack.c.bf16 %v9107_v24, %v9105_v23  ;;  %v9135_v23 = vld [vmem:[%s13692_s30 + $0x350] sm:$0xff] }
0x15b2   :  { %9162 = vmatmul.mubr.msk.f32.vlgmr.msra.gmra.mrb[66].mxu0 %vm268_vm1, %v9157_v36  ;;  %v11259_v35 = vpack.c.bf16 %v5583_v30, %v5581_v31  ;;  %v5580_v36 = vld [vmem:[%s13692_s30 + $0x1a0] sm:$0xff]  ;;  %v9138_v24 = vld [vmem:[%s13692_s30 + $0x368] sm:$0xff] }
0x15b3   :  { %11418 = vmatpush1.bf16.msra.mxu0 %v12857_v39  ;;  %6085 = vmatprep.mubr.f32.mxu0 %v12065_v54  ;;  %v5559_v39 = vld [vmem:[%s13692_s30 + $0xf8] sm:$0xff] }
0x15b4   :  { %11420 = vmatprep.subr.bf16.mxu0 %v12865_v56  ;;  %11226 = vmatpush1.bf16.msra.mxu1 %v11225_v37  ;;  %v11235_v51 = vpack.c.bf16 %v5559_v39, %v5557_v48  ;;  %v5558_v56 = vld [vmem:[%s13692_s30 + $0xf0] sm:$0xff]  ;;  %v5588_v39 = vld [vmem:[%s13692_s30 + $0x1e0] sm:$0xff] }
0x15b5   :  { %11228 = vmatprep.subr.bf16.mxu1 %v11227_v38  ;;  %v11237_v59 = vpack.c.bf16 %v5558_v56, %v5556_v52  ;;  %v5582_v37 = vld [vmem:[%s13692_s30 + $0x1b0] sm:$0xff]  ;;  %v5585_v38 = vld [vmem:[%s13692_s30 + $0x1c8] sm:$0xff]  ;;  %v9096_v52 = vld [vmem:[%s13692_s30 + $0x218] sm:$0xff] }
0x15b6   :  { %9163 = vmatmul.mubr.msk.f32.gmra.mrb[68].mxu0 %vm268_vm1, %v9158_v43  ;;  %v11261_v32 = vpack.c.bf16 %v5582_v37, %v5580_v36  ;;  %v11263_v42 = vpack.c.bf16 %v5587_v40, %v5585_v38  ;;  %v5584_v43 = vld [vmem:[%s13692_s30 + $0x1c0] sm:$0xff]  ;;  %v9114_v38 = vld [vmem:[%s13692_s30 + $0x2a8] sm:$0xff]  ;;  %v9116_v40 = vld [vmem:[%s13692_s30 + $0x2b8] sm:$0xff] }
0x15b7   :  { %11422 = vmatpush1.bf16.msra.mxu0 %v12863_v55  ;;  %6091 = vmatprep.mubr.f32.mxu0 %v12065_v54  ;;  %v9160_v55 = vld [vmem:[%s13693_s12 + $0x68] sm:$0xff] }
0x15b8   :  { %11230 = vmatpush1.bf16.msra.mxu1 %v11229_v44  ;;  %v5586_v44 = vld [vmem:[%s13692_s30 + $0x1d0] sm:$0xff] }
0x15b9   :  { %11232 = vmatprep.subr.bf16.mxu1 %v11231_v45  ;;  %v5589_v45 = vld [vmem:[%s13692_s30 + $0x1e8] sm:$0xff]  ;;  %v11265_v47 = vpack.c.bf16 %v5586_v44, %v5584_v43  ;;  %v11299_v43 = vpack.c.bf16 %v9116_v40, %v9114_v38  ;;  %v9113_v44 = vld [vmem:[%s13692_s30 + $0x2a0] sm:$0xff] }
0x15ba   :  { %9164 = vmatmul.mubr.msk.f32.gmra.mrb[70].mxu0 %vm268_vm1, %v9159_v49  ;;  %v11267_v48 = vpack.c.bf16 %v5591_v46, %v5589_v45  ;;  %v5590_v49 = vld [vmem:[%s13692_s30 + $0x1f0] sm:$0xff]  ;;  %v9141_v40 = vld [vmem:[%s13692_s30 + $0x380] sm:$0xff] }
0x15bb   :  { %6097 = vmatprep.mubr.f32.mxu0 %v12065_v54  ;;  %v9115_v45 = vld [vmem:[%s13692_s30 + $0x2b0] sm:$0xff] }
0x15bc   :  { %11234 = vmatpush1.bf16.msra.mxu1 %v11233_v50  ;;  %v11269_v50 = vpack.c.bf16 %v5590_v49, %v5588_v39  ;;  %v9120_v39 = vld [vmem:[%s13692_s30 + $0x2d8] sm:$0xff]  ;;  %v11301_v49 = vpack.c.bf16 %v9115_v45, %v9113_v44 }
0x15bd   :  { %11236 = vmatprep.subr.bf16.mxu1 %v11235_v51  ;;  %v9094_v51 = vld [vmem:[%s13692_s30 + $0x208] sm:$0xff]  ;;  %v9148_v44 = vld [vmem:[%s13692_s30 + $0x3b8] sm:$0xff] }
0x15be   :  { %9165 = vmatmul.mubr.msk.f32.gmra.mrb[72].mxu0 %vm268_vm1, %v9160_v55  ;;  %v11279_v56 = vpack.c.bf16 %v9096_v52, %v9094_v51  ;;  %v9098_v55 = vld [vmem:[%s13692_s30 + $0x228] sm:$0xff]  ;;  %v9117_v52 = vld [vmem:[%s13692_s30 + $0x2c0] sm:$0xff] }
0x15bf   :  { %6103 = vmatprep.mubr.f32.mxu0 %v12065_v54 }
0x15c0   :  { %11238 = vmatpush1.bf16.msra.mxu1 %v11237_v59  ;;  %v9100_v59 = vld [vmem:[%s13692_s30 + $0x238] sm:$0xff] }
0x15c1   :  { %11240 = vmatprep.subr.bf16.mxu1 %v11239_v60  ;;  %v11283_v0 = vpack.c.bf16 %v9100_v59, %v9098_v55  ;;  %v9124_v55 = vld [vmem:[%s13692_s30 + $0x2f8] sm:$0xff] }
0x15c2   :  { %9166 = vmatmul.mubr.msk.f32.gmra.mrb[74].mxu0 %vm268_vm1, %v9161_v1  ;;  %v9097_v1 = vld [vmem:[%s13692_s30 + $0x220] sm:$0xff] }
0x15c3   :  { %6365 = vmatprep.mubr.f32.mxu0 %v12065_v54 }
0x15c4   :  { %11242 = vmatpush1.bf16.msra.mxu1 %v11241_v2  ;;  %v9099_v2 = vld [vmem:[%s13692_s30 + $0x230] sm:$0xff] }
0x15c5   :  { %11244 = vmatprep.subr.bf16.mxu1 %v11243_v3  ;;  %v11285_v6 = vpack.c.bf16 %v9099_v2, %v9097_v1  ;;  %v9128_v1 = vld [vmem:[%s13692_s30 + $0x318] sm:$0xff] }
0x15c6   :  { %9236 = vmatmul.mubr.msk.f32.vlgmr.msra.gmra.mrb[76].mxu0 %vm268_vm1, %v9231_v8 }
0x15c7   :  { %6371 = vmatprep.mubr.f32.mxu0 %v12065_v54 }
0x15c8   :  { %11246 = vmatpush1.bf16.msra.mxu1 %v11245_v9  ;;  %v11287_v9 = vpack.c.bf16 %v9104_v5, %v9102_v4  ;;  %v9125_v4 = vld [vmem:[%s13692_s30 + $0x300] sm:$0xff]  ;;  %v9127_v5 = vld [vmem:[%s13692_s30 + $0x310] sm:$0xff] }
0x15c9   :  { %11248 = vmatprep.subr.bf16.mxu1 %v11247_v10  ;;  %v9101_v10 = vld [vmem:[%s13692_s30 + $0x240] sm:$0xff] }
0x15ca   :  { %9237 = vmatmul.mubr.msk.f32.gmra.mrb[78].mxu0 %vm268_vm1, %v9232_v15  ;;  %v9108_v15 = vld [vmem:[%s13692_s30 + $0x278] sm:$0xff] }
0x15cb   :  { %6377 = vmatprep.mubr.f32.mxu0 %v12065_v54  ;;  %v11291_v21 = vpack.c.bf16 %v9108_v15, %v9106_v14  ;;  %v9134_v14 = vld [vmem:[%s13692_s30 + $0x348] sm:$0xff]  ;;  %v9136_v15 = vld [vmem:[%s13692_s30 + $0x358] sm:$0xff] }
0x15cc   :  { %11250 = vmatpush1.bf16.msra.mxu1 %v11249_v16  ;;  %v11289_v16 = vpack.c.bf16 %v9103_v11, %v9101_v10  ;;  %v9129_v11 = vld [vmem:[%s13692_s30 + $0x320] sm:$0xff] }
0x15cd   :  { %11252 = vmatprep.subr.bf16.mxu1 %v11251_v17 }
0x15ce   :  { %9238 = vmatmul.mubr.msk.f32.gmra.mrb[80].mxu0 %vm268_vm1, %v9233_v25 }
0x15cf   :  { %6383 = vmatprep.mubr.f32.mxu0 %v12065_v54 }
0x15d0   :  { %11254 = vmatpush1.bf16.msra.mxu1 %v11253_v26 }
0x15d1   :  { %11256 = vmatprep.subr.bf16.mxu1 %v11255_v27  ;;  %v9110_v27 = vld [vmem:[%s13692_s30 + $0x288] sm:$0xff] }
0x15d2   :  { %9239 = vmatmul.mubr.msk.f32.gmra.mrb[82].mxu0 %vm268_vm1, %v9234_v33  ;;  %v11295_v33 = vpack.c.bf16 %v9112_v28, %v9110_v27 }
0x15d3   :  { %6389 = vmatprep.mubr.f32.mxu0 %v12065_v54 }
0x15d4   :  { %11258 = vmatpush1.bf16.msra.mxu1 %v11257_v34  ;;  %v9109_v34 = vld [vmem:[%s13692_s30 + $0x280] sm:$0xff] }
0x15d5   :  { %11260 = vmatprep.subr.bf16.mxu1 %v11259_v35  ;;  %v9111_v35 = vld [vmem:[%s13692_s30 + $0x290] sm:$0xff] }
0x15d6   :  { %9240 = vmatmul.mubr.msk.f32.gmra.mrb[84].mxu0 %vm268_vm1, %v9235_v41  ;;  %v11297_v41 = vpack.c.bf16 %v9111_v35, %v9109_v34  ;;  %v9144_v34 = vld [vmem:[%s13692_s30 + $0x398] sm:$0xff] }
0x15d7   :  { %6664 = vmatprep.mubr.f32.mxu0 %v12065_v54 }
0x15d8   :  { %11262 = vmatpush1.bf16.msra.mxu1 %v11261_v32 }
0x15d9   :  { %11264 = vmatprep.subr.bf16.mxu1 %v11263_v42 }
0x15dc   :  { %11266 = vmatpush1.bf16.msra.mxu1 %v11265_v47 }
0x15dd   :  { %11268 = vmatprep.subr.bf16.mxu1 %v11267_v48  ;;  %v9118_v48 = vld [vmem:[%s13692_s30 + $0x2c8] sm:$0xff] }
0x15de   :  { %v11303_v51 = vpack.c.bf16 %v9120_v39, %v9118_v48  ;;  %v9145_v39 = vld [vmem:[%s13692_s30 + $0x3a0] sm:$0xff] }
0x15e0   :  { %11270 = vmatpush1.bf16.msra.mxu1 %v11269_v50 }
0x15e1   :  { %11280 = vmatprep.subr.bf16.mxu1 %v11279_v56  ;;  %v9119_v56 = vld [vmem:[%s13692_s30 + $0x2d0] sm:$0xff] }
0x15e2   :  { %v11305_v59 = vpack.c.bf16 %v9119_v56, %v9117_v52  ;;  %v9150_v52 = vld [vmem:[%s13692_s30 + $0x3c8] sm:$0xff]  ;;  %v9152_v56 = vld [vmem:[%s13692_s30 + $0x3d8] sm:$0xff] }
0x1671   :  { %v5499_v60 = vpop.f32.mrb[40].mxu1  ;;  %v13004_v62 = vpop.f32.mrb[56].mxu0 }
0x1672   :  { %v5501_v63 = vpop.f32.mrb[41].mxu1  ;;  %v13008_v3 = vpop.f32.mrb[57].mxu0 }
0x1673   :  { %5656 = vmatprep.mubr.f32.mxu1 %v5501_v63  ;;  %v9123_v63 = vld [vmem:[%s13692_s30 + $0x2f0] sm:$0xff] }
0x1674   :  { %5657 = vmatmul.mubr.f32.vlgmr.msra.gmra.mrb[50].mxu1 %v5499_v60  ;;  %v11307_v60 = vpack.c.bf16 %v9124_v55, %v9122_v58 }
0x1675   :  { %11282 = vmatpush1.bf16.msra.mxu1 %v11281_v61  ;;  %v5505_v7 = vpop.f32.mrb[42].mxu1  ;;  %v13012_v8 = vpop.f32.mrb[58].mxu0  ;;  %v9121_v61 = vld [vmem:[%s13692_s30 + $0x2e0] sm:$0xff] }
0x1676   :  { %11284 = vmatprep.subr.bf16.mxu1 %v11283_v0  ;;  %v5507_v12 = vpop.f32.mrb[43].mxu1  ;;  %v13016_v13 = vpop.f32.mrb[59].mxu0  ;;  %v9126_v0 = vld [vmem:[%s13692_s30 + $0x308] sm:$0xff]  ;;  %v11309_v2 = vpack.c.bf16 %v9123_v63, %v9121_v61  ;;  %v9151_v61 = vld [vmem:[%s13692_s30 + $0x3d0] sm:$0xff] }
0x1677   :  { %5662 = vmatprep.mubr.f32.mxu1 %v5507_v12  ;;  %v9131_v12 = vld [vmem:[%s13692_s30 + $0x330] sm:$0xff] }
0x1678   :  { %5663 = vmatmul.mubr.f32.gmra.mrb[52].mxu1 %v5505_v7  ;;  %v9132_v7 = vld [vmem:[%s13692_s30 + $0x338] sm:$0xff] }
0x1679   :  { %11286 = vmatpush1.bf16.msra.mxu1 %v11285_v6  ;;  %v5511_v17 = vpop.f32.mrb[44].mxu1  ;;  %v13020_v18 = vpop.f32.mrb[60].mxu0  ;;  %v9130_v6 = vld [vmem:[%s13692_s30 + $0x328] sm:$0xff] }
0x167a   :  { %11288 = vmatprep.subr.bf16.mxu1 %v11287_v9  ;;  %v5513_v25 = vpop.f32.mrb[45].mxu1  ;;  %v13024_v26 = vpop.f32.mrb[61].mxu0  ;;  %v11313_v9 = vpack.c.bf16 %v9127_v5, %v9125_v4  ;;  %v11315_v10 = vpack.c.bf16 %v9132_v7, %v9130_v6  ;;  %v9153_v5 = vld [vmem:[%s13692_s30 + $0x3e0] sm:$0xff]  ;;  %v9155_v6 = vld [vmem:[%s13692_s30 + $0x3f0] sm:$0xff] }
0x167b   :  { %5668 = vmatprep.mubr.f32.mxu1 %v5513_v25  ;;  %v9140_v25 = vld [vmem:[%s13692_s30 + $0x378] sm:$0xff] }
0x167c   :  { %5669 = vmatmul.mubr.f32.gmra.mrb[54].mxu1 %v5511_v17  ;;  %v11319_v17 = vpack.c.bf16 %v9136_v15, %v9134_v14  ;;  %v11323_v28 = vpack.c.bf16 %v9140_v25, %v9138_v24  ;;  %v9167_v15 = vld [vmem:[%s13692_s30 + $0x400] sm:$0xff] }
0x167d   :  { %11290 = vmatpush1.bf16.msra.mxu1 %v11289_v16  ;;  %v5517_v31 = vpop.f32.mrb[46].mxu1  ;;  %v13028_v30 = vpop.f32.mrb[62].mxu0  ;;  %v11317_v16 = vpack.c.bf16 %v9131_v12, %v9129_v11  ;;  %v11341_v11 = vpack.c.bf16 %v9155_v6, %v9153_v5  ;;  %v9187_v5 = vld [vmem:[%s13692_s30 + $0x4a0] sm:$0xff]  ;;  %v9189_v6 = vld [vmem:[%s13692_s30 + $0x4b0] sm:$0xff] }
0x167e   :  { %11292 = vmatprep.subr.bf16.mxu1 %v11291_v21  ;;  %v5519_v36 = vpop.f32.mrb[47].mxu1  ;;  %v13032_v37 = vpop.f32.mrb[63].mxu0  ;;  %v9133_v21 = vld [vmem:[%s13692_s30 + $0x340] sm:$0xff] }
0x167f   :  { %5674 = vmatprep.mubr.f32.mxu1 %v5519_v36  ;;  %v11321_v27 = vpack.c.bf16 %v9135_v23, %v9133_v21  ;;  %v9172_v21 = vld [vmem:[%s13692_s30 + $0x428] sm:$0xff]  ;;  %v9174_v23 = vld [vmem:[%s13692_s30 + $0x438] sm:$0xff] }
0x1680   :  { %5675 = vmatmul.mubr.f32.gmra.mrb[56].mxu1 %v5517_v31  ;;  %v9139_v31 = vld [vmem:[%s13692_s30 + $0x370] sm:$0xff] }
0x1681   :  { %11294 = vmatpush1.bf16.msra.mxu1 %v11293_v29  ;;  %v5523_v32 = vpop.f32.mrb[48].mxu1  ;;  %v13036_v42 = vpop.f32.mrb[64].mxu0  ;;  %v9137_v29 = vld [vmem:[%s13692_s30 + $0x360] sm:$0xff] }
0x1682   :  { %11296 = vmatprep.subr.bf16.mxu1 %v11295_v33  ;;  %v5525_v46 = vpop.f32.mrb[49].mxu1  ;;  %v13040_v47 = vpop.f32.mrb[65].mxu0  ;;  %v9142_v33 = vld [vmem:[%s13692_s30 + $0x388] sm:$0xff]  ;;  %v11325_v35 = vpack.c.bf16 %v9139_v31, %v9137_v29  ;;  %v9173_v29 = vld [vmem:[%s13692_s30 + $0x430] sm:$0xff] }
0x1683   :  { %5680 = vmatprep.mubr.f32.mxu1 %v5525_v46  ;;  %v11327_v38 = vpack.c.bf16 %v9144_v34, %v9142_v33  ;;  %v9176_v31 = vld [vmem:[%s13692_s30 + $0x448] sm:$0xff]  ;;  %v9178_v33 = vld [vmem:[%s13692_s30 + $0x458] sm:$0xff] }
0x1684   :  { %5681 = vmatmul.mubr.f32.gmra.mrb[58].mxu1 %v5523_v32 }
0x1685   :  { %11298 = vmatpush1.bf16.msra.mxu1 %v11297_v41  ;;  %5953 = vmatprep.mubr.f32.mxu1 %v13008_v3  ;;  %v13045_v50 = vpop.f32.mrb[66].mxu0  ;;  %v11311_v3 = vpack.c.bf16 %v9128_v1, %v9126_v0  ;;  %v9143_v41 = vld [vmem:[%s13692_s30 + $0x390] sm:$0xff]  ;;  %v9154_v0 = vld [vmem:[%s13692_s30 + $0x3e8] sm:$0xff]  ;;  %v9156_v1 = vld [vmem:[%s13692_s30 + $0x3f8] sm:$0xff] }
0x1686   :  { %11300 = vmatprep.subr.bf16.mxu1 %v11299_v43  ;;  %v13049_v57 = vpop.f32.mrb[67].mxu0  ;;  %v9146_v43 = vld [vmem:[%s13692_s30 + $0x3a8] sm:$0xff]  ;;  %v11329_v45 = vpack.c.bf16 %v9143_v41, %v9141_v40  ;;  %v11339_v4 = vpack.c.bf16 %v9156_v1, %v9154_v0  ;;  %v11359_v40 = vpack.c.bf16 %v9178_v33, %v9176_v31  ;;  %v9175_v41 = vld [vmem:[%s13692_s30 + $0x440] sm:$0xff]  ;;  %v9190_v1 = vld [vmem:[%s13692_s30 + $0x4b8] sm:$0xff] }
0x1687   :  { %v11331_v48 = vpack.c.bf16 %v9148_v44, %v9146_v43  ;;  %v9177_v43 = vld [vmem:[%s13692_s30 + $0x450] sm:$0xff]  ;;  %v9180_v44 = vld [vmem:[%s13692_s30 + $0x468] sm:$0xff]  ;;  %v9199_v31 = vld [vmem:[%s13692_s30 + $0x500] sm:$0xff] }
0x1688   :  { %v9188_v0 = vld [vmem:[%s13692_s30 + $0x4a8] sm:$0xff]  ;;  %v9201_v33 = vld [vmem:[%s13692_s30 + $0x510] sm:$0xff] }
0x1689   :  { %11302 = vmatpush1.bf16.msra.mxu1 %v11301_v49  ;;  %v13073_v36 = vpop.f32.mrb[68].mxu0  ;;  %v9147_v49 = vld [vmem:[%s13692_s30 + $0x3b0] sm:$0xff] }
0x168a   :  { %11304 = vmatprep.subr.bf16.mxu1 %v11303_v51  ;;  %v13077_v32 = vpop.f32.mrb[69].mxu0  ;;  %v11333_v58 = vpack.c.bf16 %v9147_v49, %v9145_v39  ;;  %v9179_v49 = vld [vmem:[%s13692_s30 + $0x460] sm:$0xff] }
0x168d   :  { %11306 = vmatpush1.bf16.msra.mxu1 %v11305_v59  ;;  %v13081_v46 = vpop.f32.mrb[70].mxu0  ;;  %v11335_v59 = vpack.c.bf16 %v9152_v56, %v9150_v52  ;;  %v9181_v52 = vld [vmem:[%s13692_s30 + $0x470] sm:$0xff]  ;;  %v9184_v56 = vld [vmem:[%s13692_s30 + $0x488] sm:$0xff] }
0x168e   :  { %11308 = vmatprep.subr.bf16.mxu1 %v11307_v60  ;;  %v13085_v51 = vpop.f32.mrb[71].mxu0  ;;  %v9149_v60 = vld [vmem:[%s13692_s30 + $0x3c0] sm:$0xff] }
0x1691   :  { %11310 = vmatpush1.bf16.msra.mxu1 %v11309_v2  ;;  %v13089_v55 = vpop.f32.mrb[72].mxu0  ;;  %v11337_v2 = vpack.c.bf16 %v9151_v61, %v9149_v60  ;;  %v9183_v60 = vld [vmem:[%s13692_s30 + $0x480] sm:$0xff]  ;;  %v9185_v61 = vld [vmem:[%s13692_s30 + $0x490] sm:$0xff] }
0x1692   :  { %11312 = vmatprep.subr.bf16.mxu1 %v11311_v3  ;;  %v13093_v63 = vpop.f32.mrb[73].mxu0 }
0x1695   :  { %11314 = vmatpush1.bf16.msra.mxu1 %v11313_v9  ;;  %v13097_v3 = vpop.f32.mrb[74].mxu0  ;;  %v9168_v9 = vld [vmem:[%s13692_s30 + $0x408] sm:$0xff] }
0x1696   :  { %11316 = vmatprep.subr.bf16.mxu1 %v11315_v10  ;;  %v13101_v7 = vpop.f32.mrb[75].mxu0  ;;  %v9170_v10 = vld [vmem:[%s13692_s30 + $0x418] sm:$0xff] }
0x1697   :  { %v11351_v14 = vpack.c.bf16 %v9170_v10, %v9168_v9  ;;  %v9192_v9 = vld [vmem:[%s13692_s30 + $0x4c8] sm:$0xff]  ;;  %v9194_v10 = vld [vmem:[%s13692_s30 + $0x4d8] sm:$0xff] }
0x1699   :  { %11318 = vmatpush1.bf16.msra.mxu1 %v11317_v16  ;;  %v13105_v12 = vpop.f32.mrb[76].mxu0  ;;  %v9169_v16 = vld [vmem:[%s13692_s30 + $0x410] sm:$0xff] }
0x169a   :  { %11320 = vmatprep.subr.bf16.mxu1 %v11319_v17  ;;  %v13109_v17 = vpop.f32.mrb[77].mxu0  ;;  %v11353_v24 = vpack.c.bf16 %v9169_v16, %v9167_v15  ;;  %v9196_v15 = vld [vmem:[%s13692_s30 + $0x4e8] sm:$0xff]  ;;  %v9198_v16 = vld [vmem:[%s13692_s30 + $0x4f8] sm:$0xff] }
0x169d   :  { %11322 = vmatpush1.bf16.msra.mxu1 %v11321_v27  ;;  %v13113_v25 = vpop.f32.mrb[78].mxu0  ;;  %v11355_v27 = vpack.c.bf16 %v9174_v23, %v9172_v21  ;;  %v9195_v23 = vld [vmem:[%s13692_s30 + $0x4e0] sm:$0xff] }
0x169e   :  { %11324 = vmatprep.subr.bf16.mxu1 %v11323_v28  ;;  %v9171_v28 = vld [vmem:[%s13692_s30 + $0x420] sm:$0xff]  ;;  %v13120_v34 = vpop.f32.mrb[79].mxu0 }
0x16a1   :  { %11326 = vmatpush1.bf16.msra.mxu1 %v11325_v35  ;;  %v11357_v35 = vpack.c.bf16 %v9173_v29, %v9171_v28 }
0x16a2   :  { %11328 = vmatprep.subr.bf16.mxu1 %v11327_v38  ;;  %v13123_v38 = vpop.f32.mrb[80].mxu0 }
0x16a5   :  { %11330 = vmatpush1.bf16.msra.mxu1 %v11329_v45  ;;  %v9182_v45 = vld [vmem:[%s13692_s30 + $0x478] sm:$0xff] }
0x16a6   :  { %11332 = vmatprep.subr.bf16.mxu1 %v11331_v48  ;;  %v11361_v48 = vpack.c.bf16 %v9177_v43, %v9175_v41  ;;  %v11363_v39 = vpack.c.bf16 %v9182_v45, %v9180_v44  ;;  %v11385_v41 = vpack.c.bf16 %v9201_v33, %v9199_v31  ;;  %v9203_v44 = vld [vmem:[%s13692_s30 + $0x520] sm:$0xff]  ;;  %v9205_v45 = vld [vmem:[%s13692_s30 + $0x530] sm:$0xff] }
0x16a9   :  { %11334 = vmatpush1.bf16.msra.mxu1 %v11333_v58  ;;  %v9186_v58 = vld [vmem:[%s13692_s30 + $0x498] sm:$0xff] }
0x16aa   :  { %11336 = vmatprep.subr.bf16.mxu1 %v11335_v59  ;;  %v11365_v59 = vpack.c.bf16 %v9181_v52, %v9179_v49  ;;  %v11389_v49 = vpack.c.bf16 %v9205_v45, %v9203_v44 }
0x16ad   :  { %11338 = vmatpush1.bf16.msra.mxu1 %v11337_v2 }
0x16ae   :  { %11340 = vmatprep.subr.bf16.mxu1 %v11339_v4  ;;  %v11371_v4 = vpack.c.bf16 %v9190_v1, %v9188_v0  ;;  %v9211_v0 = vld [vmem:[%s13692_s30 + $0x560] sm:$0xff]  ;;  %v9213_v1 = vld [vmem:[%s13692_s30 + $0x570] sm:$0xff] }
0x16b1   :  { %11342 = vmatpush1.bf16.msra.mxu1 %v11341_v11  ;;  %v9191_v11 = vld [vmem:[%s13692_s30 + $0x4c0] sm:$0xff] }
0x16b2   :  { %11352 = vmatprep.subr.bf16.mxu1 %v11351_v14  ;;  %v9193_v14 = vld [vmem:[%s13692_s30 + $0x4d0] sm:$0xff] }
0x16b3   :  { %v11377_v21 = vpack.c.bf16 %v9193_v14, %v9191_v11 }
0x16b4   :  { %5954 = vmatmul.mubr.f32.vlgmr.msra.gmra.mrb[50].mxu1 %v13004_v62  ;;  %v13130_v62 = vpop.f32.mrb[81].mxu0 }
0x16b5   :  { %11354 = vmatpush1.bf16.msra.mxu1 %v11353_v24  ;;  %5959 = vmatprep.mubr.f32.mxu1 %v13016_v13  ;;  %v13133_v13 = vpop.f32.mrb[82].mxu0  ;;  %v9197_v24 = vld [vmem:[%s13692_s30 + $0x4f0] sm:$0xff] }
0x16b6   :  { %11356 = vmatprep.subr.bf16.mxu1 %v11355_v27  ;;  %v9200_v27 = vld [vmem:[%s13692_s30 + $0x508] sm:$0xff]  ;;  %v11381_v28 = vpack.c.bf16 %v9197_v24, %v9195_v23 }
0x16b8   :  { %5960 = vmatmul.mubr.f32.gmra.mrb[52].mxu1 %v13012_v8  ;;  %v13140_v8 = vpop.f32.mrb[83].mxu0 }
0x16b9   :  { %11358 = vmatpush1.bf16.msra.mxu1 %v11357_v35  ;;  %5965 = vmatprep.mubr.f32.mxu1 %v13024_v26  ;;  %v11367_v26 = vpack.c.bf16 %v9186_v58, %v9184_v56  ;;  %v13148_v2 = vpop.f32.mrb[84].mxu0  ;;  %v9204_v35 = vld [vmem:[%s13692_s30 + $0x528] sm:$0xff]  ;;  %v9207_v56 = vld [vmem:[%s13692_s30 + $0x540] sm:$0xff]  ;;  %v9209_v58 = vld [vmem:[%s13692_s30 + $0x550] sm:$0xff] }
0x16ba   :  { %11360 = vmatprep.subr.bf16.mxu1 %v11359_v40  ;;  %v9206_v40 = vld [vmem:[%s13692_s30 + $0x538] sm:$0xff] }
0x16bb   :  { %v11387_v43 = vpack.c.bf16 %v9206_v40, %v9204_v35  ;;  %v9227_v35 = vld [vmem:[%s13692_s30 + $0x5e0] sm:$0xff]  ;;  %v9229_v40 = vld [vmem:[%s13692_s30 + $0x5f0] sm:$0xff] }
0x16bc   :  { %5966 = vmatmul.mubr.f32.gmra.mrb[54].mxu1 %v13020_v18  ;;  %v11369_v18 = vpack.c.bf16 %v9185_v61, %v9183_v60  ;;  %v11393_v60 = vpack.c.bf16 %v9209_v58, %v9207_v56  ;;  %v11413_v44 = vpack.c.bf16 %v9229_v40, %v9227_v35  ;;  %v9271_v35 = vld [vmem:[%s13692_s30 + $0x6f0] sm:$0xff]  ;;  %v9274_v40 = vld [vmem:[%s13692_s30 + $0x708] sm:$0xff] }
0x16bd   :  { %11362 = vmatpush1.bf16.msra.mxu1 %v11361_v48  ;;  %5971 = vmatprep.mubr.f32.mxu1 %v13032_v37  ;;  %v13151_v37 = vpop.f32.mrb[85].mxu0  ;;  %v9208_v48 = vld [vmem:[%s13692_s30 + $0x548] sm:$0xff] }
0x16be   :  { %11364 = vmatprep.subr.bf16.mxu1 %v11363_v39  ;;  %v9210_v39 = vld [vmem:[%s13692_s30 + $0x558] sm:$0xff] }
0x16bf   :  { %v11391_v52 = vpack.c.bf16 %v9210_v39, %v9208_v48  ;;  %v9241_v48 = vld [vmem:[%s13692_s30 + $0x600] sm:$0xff]  ;;  %v9243_v39 = vld [vmem:[%s13692_s30 + $0x610] sm:$0xff] }
0x16c0   :  { %5972 = vmatmul.mubr.f32.gmra.mrb[56].mxu1 %v13028_v30  ;;  %v11373_v30 = vpack.c.bf16 %v9189_v6, %v9187_v5  ;;  %v11397_v5 = vpack.c.bf16 %v9213_v1, %v9211_v0  ;;  %v11425_v56 = vpack.c.bf16 %v9243_v39, %v9241_v48  ;;  %v9278_v48 = vld [vmem:[%s13692_s30 + $0x728] sm:$0xff]  ;;  %v9280_v39 = vld [vmem:[%s13692_s30 + $0x738] sm:$0xff] }
0x16c1   :  { %11366 = vmatpush1.bf16.msra.mxu1 %v11365_v59  ;;  %5977 = vmatprep.mubr.f32.mxu1 %v13040_v47  ;;  %v11375_v47 = vpack.c.bf16 %v9194_v10, %v9192_v9  ;;  %v9212_v59 = vld [vmem:[%s13692_s30 + $0x568] sm:$0xff]  ;;  %v9215_v9 = vld [vmem:[%s13692_s30 + $0x580] sm:$0xff]  ;;  %v9217_v10 = vld [vmem:[%s13692_s30 + $0x590] sm:$0xff] }
0x16c2   :  { %11368 = vmatprep.subr.bf16.mxu1 %v11367_v26  ;;  %v9214_v26 = vld [vmem:[%s13692_s30 + $0x578] sm:$0xff]  ;;  %v11401_v11 = vpack.c.bf16 %v9217_v10, %v9215_v9  ;;  %v9255_v10 = vld [vmem:[%s13692_s30 + $0x670] sm:$0xff] }
0x16c3   :  { %v11395_v61 = vpack.c.bf16 %v9214_v26, %v9212_v59  ;;  %v9245_v59 = vld [vmem:[%s13692_s30 + $0x620] sm:$0xff]  ;;  %v9247_v26 = vld [vmem:[%s13692_s30 + $0x630] sm:$0xff] }
0x16c4   :  { %5978 = vmatmul.mubr.f32.gmra.mrb[58].mxu1 %v13036_v42  ;;  %v11379_v42 = vpack.c.bf16 %v9198_v16, %v9196_v15  ;;  %v9219_v15 = vld [vmem:[%s13692_s30 + $0x5a0] sm:$0xff]  ;;  %v9221_v16 = vld [vmem:[%s13692_s30 + $0x5b0] sm:$0xff]  ;;  %v11429_v0 = vpack.c.bf16 %v9247_v26, %v9245_v59  ;;  %v9282_v59 = vld [vmem:[%s13692_s30 + $0x748] sm:$0xff] }
0x16c5   :  { %11370 = vmatpush1.bf16.msra.mxu1 %v11369_v18  ;;  %6239 = vmatprep.mubr.f32.mxu1 %v13049_v57  ;;  %v9202_v57 = vld [vmem:[%s13692_s30 + $0x518] sm:$0xff]  ;;  %v9216_v18 = vld [vmem:[%s13692_s30 + $0x588] sm:$0xff]  ;;  %v11405_v23 = vpack.c.bf16 %v9221_v16, %v9219_v15 }
0x16c6   :  { %11372 = vmatprep.subr.bf16.mxu1 %v11371_v4  ;;  %v11383_v29 = vpack.c.bf16 %v9202_v57, %v9200_v27  ;;  %v9218_v4 = vld [vmem:[%s13692_s30 + $0x598] sm:$0xff]  ;;  %v9223_v27 = vld [vmem:[%s13692_s30 + $0x5c0] sm:$0xff]  ;;  %v9225_v57 = vld [vmem:[%s13692_s30 + $0x5d0] sm:$0xff] }
0x16c7   :  { %v11399_v6 = vpack.c.bf16 %v9218_v4, %v9216_v18  ;;  %v11409_v31 = vpack.c.bf16 %v9225_v57, %v9223_v27  ;;  %v9249_v18 = vld [vmem:[%s13692_s30 + $0x640] sm:$0xff]  ;;  %v9251_v4 = vld [vmem:[%s13692_s30 + $0x650] sm:$0xff]  ;;  %v9262_v15 = vld [vmem:[%s13692_s30 + $0x6a8] sm:$0xff] }
0x16c8   :  { %v9264_v16 = vld [vmem:[%s13692_s30 + $0x6b8] sm:$0xff]  ;;  %v9267_v57 = vld [vmem:[%s13692_s30 + $0x6d0] sm:$0xff] }
0x16c9   :  { %11374 = vmatpush1.bf16.msra.mxu1 %v11373_v30  ;;  %v9220_v30 = vld [vmem:[%s13692_s30 + $0x5a8] sm:$0xff]  ;;  %v9284_v26 = vld [vmem:[%s13692_s30 + $0x758] sm:$0xff] }
0x16ca   :  { %11376 = vmatprep.subr.bf16.mxu1 %v11375_v47  ;;  %v9222_v47 = vld [vmem:[%s13692_s30 + $0x5b8] sm:$0xff] }
0x16cb   :  { %v11403_v14 = vpack.c.bf16 %v9222_v47, %v9220_v30  ;;  %v9258_v30 = vld [vmem:[%s13692_s30 + $0x688] sm:$0xff]  ;;  %v9260_v47 = vld [vmem:[%s13692_s30 + $0x698] sm:$0xff] }
0x16cd   :  { %11378 = vmatpush1.bf16.msra.mxu1 %v11377_v21  ;;  %v9224_v21 = vld [vmem:[%s13692_s30 + $0x5c8] sm:$0xff] }
0x16ce   :  { %11380 = vmatprep.subr.bf16.mxu1 %v11379_v42  ;;  %v9226_v42 = vld [vmem:[%s13692_s30 + $0x5d8] sm:$0xff] }
0x16cf   :  { %v11407_v24 = vpack.c.bf16 %v9226_v42, %v9224_v21  ;;  %v11443_v21 = vpack.c.bf16 %v9264_v16, %v9262_v15  ;;  %v9263_v42 = vld [vmem:[%s13692_s30 + $0x6b0] sm:$0xff] }
0x16d1   :  { %11382 = vmatpush1.bf16.msra.mxu1 %v11381_v28  ;;  %v9228_v28 = vld [vmem:[%s13692_s30 + $0x5e8] sm:$0xff] }
0x16d2   :  { %11384 = vmatprep.subr.bf16.mxu1 %v11383_v29  ;;  %v9230_v29 = vld [vmem:[%s13692_s30 + $0x5f8] sm:$0xff] }
0x16d3   :  { %v11411_v33 = vpack.c.bf16 %v9230_v29, %v9228_v28  ;;  %v9270_v28 = vld [vmem:[%s13692_s30 + $0x6e8] sm:$0xff]  ;;  %v9272_v29 = vld [vmem:[%s13692_s30 + $0x6f8] sm:$0xff] }
0x16d5   :  { %11386 = vmatpush1.bf16.msra.mxu1 %v11385_v41  ;;  %v9242_v41 = vld [vmem:[%s13692_s30 + $0x608] sm:$0xff] }
0x16d6   :  { %11388 = vmatprep.subr.bf16.mxu1 %v11387_v43  ;;  %v9244_v43 = vld [vmem:[%s13692_s30 + $0x618] sm:$0xff] }
0x16d7   :  { %v11423_v45 = vpack.c.bf16 %v9244_v43, %v9242_v41 }
0x16d9   :  { %11390 = vmatpush1.bf16.msra.mxu1 %v11389_v49  ;;  %v9246_v49 = vld [vmem:[%s13692_s30 + $0x628] sm:$0xff] }
0x16da   :  { %11392 = vmatprep.subr.bf16.mxu1 %v11391_v52  ;;  %v9248_v52 = vld [vmem:[%s13692_s30 + $0x638] sm:$0xff] }
0x16db   :  { %v11427_v58 = vpack.c.bf16 %v9248_v52, %v9246_v49  ;;  %v11459_v52 = vpack.c.bf16 %v9280_v39, %v9278_v48 }
0x16dd   :  { %11394 = vmatpush1.bf16.msra.mxu1 %v11393_v60  ;;  %v9250_v60 = vld [vmem:[%s13692_s30 + $0x648] sm:$0xff] }
0x16de   :  { %11396 = vmatprep.subr.bf16.mxu1 %v11395_v61  ;;  %v9252_v61 = vld [vmem:[%s13692_s30 + $0x658] sm:$0xff] }
0x16df   :  { %v11431_v1 = vpack.c.bf16 %v9252_v61, %v9250_v60  ;;  %v11463_v61 = vpack.c.bf16 %v9284_v26, %v9282_v59 }
0x16e1   :  { %11398 = vmatpush1.bf16.msra.mxu1 %v11397_v5  ;;  %v9254_v5 = vld [vmem:[%s13692_s30 + $0x668] sm:$0xff] }
0x16e2   :  { %11400 = vmatprep.subr.bf16.mxu1 %v11399_v6  ;;  %v9256_v6 = vld [vmem:[%s13692_s30 + $0x678] sm:$0xff] }
0x16e3   :  { %v11435_v9 = vpack.c.bf16 %v9256_v6, %v9254_v5 }
0x16e5   :  { %11402 = vmatpush1.bf16.msra.mxu1 %v11401_v11  ;;  %v11439_v11 = vpack.c.bf16 %v9260_v47, %v9258_v30 }
0x16e6   :  { %11404 = vmatprep.subr.bf16.mxu1 %v11403_v14  ;;  %v9259_v14 = vld [vmem:[%s13692_s30 + $0x690] sm:$0xff] }
0x16e9   :  { %11406 = vmatpush1.bf16.msra.mxu1 %v11405_v23  ;;  %v9266_v23 = vld [vmem:[%s13692_s30 + $0x6c8] sm:$0xff] }
0x16ea   :  { %11408 = vmatprep.subr.bf16.mxu1 %v11407_v24  ;;  %v9268_v24 = vld [vmem:[%s13692_s30 + $0x6d8] sm:$0xff] }
0x16eb   :  { %v11447_v27 = vpack.c.bf16 %v9268_v24, %v9266_v23 }
0x16ed   :  { %11410 = vmatpush1.bf16.msra.mxu1 %v11409_v31 }
0x16ee   :  { %11412 = vmatprep.subr.bf16.mxu1 %v11411_v33  ;;  %v9269_v33 = vld [vmem:[%s13692_s30 + $0x6e0] sm:$0xff] }
0x16ef   :  { %v11453_v41 = vpack.c.bf16 %v9271_v35, %v9269_v33  ;;  %v5412_v35 = vld [vmem:[%s13694_s7] sm:$0x3] }
0x16f1   :  { %11414 = vmatpush1.bf16.msra.mxu1 %v11413_v44  ;;  %v9273_v44 = vld [vmem:[%s13692_s30 + $0x700] sm:$0xff] }
0x16f2   :  { %11424 = vmatprep.subr.bf16.mxu1 %v11423_v45  ;;  %v9275_v45 = vld [vmem:[%s13692_s30 + $0x710] sm:$0xff] }
0x16f3   :  { %v11457_v49 = vpack.c.bf16 %v9275_v45, %v9273_v44 }
0x16f4   :  { %6240 = vmatmul.mubr.f32.vlgmr.msra.gmra.mrb[50].mxu1 %v13045_v50  ;;  %v11433_v50 = vpack.c.bf16 %v9251_v4, %v9249_v18  ;;  %v9286_v18 = vld [vmem:[%s13692_s30 + $0x768] sm:$0xff]  ;;  %v9288_v4 = vld [vmem:[%s13692_s30 + $0x778] sm:$0xff] }
0x16f5   :  { %11426 = vmatpush1.bf16.msra.mxu1 %v11425_v56  ;;  %6245 = vmatprep.mubr.f32.mxu1 %v13077_v32  ;;  %v9253_v32 = vld [vmem:[%s13692_s30 + $0x660] sm:$0xff]  ;;  %v11467_v6 = vpack.c.bf16 %v9288_v4, %v9286_v18 }
0x16f6   :  { %11428 = vmatprep.subr.bf16.mxu1 %v11427_v58  ;;  %v9277_v56 = vld [vmem:[%s13692_s30 + $0x720] sm:$0xff]  ;;  %v9279_v58 = vld [vmem:[%s13692_s30 + $0x730] sm:$0xff] }
0x16f7   :  { %v11461_v60 = vpack.c.bf16 %v9279_v58, %v9277_v56 }
0x16f8   :  { %6246 = vmatmul.mubr.f32.gmra.mrb[52].mxu1 %v13073_v36  ;;  %v11437_v36 = vpack.c.bf16 %v9255_v10, %v9253_v32  ;;  %v9290_v32 = vld [vmem:[%s13692_s30 + $0x788] sm:$0xff]  ;;  %v9292_v10 = vld [vmem:[%s13692_s30 + $0x798] sm:$0xff] }
0x16f9   :  { %11430 = vmatpush1.bf16.msra.mxu1 %v11429_v0  ;;  %6251 = vmatprep.mubr.f32.mxu1 %v13085_v51  ;;  %v9257_v51 = vld [vmem:[%s13692_s30 + $0x680] sm:$0xff]  ;;  %v11471_v47 = vpack.c.bf16 %v9292_v10, %v9290_v32  ;;  %v6690_v32 = vld [vmem:[%s13695_s10 + $0x8] sm:$0xff] }
0x16fa   :  { %11432 = vmatprep.subr.bf16.mxu1 %v11431_v1  ;;  %v9281_v0 = vld [vmem:[%s13692_s30 + $0x740] sm:$0xff]  ;;  %v9283_v1 = vld [vmem:[%s13692_s30 + $0x750] sm:$0xff] }
0x16fb   :  { %v11465_v5 = vpack.c.bf16 %v9283_v1, %v9281_v0 }
0x16fc   :  { %6252 = vmatmul.mubr.f32.gmra.mrb[54].mxu1 %v13081_v46  ;;  %v11441_v46 = vpack.c.bf16 %v9259_v14, %v9257_v51  ;;  %v9294_v51 = vld [vmem:[%s13692_s30 + $0x7a8] sm:$0xff]  ;;  %v9296_v14 = vld [vmem:[%s13692_s30 + $0x7b8] sm:$0xff] }
0x16fd   :  { %11434 = vmatpush1.bf16.msra.mxu1 %v11433_v50  ;;  %6257 = vmatprep.mubr.f32.mxu1 %v13093_v63  ;;  %v9261_v63 = vld [vmem:[%s13692_s30 + $0x6a0] sm:$0xff]  ;;  %v11475_v16 = vpack.c.bf16 %v9296_v14, %v9294_v51  ;;  %v6578_v51 = vld [vmem:[%s13696_s11 + $0x8] sm:$0xff] }
0x16fe   :  { %11436 = vmatprep.subr.bf16.mxu1 %v11435_v9  ;;  %v9285_v50 = vld [vmem:[%s13692_s30 + $0x760] sm:$0xff]  ;;  %v9287_v9 = vld [vmem:[%s13692_s30 + $0x770] sm:$0xff] }
0x16ff   :  { %v11469_v30 = vpack.c.bf16 %v9287_v9, %v9285_v50  ;;  %v6689_v9 = vld [vmem:[%s13695_s10] sm:$0xff] }
0x1700   :  { %6258 = vmatmul.mubr.f32.gmra.mrb[56].mxu1 %v13089_v55  ;;  %v11445_v55 = vpack.c.bf16 %v9263_v42, %v9261_v63  ;;  %v9298_v63 = vld [vmem:[%s13692_s30 + $0x7c8] sm:$0xff]  ;;  %v9300_v42 = vld [vmem:[%s13692_s30 + $0x7d8] sm:$0xff] }
0x1701   :  { %11438 = vmatpush1.bf16.msra.mxu1 %v11437_v36  ;;  %6263 = vmatprep.mubr.f32.mxu1 %v13101_v7  ;;  %v9265_v7 = vld [vmem:[%s13692_s30 + $0x6c0] sm:$0xff]  ;;  %v11479_v24 = vpack.c.bf16 %v9300_v42, %v9298_v63  ;;  %v6695_v63 = vld [vmem:[%s13695_s10 + $0x30] sm:$0xff]  ;;  %v6696_v42 = vld [vmem:[%s13695_s10 + $0x38] sm:$0xff] }
0x1702   :  { %11440 = vmatprep.subr.bf16.mxu1 %v11439_v11  ;;  %v11449_v31 = vpack.c.bf16 %v9267_v57, %v9265_v7  ;;  %v9289_v36 = vld [vmem:[%s13692_s30 + $0x780] sm:$0xff]  ;;  %v9291_v11 = vld [vmem:[%s13692_s30 + $0x790] sm:$0xff]  ;;  %v9302_v7 = vld [vmem:[%s13692_s30 + $0x7e8] sm:$0xff] }
0x1703   :  { %v11473_v15 = vpack.c.bf16 %v9291_v11, %v9289_v36  ;;  %v9304_v57 = vld [vmem:[%s13692_s30 + $0x7f8] sm:$0xff]  ;;  %v6691_v36 = vld [vmem:[%s13695_s10 + $0x10] sm:$0xff] }
0x1704   :  { %6264 = vmatmul.mubr.f32.gmra.mrb[58].mxu1 %v13097_v3  ;;  %v11451_v3 = vpack.c.bf16 %v9272_v29, %v9270_v28  ;;  %v11483_v29 = vpack.c.bf16 %v9304_v57, %v9302_v7  ;;  %v6692_v11 = vld [vmem:[%s13695_s10 + $0x18] sm:$0xff]  ;;  %v6699_v57 = vld [vmem:[%s13695_s10 + $0x50] sm:$0xff] }
0x1705   :  { %11442 = vmatpush1.bf16.msra.mxu1 %v11441_v46  ;;  %6525 = vmatprep.mubr.f32.mxu1 %v13109_v17  ;;  %v9276_v17 = vld [vmem:[%s13692_s30 + $0x718] sm:$0xff]  ;;  %v9293_v46 = vld [vmem:[%s13692_s30 + $0x7a0] sm:$0xff]  ;;  %v11499_v14 = vpack.c.bf16 %v6692_v11, %v6691_v36  ;;  %v9339_v36 = vld [vmem:[%s13695_s10 + $0xf0] sm:$0xff] }
0x1706   :  { %11444 = vmatprep.subr.bf16.mxu1 %v11443_v21  ;;  %v11455_v43 = vpack.c.bf16 %v9276_v17, %v9274_v40  ;;  %v9295_v21 = vld [vmem:[%s13692_s30 + $0x7b0] sm:$0xff] }
0x1707   :  { %v11477_v23 = vpack.c.bf16 %v9295_v21, %v9293_v46  ;;  %v6579_v46 = vld [vmem:[%s13696_s11 + $0x10] sm:$0xff] }
0x1709   :  { %11446 = vmatpush1.bf16.msra.mxu1 %v11445_v55  ;;  %v9297_v55 = vld [vmem:[%s13692_s30 + $0x7c0] sm:$0xff] }
0x170a   :  { %11448 = vmatprep.subr.bf16.mxu1 %v11447_v27  ;;  %v9299_v27 = vld [vmem:[%s13692_s30 + $0x7d0] sm:$0xff] }
0x170b   :  { %v11481_v28 = vpack.c.bf16 %v9299_v27, %v9297_v55  ;;  %v6697_v55 = vld [vmem:[%s13695_s10 + $0x40] sm:$0xff]  ;;  %v6698_v27 = vld [vmem:[%s13695_s10 + $0x48] sm:$0xff] }
0x170c   :  { %v11508_v7 = vpack.c.bf16 %v6698_v27, %v6697_v55 }
0x170d   :  { %11450 = vmatpush1.bf16.msra.mxu1 %v11449_v31  ;;  %v9301_v31 = vld [vmem:[%s13692_s30 + $0x7e0] sm:$0xff] }
0x170e   :  { %11452 = vmatprep.subr.bf16.mxu1 %v11451_v3  ;;  %v9303_v3 = vld [vmem:[%s13692_s30 + $0x7f0] sm:$0xff] }
0x170f   :  { %v11485_v33 = vpack.c.bf16 %v9303_v3, %v9301_v31  ;;  %v6701_v31 = vld [vmem:[%s13695_s10 + $0x60] sm:$0xff]  ;;  %v6702_v3 = vld [vmem:[%s13695_s10 + $0x68] sm:$0xff] }
0x1711   :  { %11454 = vmatpush1.bf16.msra.mxu1 %v11453_v41 }
0x1712   :  { %11456 = vmatprep.subr.bf16.mxu1 %v11455_v43 }
0x1715   :  { %11458 = vmatpush1.bf16.msra.mxu1 %v11457_v49 }
0x1716   :  { %11460 = vmatprep.subr.bf16.mxu1 %v11459_v52 }
0x1719   :  { %11462 = vmatpush1.bf16.msra.mxu1 %v11461_v60 }
0x171a   :  { %11464 = vmatprep.subr.bf16.mxu1 %v11463_v61 }
0x171d   :  { %11466 = vmatpush1.bf16.msra.mxu1 %v11465_v5 }
0x171e   :  { %11468 = vmatprep.subr.bf16.mxu1 %v11467_v6 }
0x1721   :  { %11470 = vmatpush1.bf16.msra.mxu1 %v11469_v30  ;;  %v6577_v30 = vld [vmem:[%s13696_s11] sm:$0xff] }
0x1722   :  { %11472 = vmatprep.subr.bf16.mxu1 %v11471_v47  ;;  %v11496_v47 = vpack.c.bf16 %v6690_v32, %v6689_v9  ;;  %v9336_v9 = vld [vmem:[%s13695_s10 + $0xd8] sm:$0xff]  ;;  %v9337_v32 = vld [vmem:[%s13695_s10 + $0xe0] sm:$0xff] }
0x1725   :  { %11474 = vmatpush1.bf16.msra.mxu1 %v11473_v15  ;;  %v6693_v15 = vld [vmem:[%s13695_s10 + $0x20] sm:$0xff] }
0x1726   :  { %11476 = vmatprep.subr.bf16.mxu1 %v11475_v16  ;;  %v6694_v16 = vld [vmem:[%s13695_s10 + $0x28] sm:$0xff] }
0x1727   :  { %v11502_v21 = vpack.c.bf16 %v6694_v16, %v6693_v15  ;;  %v9342_v16 = vld [vmem:[%s13695_s10 + $0x108] sm:$0xff] }
0x1729   :  { %11478 = vmatpush1.bf16.msra.mxu1 %v11477_v23  ;;  %v6580_v23 = vld [vmem:[%s13696_s11 + $0x18] sm:$0xff] }
0x172a   :  { %11480 = vmatprep.subr.bf16.mxu1 %v11479_v24  ;;  %v11505_v24 = vpack.c.bf16 %v6696_v42, %v6695_v63 }
0x172d   :  { %11482 = vmatpush1.bf16.msra.mxu1 %v11481_v28  ;;  %v6700_v28 = vld [vmem:[%s13695_s10 + $0x58] sm:$0xff] }
0x172e   :  { %11484 = vmatprep.subr.bf16.mxu1 %v11483_v29  ;;  %v11511_v29 = vpack.c.bf16 %v6700_v28, %v6699_v57  ;;  %v9358_v57 = vld [vmem:[%s13695_s10 + $0x118] sm:$0xff]  ;;  %v9347_v28 = vld [vmem:[%s13696_s11 + $0x40] sm:$0xff] }
0x1731   :  { %11486 = vmatpush1.bf16.msra.mxu1 %v11485_v33  ;;  %v11514_v33 = vpack.c.bf16 %v6702_v3, %v6701_v31  ;;  %v9359_v31 = vld [vmem:[%s13695_s10 + $0x120] sm:$0xff]  ;;  %v9360_v3 = vld [vmem:[%s13695_s10 + $0x128] sm:$0xff] }
0x1734   :  { %6526 = vmatmul.mubr.f32.vlgmr.msra.gmra.mrb[50].mxu1 %v13105_v12  ;;  %v5695_v12 = vrot.slane %v5412_v35, %v4750_v22 }
0x1735   :  { %6531 = vmatprep.mubr.f32.mxu1 %v13120_v34  ;;  %v5691_v34 = vrot.slane %v5412_v35, %v4746_v20  ;;  %v6703_v35 = vld [vmem:[%s13695_s10 + $0x70] sm:$0xff] }
0x1738   :  { %6532 = vmatmul.mubr.f32.gmra.mrb[52].mxu1 %v13113_v25 }
0x1739   :  { %6537 = vmatprep.mubr.f32.mxu1 %v13130_v62 }
0x173c   :  { %6538 = vmatmul.mubr.f32.gmra.mrb[54].mxu1 %v13123_v38 }
0x173d   :  { %6543 = vmatprep.mubr.f32.mxu1 %v13140_v8 }
0x1740   :  { %6544 = vmatmul.mubr.f32.gmra.mrb[56].mxu1 %v13133_v13 }
0x1741   :  { %6549 = vmatprep.mubr.f32.mxu1 %v13151_v37 }
0x1744   :  { %6550 = vmatmul.mubr.f32.gmra.mrb[58].mxu1 %v13148_v2 }
0x1807   :  { %v6527_v25 = vpop.f32.mrb[50].mxu1 }
0x1808   :  { %v6529_v40 = vpop.f32.mrb[51].mxu1  ;;  %v11730_v17 = vadd.f32 %v6527_v25, %v5691_v34  ;;  %v6705_v25 = vld [vmem:[%s13695_s10 + $0x80] sm:$0xff] }
0x1809   :  { %v11731_v62 = vadd.f32 %v6529_v40, %v5695_v12 }
0x180a   :  { %v6566_v13 = vmax.f32 %v11730_v17, 0.0 }
0x180b   :  { %v6533_v38 = vpop.f32.mrb[52].mxu1  ;;  %v6567_v37 = vmax.f32 %v11731_v62, 0.0 }
0x180c   :  { %v11732_v41 = vadd.f32 %v6533_v38, %v5691_v34  ;;  %v6535_v8 = vpop.f32.mrb[53].mxu1 }
0x180d   :  { %v11733_v43 = vadd.f32 %v6535_v8, %v5695_v12 }
0x180e   :  { %v6568_v44 = vmax.f32 %v11732_v41, 0.0 }
0x180f   :  { %v6569_v45 = vmax.f32 %v11733_v43, 0.0  ;;  %v6539_v2 = vpop.f32.mrb[54].mxu1 }
0x1810   :  { %v13285_v48 = vpack.c.bf16 %v6568_v44, %v6566_v13  ;;  %v6541_v39 = vpop.f32.mrb[55].mxu1  ;;  %v11734_v20 = vadd.f32 %v6539_v2, %v5691_v34  ;;  %v9326_v44 = vld [vmem:[%s13695_s10 + $0x88] sm:$0xff] }
0x1811   :  { %v13287_v22 = vpack.c.bf16 %v6569_v45, %v6567_v37  ;;  %v11735_v19 = vadd.f32 %v6541_v39, %v5695_v12  ;;  %v9327_v37 = vld [vmem:[%s13695_s10 + $0x90] sm:$0xff]  ;;  %v9316_v45 = vld [vmem:[%s13696_s11 + $0x20] sm:$0xff]  ;;  %v9328_v39 = vld [vmem:[%s13695_s10 + $0x98] sm:$0xff] }
0x1812   :  { %v6570_v59 = vmax.f32 %v11734_v20, 0.0  ;;  %v11528_v2 = vpack.c.bf16 %v9327_v37, %v9326_v44  ;;  %v9317_v20 = vld [vmem:[%s13696_s11 + $0x28] sm:$0xff]  ;;  %v9367_v44 = vld [vmem:[%s13695_s10 + $0x160] sm:$0xff] }
0x1813   :  { %v6545_v49 = vpop.f32.mrb[56].mxu1  ;;  %11488 = vmatprep.subr.bf16.mxu0 %v13287_v22  ;;  %v6571_v60 = vmax.f32 %v11735_v19, 0.0  ;;  %v9329_v19 = vld [vmem:[%s13695_s10 + $0xa0] sm:$0xff]  ;;  %v9368_v37 = vld [vmem:[%s13695_s10 + $0x168] sm:$0xff] }
0x1814   :  { %v11736_v52 = vadd.f32 %v6545_v49, %v5691_v34  ;;  %v6547_v56 = vpop.f32.mrb[57].mxu1  ;;  %11490 = vmatpush1.bf16.msra.mxu0 %v13285_v48  ;;  %v11531_v49 = vpack.c.bf16 %v9329_v19, %v9328_v39  ;;  %v9370_v39 = vld [vmem:[%s13695_s10 + $0x178] sm:$0xff] }
0x1815   :  { %v11737_v58 = vadd.f32 %v6547_v56, %v5695_v12  ;;  %v9331_v56 = vld [vmem:[%s13695_s10 + $0xb0] sm:$0xff] }
0x1816   :  { %v6572_v26 = vmax.f32 %v11736_v52, 0.0  ;;  %v9330_v52 = vld [vmem:[%s13695_s10 + $0xa8] sm:$0xff] }
0x1817   :  { %v6573_v61 = vmax.f32 %v11737_v58, 0.0  ;;  %v6551_v0 = vpop.f32.mrb[58].mxu1  ;;  %v9318_v58 = vld [vmem:[%s13696_s11 + $0x30] sm:$0xff] }
0x1818   :  { %v13291_v1 = vpack.c.bf16 %v6572_v26, %v6570_v59  ;;  %v6553_v18 = vpop.f32.mrb[59].mxu1  ;;  %v11738_v6 = vadd.f32 %v6551_v0, %v5691_v34  ;;  %v11534_v59 = vpack.c.bf16 %v9331_v56, %v9330_v52  ;;  %v9332_v26 = vld [vmem:[%s13695_s10 + $0xb8] sm:$0xff]  ;;  %v9373_v56 = vld [vmem:[%s13695_s10 + $0x190] sm:$0xff] }
0x1819   :  { %v13293_v4 = vpack.c.bf16 %v6573_v61, %v6571_v60  ;;  %v11739_v5 = vadd.f32 %v6553_v18, %v5695_v12  ;;  %v6704_v12 = vld [vmem:[%s13695_s10 + $0x78] sm:$0xff]  ;;  %v9333_v60 = vld [vmem:[%s13695_s10 + $0xc0] sm:$0xff]  ;;  %v9334_v18 = vld [vmem:[%s13695_s10 + $0xc8] sm:$0xff] }
0x181a   :  { %v13303_v10 = vmax.f32 %v11738_v6, 0.0  ;;  %v11517_v34 = vpack.c.bf16 %v6704_v12, %v6703_v35  ;;  %v9319_v61 = vld [vmem:[%s13696_s11 + $0x38] sm:$0xff]  ;;  %v11537_v0 = vpack.c.bf16 %v9333_v60, %v9332_v26  ;;  %v11563_v35 = vpack.c.bf16 %v9360_v3, %v9359_v31  ;;  %v9361_v12 = vld [vmem:[%s13695_s10 + $0x130] sm:$0xff] }
0x181b   :  { %v13295_v50 = vmax.f32 %v11739_v5, 0.0  ;;  %11492 = vmatprep.subr.bf16.mxu0 %v13293_v4  ;;  %v9335_v5 = vld [vmem:[%s13695_s10 + $0xd0] sm:$0xff] }
0x181c   :  { %11494 = vmatpush1.bf16.msra.mxu0 %v13291_v1  ;;  %v11540_v6 = vpack.c.bf16 %v9335_v5, %v9334_v18  ;;  %v9390_v5 = vld [vmem:[%s13695_s10 + $0x1a8] sm:$0xff] }
0x181d   :  { %9305 = vmatprep.subr.msk.mxu0 %vm3033_vm8, %v13295_v50 }
0x1820   :  { %9306 = vmatpush1.msk.msra.mxu0 %vm3033_vm8, %v13303_v10 }
0x1821   :  { %9307 = vmatmul.mubr.msk.f32.vlgmr.msra.gmra.mrb[86].mxu0 %vm6581_vm12, %v6577_v30  ;;  %11495 = vmatprep.subr.bf16.mxu0 %v12063_v53  ;;  %v11543_v30 = vpack.c.bf16 %v9337_v32, %v9336_v9  ;;  %v9392_v32 = vld [vmem:[%s13695_s10 + $0x1b8] sm:$0xff] }
0x1822   :  { %11497 = vmatpush1.bf16.msra.mxu0 %v11496_v47  ;;  %6670 = vmatprep.mubr.f32.mxu0 %v12065_v54  ;;  %v9338_v47 = vld [vmem:[%s13695_s10 + $0xe8] sm:$0xff] }
0x1823   :  { %11498 = vmatprep.subr.bf16.mxu0 %v12063_v53  ;;  %v11546_v11 = vpack.c.bf16 %v9339_v36, %v9338_v47  ;;  %v9380_v47 = vld [vmem:[%s13696_s11 + $0x70] sm:$0xff] }
0x1825   :  { %9308 = vmatmul.mubr.msk.f32.gmra.mrb[88].mxu0 %vm6581_vm12, %v6578_v51  ;;  %v9340_v51 = vld [vmem:[%s13695_s10 + $0xf8] sm:$0xff] }
0x1826   :  { %11500 = vmatpush1.bf16.msra.mxu0 %v11499_v14  ;;  %6676 = vmatprep.mubr.f32.mxu0 %v12065_v54  ;;  %v9341_v14 = vld [vmem:[%s13695_s10 + $0x100] sm:$0xff] }
0x1827   :  { %11501 = vmatprep.subr.bf16.mxu0 %v12063_v53  ;;  %v11549_v15 = vpack.c.bf16 %v9341_v14, %v9340_v51  ;;  %v9395_v51 = vld [vmem:[%s13695_s10 + $0x1d0] sm:$0xff]  ;;  %v9381_v14 = vld [vmem:[%s13696_s11 + $0x78] sm:$0xff] }
0x1829   :  { %9309 = vmatmul.mubr.msk.f32.gmra.mrb[90].mxu0 %vm6581_vm12, %v6579_v46 }
0x182a   :  { %11503 = vmatpush1.bf16.msra.mxu0 %v11502_v21  ;;  %6682 = vmatprep.mubr.f32.mxu0 %v12065_v54 }
0x182b   :  { %11504 = vmatprep.subr.bf16.mxu0 %v12063_v53 }
0x182d   :  { %9310 = vmatmul.mubr.msk.f32.gmra.mrb[92].mxu0 %vm6581_vm12, %v6580_v23 }
0x182e   :  { %11506 = vmatpush1.bf16.msra.mxu0 %v11505_v24 }
0x182f   :  { %11507 = vmatprep.subr.bf16.mxu0 %v12063_v53 }
0x1832   :  { %11509 = vmatpush1.bf16.msra.mxu0 %v11508_v7  ;;  %v9357_v7 = vld [vmem:[%s13695_s10 + $0x110] sm:$0xff] }
0x1833   :  { %11510 = vmatprep.subr.bf16.mxu0 %v12063_v53 }
0x1836   :  { %11512 = vmatpush1.bf16.msra.mxu0 %v11511_v29  ;;  %v11560_v29 = vpack.c.bf16 %v9358_v57, %v9357_v7  ;;  %v9402_v7 = vld [vmem:[%s13695_s10 + $0x208] sm:$0xff]  ;;  %v9403_v57 = vld [vmem:[%s13695_s10 + $0x210] sm:$0xff] }
0x1837   :  { %11513 = vmatprep.subr.bf16.mxu0 %v12063_v53 }
0x183a   :  { %11515 = vmatpush1.bf16.msra.mxu0 %v11514_v33  ;;  %v9348_v33 = vld [vmem:[%s13696_s11 + $0x48] sm:$0xff] }
0x183b   :  { %11516 = vmatprep.subr.bf16.mxu0 %v12063_v53 }
0x183e   :  { %11518 = vmatpush1.bf16.msra.mxu0 %v11517_v34  ;;  %v9362_v34 = vld [vmem:[%s13695_s10 + $0x138] sm:$0xff] }
0x183f   :  { %6750 = vmatprep.subr.mxu0 %v12065_v54 }
0x1842   :  { %6751 = vmatpush1.msra.mxu0 %v6705_v25  ;;  %v9349_v25 = vld [vmem:[%s13696_s11 + $0x50] sm:$0xff] }
0x1843   :  { %11520 = vmatprep.subr.bf16.mxu0 %v13287_v22 }
0x18f4   :  { %v6666_v40 = vpop.f32.mrb[86].mxu0 }
0x18f5   :  { %v6668_v62 = vpop.f32.mrb[87].mxu0 }
0x18f6   :  { %9311 = vmatprep.mubr.msk.f32.mxu0 %vm1814_vm4, %v6668_v62  ;;  %v9363_v62 = vld [vmem:[%s13695_s10 + $0x140] sm:$0xff] }
0x18f7   :  { %6783 = vmatmul.mubr.f32.vlgmr.msra.gmra.mrb[94].mxu0 %v6666_v40  ;;  %v11566_v40 = vpack.c.bf16 %v9362_v34, %v9361_v12 }
0x18f8   :  { %11522 = vmatpush1.bf16.msra.mxu0 %v13285_v48  ;;  %v6672_v17 = vpop.f32.mrb[88].mxu0 }
0x18f9   :  { %11524 = vmatprep.subr.bf16.mxu0 %v13293_v4  ;;  %v6674_v38 = vpop.f32.mrb[89].mxu0 }
0x18fa   :  { %9312 = vmatprep.mubr.msk.f32.mxu0 %vm1814_vm4, %v6674_v38  ;;  %v9350_v38 = vld [vmem:[%s13696_s11 + $0x58] sm:$0xff] }
0x18fb   :  { %6788 = vmatmul.mubr.f32.gmra.mrb[96].mxu0 %v6672_v17  ;;  %v9364_v17 = vld [vmem:[%s13695_s10 + $0x148] sm:$0xff] }
0x18fc   :  { %11526 = vmatpush1.bf16.msra.mxu0 %v13291_v1  ;;  %v6678_v41 = vpop.f32.mrb[90].mxu0 }
0x18fd   :  { %9320 = vmatprep.subr.msk.mxu0 %vm3033_vm8, %v13295_v50  ;;  %v6680_v8 = vpop.f32.mrb[91].mxu0 }
0x18fe   :  { %9313 = vmatprep.mubr.msk.f32.mxu0 %vm1814_vm4, %v6680_v8  ;;  %v9365_v8 = vld [vmem:[%s13695_s10 + $0x150] sm:$0xff] }
0x18ff   :  { %6793 = vmatmul.mubr.f32.gmra.mrb[98].mxu0 %v6678_v41  ;;  %v11569_v41 = vpack.c.bf16 %v9364_v17, %v9363_v62  ;;  %v7631_v62 = vld [vmem:[%s13698_s16 + $0x8] sm:$0xff]  ;;  %v7632_v17 = vld [vmem:[%s13698_s16 + $0x10] sm:$0xff] }
0x1900   :  { %9321 = vmatpush1.msk.msra.mxu0 %vm3033_vm8, %v13303_v10  ;;  %v6684_v43 = vpop.f32.mrb[92].mxu0 }
0x1901   :  { %v6686_v13 = vpop.f32.mrb[93].mxu0  ;;  %11527 = vmatprep.subr.bf16.mxu0 %v12063_v53 }
0x1902   :  { %9314 = vmatprep.mubr.msk.f32.mxu0 %vm1814_vm4, %v6686_v13 }
0x1903   :  { %6798 = vmatmul.mubr.f32.gmra.mrb[100].mxu0 %v6684_v43  ;;  %v9366_v43 = vld [vmem:[%s13695_s10 + $0x158] sm:$0xff] }
0x1904   :  { %6894 = vmatprep.mubr.f32.mxu0 %v12065_v54  ;;  %v11572_v13 = vpack.c.bf16 %v9366_v43, %v9365_v8  ;;  %v7634_v43 = vld [vmem:[%s13698_s16 + $0x20] sm:$0xff] }
0x1907   :  { %9322 = vmatmul.mubr.msk.f32.vlgmr.msra.gmra.mrb[102].mxu0 %vm6581_vm12, %v9316_v45  ;;  %v11575_v45 = vpack.c.bf16 %v9368_v37, %v9367_v44  ;;  %v7636_v37 = vld [vmem:[%s13698_s16 + $0x30] sm:$0xff] }
0x1908   :  { %11529 = vmatpush1.bf16.msra.mxu0 %v11528_v2  ;;  %6900 = vmatprep.mubr.f32.mxu0 %v12065_v54  ;;  %v9369_v2 = vld [vmem:[%s13695_s10 + $0x170] sm:$0xff] }
0x1909   :  { %11530 = vmatprep.subr.bf16.mxu0 %v12063_v53  ;;  %v11578_v19 = vpack.c.bf16 %v9370_v39, %v9369_v2  ;;  %v9315_v39 = vld [vmem:[%s13699_s18] ss:$0 sm:$0xff] }
0x190b   :  { %9323 = vmatmul.mubr.msk.f32.gmra.mrb[104].mxu0 %vm6581_vm12, %v9317_v20  ;;  %v9371_v20 = vld [vmem:[%s13695_s10 + $0x180] sm:$0xff] }
0x190c   :  { %11532 = vmatpush1.bf16.msra.mxu0 %v11531_v49  ;;  %6906 = vmatprep.mubr.f32.mxu0 %v12065_v54  ;;  %v9372_v49 = vld [vmem:[%s13695_s10 + $0x188] sm:$0xff] }
0x190d   :  { %11533 = vmatprep.subr.bf16.mxu0 %v12063_v53  ;;  %v11581_v52 = vpack.c.bf16 %v9372_v49, %v9371_v20 }
0x190f   :  { %9324 = vmatmul.mubr.msk.f32.gmra.mrb[106].mxu0 %vm6581_vm12, %v9318_v58 }
0x1910   :  { %11535 = vmatpush1.bf16.msra.mxu0 %v11534_v59  ;;  %6912 = vmatprep.mubr.f32.mxu0 %v12065_v54 }
0x1911   :  { %11536 = vmatprep.subr.bf16.mxu0 %v12063_v53 }
0x1913   :  { %9325 = vmatmul.mubr.msk.f32.gmra.mrb[108].mxu0 %vm6581_vm12, %v9319_v61 }
0x1914   :  { %11538 = vmatpush1.bf16.msra.mxu0 %v11537_v0  ;;  %v9389_v0 = vld [vmem:[%s13695_s10 + $0x1a0] sm:$0xff] }
0x1915   :  { %11539 = vmatprep.subr.bf16.mxu0 %v12063_v53 }
0x1918   :  { %11541 = vmatpush1.bf16.msra.mxu0 %v11540_v6  ;;  %v9391_v6 = vld [vmem:[%s13695_s10 + $0x1b0] sm:$0xff] }
0x1919   :  { %11542 = vmatprep.subr.bf16.mxu0 %v12063_v53  ;;  %v11595_v9 = vpack.c.bf16 %v9391_v6, %v9390_v5  ;;  %v7494_v6 = vld [vmem:[%s13697_s15 + $0x8] sm:$0xff] }
0x191c   :  { %11544 = vmatpush1.bf16.msra.mxu0 %v11543_v30  ;;  %v9393_v30 = vld [vmem:[%s13695_s10 + $0x1c0] sm:$0xff] }
0x191d   :  { %11545 = vmatprep.subr.bf16.mxu0 %v12063_v53  ;;  %v11598_v36 = vpack.c.bf16 %v9393_v30, %v9392_v32  ;;  %v7497_v32 = vld [vmem:[%s13697_s15 + $0x20] sm:$0xff]  ;;  %v7498_v30 = vld [vmem:[%s13697_s15 + $0x28] sm:$0xff] }
0x1920   :  { %11547 = vmatpush1.bf16.msra.mxu0 %v11546_v11  ;;  %v9394_v11 = vld [vmem:[%s13695_s10 + $0x1c8] sm:$0xff] }
0x1921   :  { %11548 = vmatprep.subr.bf16.mxu0 %v12063_v53 }
0x1924   :  { %11550 = vmatpush1.bf16.msra.mxu0 %v11549_v15  ;;  %v11601_v15 = vpack.c.bf16 %v9395_v51, %v9394_v11  ;;  %v9426_v11 = vld [vmem:[%s13697_s15 + $0x40] sm:$0xff]  ;;  %v9427_v51 = vld [vmem:[%s13697_s15 + $0x48] sm:$0xff] }
0x1925   :  { %6981 = vmatprep.subr.mxu0 %v12065_v54 }
0x1928   :  { %6982 = vmatpush1.msra.mxu0 %v9342_v16  ;;  %v9396_v16 = vld [vmem:[%s13695_s10 + $0x1d8] sm:$0xff] }
0x1929   :  { %11552 = vmatprep.subr.bf16.mxu0 %v13287_v22 }
0x19da   :  { %v6896_v46 = vpop.f32.mrb[102].mxu0 }
0x19db   :  { %v6898_v21 = vpop.f32.mrb[103].mxu0 }
0x19dc   :  { %9343 = vmatprep.mubr.msk.f32.mxu0 %vm1814_vm4, %v6898_v21 }
0x19dd   :  { %7014 = vmatmul.mubr.f32.vlgmr.msra.gmra.mrb[94].mxu0 %v6896_v46  ;;  %v9397_v46 = vld [vmem:[%s13695_s10 + $0x1e0] sm:$0xff] }
0x19de   :  { %11554 = vmatpush1.bf16.msra.mxu0 %v13285_v48  ;;  %v6902_v63 = vpop.f32.mrb[104].mxu0  ;;  %v11604_v21 = vpack.c.bf16 %v9397_v46, %v9396_v16  ;;  %v9430_v16 = vld [vmem:[%s13697_s15 + $0x60] sm:$0xff]  ;;  %v9431_v46 = vld [vmem:[%s13697_s15 + $0x68] sm:$0xff] }
0x19df   :  { %11556 = vmatprep.subr.bf16.mxu0 %v13293_v4  ;;  %v6904_v42 = vpop.f32.mrb[105].mxu0 }
0x19e0   :  { %9344 = vmatprep.mubr.msk.f32.mxu0 %vm1814_vm4, %v6904_v42  ;;  %v9399_v42 = vld [vmem:[%s13695_s10 + $0x1f0] sm:$0xff] }
0x19e1   :  { %7019 = vmatmul.mubr.f32.gmra.mrb[96].mxu0 %v6902_v63  ;;  %v9398_v63 = vld [vmem:[%s13695_s10 + $0x1e8] sm:$0xff] }
0x19e2   :  { %11558 = vmatpush1.bf16.msra.mxu0 %v13291_v1  ;;  %v6908_v23 = vpop.f32.mrb[106].mxu0 }
0x19e3   :  { %9351 = vmatprep.subr.msk.mxu0 %vm3033_vm8, %v13295_v50  ;;  %v6910_v24 = vpop.f32.mrb[107].mxu0 }
0x19e4   :  { %9345 = vmatprep.mubr.msk.f32.mxu0 %vm1814_vm4, %v6910_v24  ;;  %v9400_v24 = vld [vmem:[%s13695_s10 + $0x1f8] sm:$0xff] }
0x19e5   :  { %7024 = vmatmul.mubr.f32.gmra.mrb[98].mxu0 %v6908_v23  ;;  %v11607_v23 = vpack.c.bf16 %v9399_v42, %v9398_v63  ;;  %v9433_v63 = vld [vmem:[%s13697_s15 + $0x78] sm:$0xff]  ;;  %v9458_v42 = vld [vmem:[%s13697_s15 + $0x80] sm:$0xff] }
0x19e6   :  { %9352 = vmatpush1.msk.msra.mxu0 %vm3033_vm8, %v13303_v10  ;;  %v6914_v55 = vpop.f32.mrb[108].mxu0 }
0x19e7   :  { %v6916_v27 = vpop.f32.mrb[109].mxu0  ;;  %11559 = vmatprep.subr.bf16.mxu0 %v12063_v53 }
0x19e8   :  { %9346 = vmatprep.mubr.msk.f32.mxu0 %vm1814_vm4, %v6916_v27 }
0x19e9   :  { %7029 = vmatmul.mubr.f32.gmra.mrb[100].mxu0 %v6914_v55  ;;  %v9401_v55 = vld [vmem:[%s13695_s10 + $0x200] sm:$0xff] }
0x19ea   :  { %7119 = vmatprep.mubr.f32.mxu0 %v12065_v54  ;;  %v11610_v27 = vpack.c.bf16 %v9401_v55, %v9400_v24  ;;  %v9460_v24 = vld [vmem:[%s13697_s15 + $0x90] sm:$0xff]  ;;  %v9461_v55 = vld [vmem:[%s13697_s15 + $0x98] sm:$0xff] }
0x19ed   :  { %9353 = vmatmul.mubr.msk.f32.vlgmr.msra.gmra.mrb[110].mxu0 %vm6581_vm12, %v9347_v28  ;;  %v11613_v28 = vpack.c.bf16 %v9403_v57, %v9402_v7  ;;  %v9463_v7 = vld [vmem:[%s13697_s15 + $0xa8] sm:$0xff]  ;;  %v9464_v57 = vld [vmem:[%s13697_s15 + $0xb0] sm:$0xff] }
0x19ee   :  { %11561 = vmatpush1.bf16.msra.mxu0 %v11560_v29  ;;  %7125 = vmatprep.mubr.f32.mxu0 %v12065_v54  ;;  %v9404_v29 = vld [vmem:[%s13695_s10 + $0x218] sm:$0xff] }
0x19ef   :  { %11562 = vmatprep.subr.bf16.mxu0 %v12063_v53 }
0x19f1   :  { %9354 = vmatmul.mubr.msk.f32.gmra.mrb[112].mxu0 %vm6581_vm12, %v9348_v33 }
0x19f2   :  { %11564 = vmatpush1.bf16.msra.mxu0 %v11563_v35  ;;  %7131 = vmatprep.mubr.f32.mxu0 %v12065_v54 }
0x19f3   :  { %11565 = vmatprep.subr.bf16.mxu0 %v12063_v53 }
0x19f5   :  { %9355 = vmatmul.mubr.msk.f32.gmra.mrb[114].mxu0 %vm6581_vm12, %v9349_v25  ;;  %v7493_v25 = vld [vmem:[%s13697_s15] sm:$0xff] }
0x19f6   :  { %11567 = vmatpush1.bf16.msra.mxu0 %v11566_v40  ;;  %7137 = vmatprep.mubr.f32.mxu0 %v12065_v54  ;;  %v7630_v40 = vld [vmem:[%s13698_s16] sm:$0xff] }
0x19f7   :  { %11568 = vmatprep.subr.bf16.mxu0 %v12063_v53  ;;  %10639 = vmatprep.mubr.msk.f32.mxu1 %vm268_vm1, %v7493_v25  ;;  %v9443_v25 = vld [vmem:[%s13698_s16 + $0x48] sm:$0xff] }
0x19f9   :  { %9356 = vmatmul.mubr.msk.f32.gmra.mrb[116].mxu0 %vm6581_vm12, %v9350_v38  ;;  %v11623_v38 = vpack.c.bf16 %v7631_v62, %v7630_v40  ;;  %v9444_v62 = vld [vmem:[%s13698_s16 + $0x50] sm:$0xff] }
0x19fa   :  { %11570 = vmatpush1.bf16.msra.mxu0 %v11569_v41  ;;  %v7633_v41 = vld [vmem:[%s13698_s16 + $0x18] sm:$0xff] }
0x19fb   :  { %11571 = vmatprep.subr.bf16.mxu0 %v12063_v53  ;;  %v11627_v8 = vpack.c.bf16 %v7633_v41, %v7632_v17  ;;  %v9445_v17 = vld [vmem:[%s13698_s16 + $0x58] sm:$0xff] }
0x19fe   :  { %11573 = vmatpush1.bf16.msra.mxu0 %v11572_v13  ;;  %v7635_v13 = vld [vmem:[%s13698_s16 + $0x28] sm:$0xff] }
0x19ff   :  { %11574 = vmatprep.subr.bf16.mxu0 %v12063_v53  ;;  %v11631_v44 = vpack.c.bf16 %v7635_v13, %v7634_v43  ;;  %v9446_v43 = vld [vmem:[%s13698_s16 + $0x60] sm:$0xff]  ;;  %v9447_v13 = vld [vmem:[%s13698_s16 + $0x68] sm:$0xff] }
0x1a02   :  { %11576 = vmatpush1.bf16.msra.mxu0 %v11575_v45  ;;  %v7637_v45 = vld [vmem:[%s13698_s16 + $0x38] sm:$0xff] }
0x1a03   :  { %11577 = vmatprep.subr.bf16.mxu0 %v12063_v53  ;;  %v11635_v2 = vpack.c.bf16 %v7637_v45, %v7636_v37  ;;  %v11655_v45 = vpack.c.bf16 %v9447_v13, %v9446_v43 }
0x1a06   :  { %11579 = vmatpush1.bf16.msra.mxu0 %v11578_v19 }
0x1a07   :  { %11580 = vmatprep.subr.bf16.mxu0 %v12063_v53 }
0x1a0a   :  { %11582 = vmatpush1.bf16.msra.mxu0 %v11581_v52 }
0x1a0b   :  { %7206 = vmatprep.subr.mxu0 %v12065_v54 }
0x1a0e   :  { %7207 = vmatpush1.msra.mxu0 %v9373_v56 }
0x1a0f   :  { %11584 = vmatprep.subr.bf16.mxu0 %v13287_v22 }
0x1ac0   :  { %v7121_v58 = vpop.f32.mrb[110].mxu0 }
0x1ac1   :  { %v7123_v59 = vpop.f32.mrb[111].mxu0 }
0x1ac2   :  { %9374 = vmatprep.mubr.msk.f32.mxu0 %vm1814_vm4, %v7123_v59 }
0x1ac3   :  { %7239 = vmatmul.mubr.f32.vlgmr.msra.gmra.mrb[94].mxu0 %v7121_v58 }
0x1ac4   :  { %11586 = vmatpush1.bf16.msra.mxu0 %v13285_v48  ;;  %v7127_v26 = vpop.f32.mrb[112].mxu0 }
0x1ac5   :  { %11588 = vmatprep.subr.bf16.mxu0 %v13293_v4  ;;  %v7129_v60 = vpop.f32.mrb[113].mxu0 }
0x1ac6   :  { %9375 = vmatprep.mubr.msk.f32.mxu0 %vm1814_vm4, %v7129_v60 }
0x1ac7   :  { %7244 = vmatmul.mubr.f32.gmra.mrb[96].mxu0 %v7127_v26 }
0x1ac8   :  { %11590 = vmatpush1.bf16.msra.mxu0 %v13291_v1  ;;  %v7133_v22 = vpop.f32.mrb[114].mxu0  ;;  %v9388_v1 = vld [vmem:[%s13695_s10 + $0x198] sm:$0xff] }
0x1ac9   :  { %9382 = vmatprep.subr.msk.mxu0 %vm3033_vm8, %v13295_v50  ;;  %v7135_v61 = vpop.f32.mrb[115].mxu0  ;;  %v9378_v50 = vld [vmem:[%s13696_s11 + $0x60] sm:$0xff]  ;;  %v11592_v18 = vpack.c.bf16 %v9389_v0, %v9388_v1 }
0x1aca   :  { %9376 = vmatprep.mubr.msk.f32.mxu0 %vm1814_vm4, %v7135_v61 }
0x1acb   :  { %7249 = vmatmul.mubr.f32.gmra.mrb[98].mxu0 %v7133_v22 }
0x1acc   :  { %9383 = vmatpush1.msk.msra.mxu0 %vm3033_vm8, %v13303_v10  ;;  %v7139_v48 = vpop.f32.mrb[116].mxu0  ;;  %v9379_v10 = vld [vmem:[%s13696_s11 + $0x68] sm:$0xff] }
0x1acd   :  { %v7141_v4 = vpop.f32.mrb[117].mxu0  ;;  %11591 = vmatprep.subr.bf16.mxu0 %v12063_v53 }
0x1ace   :  { %9377 = vmatprep.mubr.msk.f32.mxu0 %vm1814_vm4, %v7141_v4 }
0x1acf   :  { %7254 = vmatmul.mubr.f32.gmra.mrb[100].mxu0 %v7139_v48 }
0x1ad0   :  { %7344 = vmatprep.mubr.f32.mxu0 %v12065_v54 }
0x1ad3   :  { %9384 = vmatmul.mubr.msk.f32.vlgmr.msra.gmra.mrb[118].mxu0 %vm6581_vm12, %v9378_v50 }
0x1ad4   :  { %7350 = vmatprep.mubr.f32.mxu0 %v12065_v54  ;;  %11593 = vmatpush1.bf16.msra.mxu0 %v11592_v18 }
0x1ad5   :  { %11594 = vmatprep.subr.bf16.mxu0 %v12063_v53 }
0x1ad7   :  { %9385 = vmatmul.mubr.msk.f32.gmra.mrb[120].mxu0 %vm6581_vm12, %v9379_v10  ;;  %v7495_v10 = vld [vmem:[%s13697_s15 + $0x10] sm:$0xff] }
0x1ad8   :  { %7356 = vmatprep.mubr.f32.mxu0 %v12065_v54  ;;  %11596 = vmatpush1.bf16.msra.mxu0 %v11595_v9  ;;  %v7496_v9 = vld [vmem:[%s13697_s15 + $0x18] sm:$0xff] }
0x1ad9   :  { %11597 = vmatprep.subr.bf16.mxu0 %v12063_v53 }
0x1adb   :  { %9386 = vmatmul.mubr.msk.f32.gmra.mrb[122].mxu0 %vm6581_vm12, %v9380_v47  ;;  %v7499_v47 = vld [vmem:[%s13697_s15 + $0x30] sm:$0xff] }
0x1adc   :  { %7362 = vmatprep.mubr.f32.mxu0 %v12065_v54  ;;  %11599 = vmatpush1.bf16.msra.mxu0 %v11598_v36  ;;  %v7500_v36 = vld [vmem:[%s13697_s15 + $0x38] sm:$0xff] }
0x1add   :  { %11600 = vmatprep.subr.bf16.mxu0 %v12063_v53 }
0x1adf   :  { %9387 = vmatmul.mubr.msk.f32.gmra.mrb[124].mxu0 %vm6581_vm12, %v9381_v14  ;;  %v9428_v14 = vld [vmem:[%s13697_s15 + $0x50] sm:$0xff] }
0x1ae0   :  { %11602 = vmatpush1.bf16.msra.mxu0 %v11601_v15  ;;  %v9429_v15 = vld [vmem:[%s13697_s15 + $0x58] sm:$0xff] }
0x1ae1   :  { %11603 = vmatprep.subr.bf16.mxu0 %v12063_v53 }
0x1ae4   :  { %11605 = vmatpush1.bf16.msra.mxu0 %v11604_v21  ;;  %v9432_v21 = vld [vmem:[%s13697_s15 + $0x70] sm:$0xff] }
0x1ae5   :  { %11606 = vmatprep.subr.bf16.mxu0 %v12063_v53 }
0x1ae8   :  { %11608 = vmatpush1.bf16.msra.mxu0 %v11607_v23  ;;  %v9459_v23 = vld [vmem:[%s13697_s15 + $0x88] sm:$0xff] }
0x1ae9   :  { %11609 = vmatprep.subr.bf16.mxu0 %v12063_v53 }
0x1aec   :  { %11611 = vmatpush1.bf16.msra.mxu0 %v11610_v27  ;;  %v9462_v27 = vld [vmem:[%s13697_s15 + $0xa0] sm:$0xff] }
0x1aed   :  { %11612 = vmatprep.subr.bf16.mxu0 %v12063_v53 }
0x1af0   :  { %11614 = vmatpush1.bf16.msra.mxu0 %v11613_v28  ;;  %v9465_v28 = vld [vmem:[%s13697_s15 + $0xb8] sm:$0xff] }
0x1af1   :  { %7431 = vmatprep.subr.mxu0 %v12065_v54 }
0x1af4   :  { %7432 = vmatpush1.msra.mxu0 %v9404_v29  ;;  %v9490_v29 = vld [vmem:[%s13697_s15 + $0xc0] sm:$0xff] }
0x1af5   :  { %11624 = vmatprep.subr.bf16.mxu0 %v11623_v38 }
0x1ba6   :  { %v7346_v31 = vpop.f32.mrb[118].mxu0 }
0x1ba7   :  { %v7348_v3 = vpop.f32.mrb[119].mxu0 }
0x1ba8   :  { %9405 = vmatprep.mubr.msk.f32.mxu0 %vm1814_vm4, %v7348_v3  ;;  %v9492_v3 = vld [vmem:[%s13697_s15 + $0xd0] sm:$0xff] }
0x1ba9   :  { %7464 = vmatmul.mubr.f32.vlgmr.msra.gmra.mrb[94].mxu0 %v7346_v31  ;;  %v9491_v31 = vld [vmem:[%s13697_s15 + $0xc8] sm:$0xff] }
0x1baa   :  { %v7352_v33 = vpop.f32.mrb[120].mxu0  ;;  %11626 = vmatpush3.bf16.msra.mxu0 %v11623_v38 }
0x1bab   :  { %v7354_v35 = vpop.f32.mrb[121].mxu0  ;;  %11628 = vmatprep.subr.bf16.mxu0 %v11627_v8 }
0x1bac   :  { %9406 = vmatprep.mubr.msk.f32.mxu0 %vm1814_vm4, %v7354_v35  ;;  %v9494_v35 = vld [vmem:[%s13697_s15 + $0xe0] sm:$0xff] }
0x1bad   :  { %7469 = vmatmul.mubr.f32.gmra.mrb[96].mxu0 %v7352_v33  ;;  %v9493_v33 = vld [vmem:[%s13697_s15 + $0xd8] sm:$0xff] }
0x1bae   :  { %v7358_v53 = vpop.f32.mrb[122].mxu0  ;;  %11630 = vmatpush3.bf16.msra.mxu0 %v11627_v8  ;;  %v11651_v8 = vpack.c.bf16 %v9445_v17, %v9444_v62 }
0x1baf   :  { %v7360_v54 = vpop.f32.mrb[123].mxu0  ;;  %11632 = vmatprep.subr.bf16.mxu0 %v11631_v44 }
0x1bb0   :  { %9407 = vmatprep.mubr.msk.f32.mxu0 %vm1814_vm4, %v7360_v54  ;;  %v9496_v54 = vld [vmem:[%s13697_s15 + $0xf0] sm:$0xff] }
0x1bb1   :  { %7474 = vmatmul.mubr.f32.gmra.mrb[98].mxu0 %v7358_v53  ;;  %v9495_v53 = vld [vmem:[%s13697_s15 + $0xe8] sm:$0xff] }
0x1bb2   :  { %v7364_v12 = vpop.f32.mrb[124].mxu0  ;;  %11634 = vmatpush3.bf16.msra.mxu0 %v11631_v44 }
0x1bb3   :  { %v7366_v34 = vpop.f32.mrb[125].mxu0  ;;  %11636 = vmatprep.subr.bf16.mxu0 %v11635_v2 }
0x1bb4   :  { %9408 = vmatprep.mubr.msk.f32.mxu0 %vm1814_vm4, %v7366_v34  ;;  %v9442_v34 = vld [vmem:[%s13698_s16 + $0x40] sm:$0xff] }
0x1bb5   :  { %7479 = vmatmul.mubr.f32.gmra.mrb[100].mxu0 %v7364_v12  ;;  %v9497_v12 = vld [vmem:[%s13697_s15 + $0xf8] sm:$0xff]  ;;  %v11647_v40 = vpack.c.bf16 %v9443_v25, %v9442_v34 }
0x1bb6   :  { %11638 = vmatpush3.bf16.msra.mxu0 %v11635_v2  ;;  %v9448_v2 = vld [vmem:[%s13698_s16 + $0x70] sm:$0xff] }
0x1bb7   :  { %11648 = vmatprep.subr.bf16.mxu0 %v11647_v40 }
0x1c7c   :  { %v7465_v19 = vpop.f32.mrb[94].mxu0 }
0x1c7d   :  { %v7467_v20 = vpop.f32.mrb[95].mxu0  ;;  %v11740_v49 = vadd.f32 %v9315_v39, %v7465_v19 }
0x1c7f   :  { %v7488_v59 = vmax.f32 %v11740_v49, 0.0 }
0x1c80   :  { %v7470_v52 = vpop.f32.mrb[96].mxu0 }
0x1c81   :  { %v11741_v56 = vadd.f32 %v9315_v39, %v7470_v52  ;;  %v7472_v58 = vpop.f32.mrb[97].mxu0  ;;  %v9474_v52 = vld [vmem:[%s13698_s16 + $0x80] sm:$0xff] }
0x1c83   :  { %v7489_v26 = vmax.f32 %v11741_v56, 0.0  ;;  %v9475_v56 = vld [vmem:[%s13698_s16 + $0x88] sm:$0xff] }
0x1c84   :  { %v7475_v60 = vpop.f32.mrb[98].mxu0 }
0x1c85   :  { %v11615_v22 = vpack.c.bf16 %v7489_v26, %v7488_v59  ;;  %v7477_v61 = vpop.f32.mrb[99].mxu0  ;;  %v11742_v48 = vadd.f32 %v9315_v39, %v7475_v60  ;;  %v11671_v26 = vpack.c.bf16 %v9475_v56, %v9474_v52  ;;  %v9476_v60 = vld [vmem:[%s13698_s16 + $0x90] sm:$0xff] }
0x1c87   :  { %11616 = vmatprep.subr.bf16.mxu1 %v11615_v22  ;;  %v7490_v50 = vmax.f32 %v11742_v48, 0.0 }
0x1c88   :  { %v7480_v4 = vpop.f32.mrb[100].mxu0  ;;  %11618 = vmatpush3.bf16.msra.mxu1 %v11615_v22 }
0x1c89   :  { %v11743_v1 = vadd.f32 %v9315_v39, %v7480_v4  ;;  %v7482_v0 = vpop.f32.mrb[101].mxu0  ;;  %v9449_v39 = vld [vmem:[%s13698_s16 + $0x78] sm:$0xff] }
0x1c8a   :  { %v11659_v49 = vpack.c.bf16 %v9449_v39, %v9448_v2  ;;  %v9479_v0 = vld [vmem:[%s13698_s16 + $0xa8] sm:$0xff] }
0x1c8b   :  { %v7491_v18 = vmax.f32 %v11743_v1, 0.0  ;;  %v9478_v1 = vld [vmem:[%s13698_s16 + $0xa0] sm:$0xff] }
0x1c8d   :  { %v11619_v5 = vpack.c.bf16 %v7491_v18, %v7490_v50 }
0x1c8f   :  { %11620 = vmatprep.subr.bf16.mxu1 %v11619_v5 }
0x1c90   :  { %11622 = vmatpush3.bf16.msra.mxu1 %v11619_v5 }
0x1c91   :  { %11640 = vmatprep.subr.bf16.mxu1 %v11615_v22 }
0x1c93   :  { %10640 = vmatmul.mubr.msk.f32.vlgmr.msra.gmra.mrb[60].mxu1 %vm268_vm1, %v7494_v6  ;;  %v9480_v6 = vld [vmem:[%s13698_s16 + $0xb0] sm:$0xff] }
0x1c94   :  { %11642 = vmatpush3.bf16.msra.mxu1 %v11615_v22  ;;  %10642 = vmatprep.mubr.msk.f32.mxu1 %vm268_vm1, %v7495_v10  ;;  %v9481_v10 = vld [vmem:[%s13698_s16 + $0xb8] sm:$0xff] }
0x1c95   :  { %11644 = vmatprep.subr.bf16.mxu1 %v11619_v5 }
0x1c97   :  { %10643 = vmatmul.mubr.msk.f32.gmra.mrb[62].mxu1 %vm268_vm1, %v7496_v9 }
0x1c98   :  { %11646 = vmatpush3.bf16.msra.mxu1 %v11619_v5  ;;  %10645 = vmatprep.mubr.msk.f32.mxu1 %vm268_vm1, %v7497_v32 }
0x1c99   :  { %11664 = vmatprep.subr.bf16.mxu1 %v11615_v22 }
0x1c9b   :  { %10646 = vmatmul.mubr.msk.f32.gmra.mrb[64].mxu1 %vm268_vm1, %v7498_v30  ;;  %v11683_v30 = vpack.c.bf16 %v9481_v10, %v9480_v6 }
0x1c9c   :  { %10648 = vmatprep.mubr.msk.f32.mxu1 %vm268_vm1, %v7499_v47  ;;  %v9506_v47 = vld [vmem:[%s13698_s16 + $0xc0] sm:$0xff] }
0x1c9f   :  { %10649 = vmatmul.mubr.msk.f32.gmra.mrb[66].mxu1 %vm268_vm1, %v7500_v36  ;;  %v9507_v36 = vld [vmem:[%s13698_s16 + $0xc8] sm:$0xff] }
0x1ca0   :  { %10687 = vmatprep.mubr.msk.f32.mxu1 %vm268_vm1, %v9426_v11 }
0x1ca3   :  { %10688 = vmatmul.mubr.msk.f32.vlgmr.msra.gmra.mrb[68].mxu1 %vm268_vm1, %v9427_v51 }
0x1ca4   :  { %11666 = vmatpush3.bf16.msra.mxu1 %v11615_v22  ;;  %10690 = vmatprep.mubr.msk.f32.mxu1 %vm268_vm1, %v9428_v14  ;;  %v11695_v14 = vpack.c.bf16 %v9507_v36, %v9506_v47 }
0x1ca5   :  { %11668 = vmatprep.subr.bf16.mxu1 %v11619_v5 }
0x1ca7   :  { %10691 = vmatmul.mubr.msk.f32.gmra.mrb[70].mxu1 %vm268_vm1, %v9429_v15  ;;  %v9508_v15 = vld [vmem:[%s13698_s16 + $0xd0] sm:$0xff] }
0x1ca8   :  { %11670 = vmatpush3.bf16.msra.mxu1 %v11619_v5  ;;  %10693 = vmatprep.mubr.msk.f32.mxu1 %vm268_vm1, %v9430_v16  ;;  %v9509_v16 = vld [vmem:[%s13698_s16 + $0xd8] sm:$0xff] }
0x1ca9   :  { %11688 = vmatprep.subr.bf16.mxu1 %v11615_v22 }
0x1cab   :  { %10694 = vmatmul.mubr.msk.f32.gmra.mrb[72].mxu1 %vm268_vm1, %v9431_v46 }
0x1cac   :  { %10696 = vmatprep.mubr.msk.f32.mxu1 %vm268_vm1, %v9432_v21 }
0x1caf   :  { %10697 = vmatmul.mubr.msk.f32.gmra.mrb[74].mxu1 %vm268_vm1, %v9433_v63  ;;  %v11699_v63 = vpack.c.bf16 %v9509_v16, %v9508_v15 }
0x1cb0   :  { %10735 = vmatprep.mubr.msk.f32.mxu1 %vm268_vm1, %v9458_v42  ;;  %v9510_v42 = vld [vmem:[%s13698_s16 + $0xe0] sm:$0xff] }
0x1cb3   :  { %10736 = vmatmul.mubr.msk.f32.vlgmr.msra.gmra.mrb[76].mxu1 %vm268_vm1, %v9459_v23  ;;  %v9511_v23 = vld [vmem:[%s13698_s16 + $0xe8] sm:$0xff] }
0x1cb4   :  { %11690 = vmatpush3.bf16.msra.mxu1 %v11615_v22  ;;  %10738 = vmatprep.mubr.msk.f32.mxu1 %vm268_vm1, %v9460_v24  ;;  %v9477_v22 = vld [vmem:[%s13698_s16 + $0x98] sm:$0xff] }
0x1cb5   :  { %11692 = vmatprep.subr.bf16.mxu1 %v11619_v5  ;;  %v11675_v4 = vpack.c.bf16 %v9477_v22, %v9476_v60 }
0x1cb7   :  { %10739 = vmatmul.mubr.msk.f32.gmra.mrb[78].mxu1 %vm268_vm1, %v9461_v55 }
0x1cb8   :  { %11694 = vmatpush3.bf16.msra.mxu1 %v11619_v5  ;;  %10741 = vmatprep.mubr.msk.f32.mxu1 %vm268_vm1, %v9462_v27  ;;  %v11679_v5 = vpack.c.bf16 %v9479_v0, %v9478_v1  ;;  %v11703_v27 = vpack.c.bf16 %v9511_v23, %v9510_v42 }
0x1cbb   :  { %10742 = vmatmul.mubr.msk.f32.gmra.mrb[80].mxu1 %vm268_vm1, %v9463_v7  ;;  %v9512_v7 = vld [vmem:[%s13698_s16 + $0xf0] sm:$0xff] }
0x1cbc   :  { %10744 = vmatprep.mubr.msk.f32.mxu1 %vm268_vm1, %v9464_v57  ;;  %v9513_v57 = vld [vmem:[%s13698_s16 + $0xf8] sm:$0xff] }
0x1cbf   :  { %10745 = vmatmul.mubr.msk.f32.gmra.mrb[82].mxu1 %vm268_vm1, %v9465_v28 }
0x1cc0   :  { %10783 = vmatprep.mubr.msk.f32.mxu1 %vm268_vm1, %v9490_v29 }
0x1cc3   :  { %10784 = vmatmul.mubr.msk.f32.vlgmr.msra.gmra.mrb[84].mxu1 %vm268_vm1, %v9491_v31  ;;  %v11707_v31 = vpack.c.bf16 %v9513_v57, %v9512_v7 }
0x1cc4   :  { %10786 = vmatprep.mubr.msk.f32.mxu1 %vm268_vm1, %v9492_v3 }
0x1cc7   :  { %10787 = vmatmul.mubr.msk.f32.gmra.mrb[86].mxu1 %vm268_vm1, %v9493_v33 }
0x1cc8   :  { %10789 = vmatprep.mubr.msk.f32.mxu1 %vm268_vm1, %v9494_v35 }
0x1ccb   :  { %10790 = vmatmul.mubr.msk.f32.gmra.mrb[88].mxu1 %vm268_vm1, %v9495_v53 }
0x1ccc   :  { %10792 = vmatprep.mubr.msk.f32.mxu1 %vm268_vm1, %v9496_v54 }
0x1ccf   :  { %10793 = vmatmul.mubr.msk.f32.gmra.mrb[90].mxu1 %vm268_vm1, %v9497_v12 }
0x1d66   :  { %v10641_v38 = vpop.f32.mrb[60].mxu1 }
0x1d67   :  { %v7591_v41 = vpop.f32.mrb[61].mxu1 }
0x1d68   :  { %10667 = vmatprep.mubr.msk.f32.mxu0 %vm166_vm0, %v7591_v41 }
0x1d69   :  { %10668 = vmatmul.mubr.msk.f32.vlgmr.msra.gmra.mrb[126].mxu0 %vm166_vm0, %v10641_v38 }
0x1d6a   :  { %v10644_v44 = vpop.f32.mrb[62].mxu1  ;;  %11650 = vmatpush3.bf16.msra.mxu0 %v11647_v40 }
0x1d6b   :  { %v7601_v37 = vpop.f32.mrb[63].mxu1  ;;  %11652 = vmatprep.subr.bf16.mxu0 %v11651_v8 }
0x1d6c   :  { %10670 = vmatprep.mubr.msk.f32.mxu0 %vm166_vm0, %v7601_v37 }
0x1d6d   :  { %10671 = vmatmul.mubr.msk.f32.gmra.mrb[128].mxu0 %vm166_vm0, %v10644_v44 }
0x1d6e   :  { %v10647_v19 = vpop.f32.mrb[64].mxu1  ;;  %11654 = vmatpush3.bf16.msra.mxu0 %v11651_v8 }
0x1d6f   :  { %v7611_v20 = vpop.f32.mrb[65].mxu1  ;;  %11656 = vmatprep.subr.bf16.mxu0 %v11655_v45 }
0x1d70   :  { %10673 = vmatprep.mubr.msk.f32.mxu0 %vm166_vm0, %v7611_v20 }
0x1d71   :  { %10674 = vmatmul.mubr.msk.f32.gmra.mrb[130].mxu0 %vm166_vm0, %v10647_v19 }
0x1d72   :  { %v10650_v58 = vpop.f32.mrb[66].mxu1  ;;  %11658 = vmatpush3.bf16.msra.mxu0 %v11655_v45 }
0x1d73   :  { %v7621_v59 = vpop.f32.mrb[67].mxu1  ;;  %11660 = vmatprep.subr.bf16.mxu0 %v11659_v49 }
0x1d74   :  { %10676 = vmatprep.mubr.msk.f32.mxu0 %vm166_vm0, %v7621_v59 }
0x1d75   :  { %10677 = vmatmul.mubr.msk.f32.gmra.mrb[132].mxu0 %vm166_vm0, %v10650_v58 }
0x1d76   :  { %v10689_v61 = vpop.f32.mrb[68].mxu1  ;;  %11662 = vmatpush3.bf16.msra.mxu0 %v11659_v49 }
0x1d77   :  { %v7880_v48 = vpop.f32.mrb[69].mxu1  ;;  %11672 = vmatprep.subr.bf16.mxu0 %v11671_v26 }
0x1d78   :  { %10715 = vmatprep.mubr.msk.f32.mxu0 %vm166_vm0, %v7880_v48 }
0x1d79   :  { %10716 = vmatmul.mubr.msk.f32.vlgmr.msra.gmra.mrb[126].mxu0 %vm166_vm0, %v10689_v61 }
0x1d7a   :  { %v10692_v50 = vpop.f32.mrb[70].mxu1  ;;  %11674 = vmatpush3.bf16.msra.mxu0 %v11671_v26 }
0x1d7b   :  { %v7890_v18 = vpop.f32.mrb[71].mxu1  ;;  %11676 = vmatprep.subr.bf16.mxu0 %v11675_v4 }
0x1d7c   :  { %10718 = vmatprep.mubr.msk.f32.mxu0 %vm166_vm0, %v7890_v18 }
0x1d7d   :  { %10719 = vmatmul.mubr.msk.f32.gmra.mrb[128].mxu0 %vm166_vm0, %v10692_v50 }
0x1d7e   :  { %v10695_v9 = vpop.f32.mrb[72].mxu1  ;;  %11678 = vmatpush3.bf16.msra.mxu0 %v11675_v4 }
0x1d7f   :  { %v7900_v32 = vpop.f32.mrb[73].mxu1  ;;  %11680 = vmatprep.subr.bf16.mxu0 %v11679_v5 }
0x1d80   :  { %10721 = vmatprep.mubr.msk.f32.mxu0 %vm166_vm0, %v7900_v32 }
0x1d81   :  { %10722 = vmatmul.mubr.msk.f32.gmra.mrb[130].mxu0 %vm166_vm0, %v10695_v9 }
0x1d82   :  { %v10698_v11 = vpop.f32.mrb[74].mxu1  ;;  %11682 = vmatpush3.bf16.msra.mxu0 %v11679_v5 }
0x1d83   :  { %v7910_v51 = vpop.f32.mrb[75].mxu1  ;;  %11684 = vmatprep.subr.bf16.mxu0 %v11683_v30 }
0x1d84   :  { %10724 = vmatprep.mubr.msk.f32.mxu0 %vm166_vm0, %v7910_v51 }
0x1d85   :  { %10725 = vmatmul.mubr.msk.f32.gmra.mrb[132].mxu0 %vm166_vm0, %v10698_v11 }
0x1d86   :  { %v10737_v46 = vpop.f32.mrb[76].mxu1  ;;  %11686 = vmatpush3.bf16.msra.mxu0 %v11683_v30 }
0x1d87   :  { %v8164_v21 = vpop.f32.mrb[77].mxu1  ;;  %11696 = vmatprep.subr.bf16.mxu0 %v11695_v14 }
0x1d88   :  { %10763 = vmatprep.mubr.msk.f32.mxu0 %vm166_vm0, %v8164_v21 }
0x1d89   :  { %10764 = vmatmul.mubr.msk.f32.vlgmr.msra.gmra.mrb[126].mxu0 %vm166_vm0, %v10737_v46 }
0x1d8a   :  { %v10740_v24 = vpop.f32.mrb[78].mxu1  ;;  %11698 = vmatpush3.bf16.msra.mxu0 %v11695_v14 }
0x1d8b   :  { %v8174_v55 = vpop.f32.mrb[79].mxu1  ;;  %11700 = vmatprep.subr.bf16.mxu0 %v11699_v63 }
0x1d8c   :  { %10766 = vmatprep.mubr.msk.f32.mxu0 %vm166_vm0, %v8174_v55 }
0x1d8d   :  { %10767 = vmatmul.mubr.msk.f32.gmra.mrb[128].mxu0 %vm166_vm0, %v10740_v24 }
0x1d8e   :  { %v10743_v28 = vpop.f32.mrb[80].mxu1  ;;  %11702 = vmatpush3.bf16.msra.mxu0 %v11699_v63 }
0x1d8f   :  { %v8184_v29 = vpop.f32.mrb[81].mxu1  ;;  %11704 = vmatprep.subr.bf16.mxu0 %v11703_v27 }
0x1d90   :  { %10769 = vmatprep.mubr.msk.f32.mxu0 %vm166_vm0, %v8184_v29 }
0x1d91   :  { %10770 = vmatmul.mubr.msk.f32.gmra.mrb[130].mxu0 %vm166_vm0, %v10743_v28 }
0x1d92   :  { %v10746_v3 = vpop.f32.mrb[82].mxu1  ;;  %11706 = vmatpush3.bf16.msra.mxu0 %v11703_v27 }
0x1d93   :  { %v8194_v33 = vpop.f32.mrb[83].mxu1  ;;  %11708 = vmatprep.subr.bf16.mxu0 %v11707_v31 }
0x1d94   :  { %10772 = vmatprep.mubr.msk.f32.mxu0 %vm166_vm0, %v8194_v33 }
0x1d95   :  { %10773 = vmatmul.mubr.msk.f32.gmra.mrb[132].mxu0 %vm166_vm0, %v10746_v3 }
0x1d96   :  { %v10785_v35 = vpop.f32.mrb[84].mxu1  ;;  %11710 = vmatpush3.bf16.msra.mxu0 %v11707_v31 }
0x1d97   :  { %v8448_v53 = vpop.f32.mrb[85].mxu1 }
0x1d98   :  { %10811 = vmatprep.mubr.msk.f32.mxu0 %vm166_vm0, %v8448_v53 }
0x1d99   :  { %10812 = vmatmul.mubr.msk.f32.vlgmr.msra.gmra.mrb[126].mxu0 %vm166_vm0, %v10785_v35 }
0x1d9a   :  { %v10788_v54 = vpop.f32.mrb[86].mxu1 }
0x1d9b   :  { %v8458_v12 = vpop.f32.mrb[87].mxu1 }
0x1d9c   :  { %10814 = vmatprep.mubr.msk.f32.mxu0 %vm166_vm0, %v8458_v12 }
0x1d9d   :  { %10815 = vmatmul.mubr.msk.f32.gmra.mrb[128].mxu0 %vm166_vm0, %v10788_v54 }
0x1d9e   :  { %v10791_v34 = vpop.f32.mrb[88].mxu1 }
0x1d9f   :  { %v8468_v25 = vpop.f32.mrb[89].mxu1 }
0x1da0   :  { %10817 = vmatprep.mubr.msk.f32.mxu0 %vm166_vm0, %v8468_v25 }
0x1da1   :  { %10818 = vmatmul.mubr.msk.f32.gmra.mrb[130].mxu0 %vm166_vm0, %v10791_v34 }
0x1da2   :  { %v10794_v40 = vpop.f32.mrb[90].mxu1 }
0x1da3   :  { %v8478_v62 = vpop.f32.mrb[91].mxu1 }
0x1da4   :  { %10820 = vmatprep.mubr.msk.f32.mxu0 %vm166_vm0, %v8478_v62 }
0x1da5   :  { %10821 = vmatmul.mubr.msk.f32.gmra.mrb[132].mxu0 %vm166_vm0, %v10794_v40 }
0x1da6   :  { %11967 = shalt.err (!%p11964_p4)
}
0x1da7   :  { %s11968_s28 = scalar_lea.hbm %s12260_s27, 32 }
0x1da8   :  { %p11969_p5 = scmp.ne.s32.totalorder %s12260_s27, %s11968_s28  ;;  %p11972_p6 = scmp.lt.u32.totalorder %s11968_s28, %s12260_s27 }
0x1daa   :  { %p11974_p7 = pnand %p11972_p6, %p11969_p5 }
0x1dac   :  { %11977 = shalt.err (!%p11974_p7)
}
0x1dad   :  { %8694 = dma.vmem_to_hbm [thread:$0]  %s8692_s23, 32, %s12260_s27, [#allocation5]  }
0x1dae   :  { %s12068_s1 = smov [#allocation6]  }
0x1daf   :  { %s8701_s2 = sshll.u32 %s12068_s1, 4  ;;  %s8702_s2 = int_to_ptr.vmem [resolvable:$true] %s8701_s2 }
0x1db0   :  { %s11978_s0 = scalar_lea.vmem %s8702_s2, 32  ;;  %p11983_p9 = scmp.lt.s32.totalorder %s8702_s2, %s8702_s2 }
0x1db1   :  { %p11979_p8 = scmp.ne.s32.totalorder %s8702_s2, %s11978_s0  ;;  %p11984_p10 = scmp.lt.s32.totalorder %s11978_s0, %s11978_s0 }
0x1db3   :  { %p11985_p11 = por %p11984_p10, %p11983_p9 }
0x1db5   :  { %p11986_p12 = pnand %p11985_p11, %p11979_p8 }
0x1db7   :  { %11989 = shalt.err (!%p11986_p12)
}
0x1db8   :  { %s11990_s5 = scalar_lea.hbm %s12265_s4, 32 }
0x1db9   :  { %p11991_p13 = scmp.ne.s32.totalorder %s12265_s4, %s11990_s5  ;;  %p11994_p0 = scmp.lt.u32.totalorder %s11990_s5, %s12265_s4 }
0x1dbb   :  { %p11996_p1 = pnand %p11994_p0, %p11991_p13 }
0x1dbd   :  { %11999 = shalt.err (!%p11996_p1)
}
0x1dbe   :  { %8704 = dma.vmem_to_hbm [thread:$0]  %s8702_s2, 32, %s12265_s4, [#allocation5]   ;;  %v9425_v17 = vld [vmem:[%s12250_s6] ss:$0 sm:$0xff] }
0x1dbf   :  { %s12069_s6 = smov [#allocation2]  }
0x1dc0   :  { %s8678_s27 = sshll.u32 %s12069_s6, 4  ;;  %s8679_s27 = int_to_ptr.vmem [resolvable:$true] %s8678_s27 }
0x1dc1   :  { %s12000_s4 = scalar_lea.vmem %s8679_s27, 1024  ;;  %p12005_p3 = scmp.lt.s32.totalorder %s8679_s27, %s8679_s27 }
0x1dc2   :  { %p12001_p2 = scmp.ne.s32.totalorder %s8679_s27, %s12000_s4  ;;  %p12006_p4 = scmp.lt.s32.totalorder %s12000_s4, %s12000_s4 }
0x1dc4   :  { %p12007_p5 = por %p12006_p4, %p12005_p3 }
0x1dc6   :  { %p12008_p6 = pnand %p12007_p5, %p12001_p2 }
0x1e6c   :  { %v10813_v38 = vpop.f32.mrb[126].mxu0 }
0x1e6d   :  { %v11744_v41 = vadd.f32 %v10813_v38, %v9425_v17  ;;  %v8586_v8 = vpop.f32.mrb[127].mxu0 }
0x1e6e   :  { %v11745_v43 = vadd.f32 %v9425_v17, %v8586_v8 }
0x1e6f   :  { %v8634_v13 = vmul.f32 0.5, %v11744_v41 }
0x1e70   :  { %v8633_v44 = vmul.f32 0.5, %v11745_v43  ;;  %v10816_v37 = vpop.f32.mrb[128].mxu0 }
0x1e71   :  { %11940 = vtanh.f32 %v8634_v13  ;;  %v11746_v45 = vadd.f32 %v10816_v37, %v9425_v17  ;;  %v8596_v2 = vpop.f32.mrb[129].mxu0 }
0x1e72   :  { %11942 = vtanh.f32 %v8633_v44  ;;  %v11747_v39 = vadd.f32 %v9425_v17, %v8596_v2 }
0x1e73   :  { %v8636_v19 = vmul.f32 0.5, %v11746_v45 }
0x1e74   :  { %v8635_v20 = vmul.f32 0.5, %v11747_v39  ;;  %v10819_v49 = vpop.f32.mrb[130].mxu0 }
0x1e75   :  { %11944 = vtanh.f32 %v8636_v19  ;;  %v11748_v52 = vadd.f32 %v10819_v49, %v9425_v17  ;;  %v8606_v56 = vpop.f32.mrb[131].mxu0 }
0x1e76   :  { %11946 = vtanh.f32 %v8635_v20  ;;  %v11749_v58 = vadd.f32 %v9425_v17, %v8606_v56 }
0x1e77   :  { %v8638_v59 = vmul.f32 0.5, %v11748_v52 }
0x1e78   :  { %v8637_v26 = vmul.f32 0.5, %v11749_v58  ;;  %v10822_v60 = vpop.f32.mrb[132].mxu0 }
0x1e79   :  { %11948 = vtanh.f32 %v8638_v59  ;;  %v11750_v22 = vadd.f32 %v10822_v60, %v9425_v17  ;;  %v8616_v61 = vpop.f32.mrb[133].mxu0 }
0x1e7a   :  { %11950 = vtanh.f32 %v8637_v26  ;;  %v11751_v48 = vadd.f32 %v9425_v17, %v8616_v61 }
0x1e7b   :  { %v11941_v4 = vpop.eup %11940  ;;  %v8640_v1 = vmul.f32 0.5, %v11750_v22 }
0x1e7c   :  { %v11943_v0 = vpop.eup %11942  ;;  %v8650_v50 = vadd.f32 1.0, %v11941_v4  ;;  %v8639_v18 = vmul.f32 0.5, %v11751_v48 }
0x1e7d   :  { %v8649_v5 = vadd.f32 1.0, %v11943_v0  ;;  %11952 = vtanh.f32 %v8640_v1 }
0x1e7e   :  { %v8658_v6 = vmul.f32 0.5, %v8650_v50  ;;  %11954 = vtanh.f32 %v8639_v18 }
0x1e7f   :  { %v11945_v10 = vpop.eup %11944  ;;  %v8657_v9 = vmul.f32 0.5, %v8649_v5 }
0x1e80   :  { %v11947_v32 = vpop.eup %11946  ;;  %8666 = vst.msk [vmem:[#allocation2 + $0x8] sm:$0xff] %vm268_vm1, %v8658_v6  ;;  %v8652_v30 = vadd.f32 1.0, %v11945_v10 }
0x1e81   :  { %8665 = vst.msk [vmem:[#allocation2] sm:$0xff] %vm268_vm1, %v8657_v9  ;;  %v8651_v47 = vadd.f32 1.0, %v11947_v32 }
0x1e82   :  { %v8660_v36 = vmul.f32 0.5, %v8652_v30 }
0x1e83   :  { %v11949_v11 = vpop.eup %11948  ;;  %v8659_v51 = vmul.f32 0.5, %v8651_v47 }
0x1e84   :  { %v11951_v14 = vpop.eup %11950  ;;  %8668 = vst.msk [vmem:[#allocation2 + $0x18] sm:$0xff] %vm268_vm1, %v8660_v36  ;;  %v8654_v15 = vadd.f32 1.0, %v11949_v11 }
0x1e85   :  { %8667 = vst.msk [vmem:[#allocation2 + $0x10] sm:$0xff] %vm268_vm1, %v8659_v51  ;;  %v8653_v16 = vadd.f32 1.0, %v11951_v14 }
0x1e86   :  { %v8662_v46 = vmul.f32 0.5, %v8654_v15 }
0x1e87   :  { %v11953_v21 = vpop.eup %11952  ;;  %v8661_v63 = vmul.f32 0.5, %v8653_v16 }
0x1e88   :  { %v11955_v42 = vpop.eup %11954  ;;  %8670 = vst.msk [vmem:[#allocation2 + $0x28] sm:$0xff] %vm268_vm1, %v8662_v46  ;;  %v8656_v23 = vadd.f32 1.0, %v11953_v21 }
0x1e89   :  { %8669 = vst.msk [vmem:[#allocation2 + $0x20] sm:$0xff] %vm268_vm1, %v8661_v63  ;;  %v8655_v24 = vadd.f32 1.0, %v11955_v42 }
0x1e8a   :  { %v8664_v55 = vmul.f32 0.5, %v8656_v23 }
0x1e8b   :  { %v8663_v27 = vmul.f32 0.5, %v8655_v24 }
0x1e8c   :  { %8672 = vst.msk [vmem:[#allocation2 + $0x38] sm:$0xff] %vm268_vm1, %v8664_v55 }
0x1e8d   :  { %8671 = vst.msk [vmem:[#allocation2 + $0x30] sm:$0xff] %vm268_vm1, %v8663_v27 }
0x1e8e   :  { %12011 = shalt.err (!%p12008_p6)
}
0x1e8f   :  { %s12012_s9 = scalar_lea.hbm %s12255_s20, 1024 }
0x1e90   :  { %p12013_p7 = scmp.ne.s32.totalorder %s12255_s20, %s12012_s9  ;;  %p12016_p8 = scmp.lt.u32.totalorder %s12012_s9, %s12255_s20 }
0x1e92   :  { %p12018_p9 = pnand %p12016_p8, %p12013_p7 }
0x1e94   :  { %12021 = shalt.err (!%p12018_p9)
}
0x1e95   :  { %s12070_s13 = smov 128   ;;  %s12071_s17 = smov 8  }
0x1e96   :  { %8684 = dma.vmem_to_hbm [thread:$0]  %s8679_s27, 1024, %s12255_s20, [#allocation3], %s12070_s13, %s12070_s13, %s12071_s17  }
0x1e97   :  { %12022 = dma.done.wait [#allocation3], 1024  }
0x1e98   :  { %12023 = vsyncadd [#allocation3], 4294966272 }
0x1e99   :  { %12024 = dma.done.wait [#allocation5], 64  }
0x1e9a   :  { %12025 = vsyncadd [#allocation5], 4294967232 }
0x1e9b   :  { %8714 = vsyncpa [#allocation3], 1 }
0x1e9c   :  { %8715 = vsyncpa [#allocation5], 1 }

</bundles_post_ra>
